<compile_context>
chip_gen: v6e
topology: v6e:2x2x1
jax: 0.10.0
libtpu: 0.0.40
codegen_flags: <defaults>
</compile_context>

<pallas_src>
import jax
import jax.numpy as jnp
import numpy as np
from jax.experimental import pallas as pl
from jax.experimental.pallas import tpu as pltpu

# ---------------- hyperparameters (nn.TransformerEncoderLayer defaults where fixed) ----
INPUT_DIM  = 16
MODEL_DIM  = 32
NUM_HEADS  = 4
NUM_LAYERS = 2
FFN_DIM    = 2048          # nn.TransformerEncoderLayer default dim_feedforward
HEAD_DIM   = MODEL_DIM // NUM_HEADS
LN_EPS     = 1e-5
NEG_INF    = -1e30
# TODO(synk): dropout is stochastic training-time behavior; implemented as identity (eval semantics).

KERNEL_PARAM_ORDER = ["w_in_t", "b_in", "wqkv_t", "bqkv", "wo_t", "bo",
                      "g1", "be1", "w1_t", "b1", "w2_t", "b2", "g2", "be2",
                      "w_out_row", "b_out"]


def _layer_norm(x, gamma, beta):
    mean = jnp.mean(x, axis=-1, keepdims=True)
    var = jnp.mean((x - mean) ** 2, axis=-1, keepdims=True)
    return (x - mean) * jax.lax.rsqrt(var + LN_EPS) * gamma + beta


# ---------------------------------- Pallas kernel ---------------------------------------
def transformer_kernel(x_ref, mask_ref,
                       w_in_ref, b_in_ref, wqkv_ref, bqkv_ref, wo_ref, bo_ref,
                       g1_ref, be1_ref, w1_ref, b1_ref, w2_ref, b2_ref,
                       g2_ref, be2_ref, w_out_ref, b_out_ref, o_ref):
    x = x_ref[...]                                   # (N, INPUT_DIM), N = batch_tile * seq_len
    n_rows = x.shape[0]                              # static
    mask_bias = mask_ref[...]                        # (R, R), R = N * NUM_HEADS, host-precomputed

    # input linear (weights pre-transposed on host: y = x @ W_t + b)
    h = jnp.dot(x, w_in_ref[...], preferred_element_type=jnp.float32) + b_in_ref[...]   # (N, D)

    scale = 1.0 / (HEAD_DIM ** 0.5)
    for l in range(NUM_LAYERS):                      # static unroll over layers
        # ---- fused QKV projection: ONE matmul for all heads of q, k and v ----
        qkv = jnp.dot(h, wqkv_ref[l], preferred_element_type=jnp.float32) + bqkv_ref[l]  # (N, 3D)

        # Carve static 8-lane per-head slices and stack heads on the sublane axis:
        # (R, HEAD_DIM) slabs with row order (head, batch*seq).
        def head_stack(base):
            return jnp.concatenate(
                [qkv[:, base + hh * HEAD_DIM: base + (hh + 1) * HEAD_DIM]
                 for hh in range(NUM_HEADS)], axis=0)
        qr = head_stack(0)
        kr = head_stack(MODEL_DIM)
        vr = head_stack(2 * MODEL_DIM)

        # one big score matmul for all heads & batches; block-diagonal mask keeps them separate
        s = jax.lax.dot_general(qr, kr, (((1,), (1,)), ((), ())),
                                preferred_element_type=jnp.float32)                       # (R, R)
        s = s * scale + mask_bias
        s = s - jnp.max(s, axis=-1, keepdims=True)
        p = jnp.exp(s)
        p = p / jnp.sum(p, axis=-1, keepdims=True)   # exact division; accuracy kept for attention
        ar = jnp.dot(p, vr, preferred_element_type=jnp.float32)                           # (R, hd)

        # re-assemble heads on the feature (lane) axis, then output projection
        attn = jnp.concatenate(
            [ar[hh * n_rows:(hh + 1) * n_rows, :] for hh in range(NUM_HEADS)], axis=1)    # (N, D)
        attn = jnp.dot(attn, wo_ref[l], preferred_element_type=jnp.float32) + bo_ref[l]

        # post-LN residual 1
        h = _layer_norm(h + attn, g1_ref[l], be1_ref[l])

        # ---- feed-forward (ReLU): bf16 weights/inputs on the MXU, f32 accumulation ----
        ff = jnp.dot(h.astype(jnp.bfloat16), w1_ref[l],
                     preferred_element_type=jnp.float32) + b1_ref[l]
        ff = jnp.maximum(ff, 0.0)
        ff = jnp.dot(ff.astype(jnp.bfloat16), w2_ref[l],
                     preferred_element_type=jnp.float32) + b2_ref[l]

        # post-LN residual 2
        h = _layer_norm(h + ff, g2_ref[l], be2_ref[l])

    # final MODEL_DIM -> 1 projection folded into the kernel (broadcast-mul + lane reduce;
    # avoids a degenerate 1-column MXU matmul and extra XLA dispatches in the wrapper)
    o_ref[...] = jnp.sum(h * w_out_ref[...], axis=-1, keepdims=True) + b_out_ref[...]


# ---------------------------------- host-side weight prep -------------------------------
def prepare_kernel_params(p):
    """Pre-transpose weights for `x @ W` form; fuse QKV; bf16 FFN weights (free host-side work)."""
    return {
        "w_in_t":  p["w_in"].T,                          # (INPUT_DIM, D)
        "b_in":    p["b_in"],                            # (1, D)
        "wqkv_t":  jnp.transpose(p["wqkv"], (0, 2, 1)),  # (L, D, 3D); cols = [q | k | v], head-major
        "bqkv":    p["bqkv"][:, None, :],                # (L, 1, 3D)
        "wo_t":    jnp.transpose(p["wo"], (0, 2, 1)),    # (L, D, D)
        "bo":      p["bo"][:, None, :],                  # (L, 1, D)
        "g1":      p["g1"][:, None, :], "be1": p["be1"][:, None, :],
        "w1_t":    jnp.transpose(p["w1"], (0, 2, 1)).astype(jnp.bfloat16),   # (L, D, FFN) bf16
        "b1":      p["b1"][:, None, :],                  # (L, 1, FFN)
        "w2_t":    jnp.transpose(p["w2"], (0, 2, 1)).astype(jnp.bfloat16),   # (L, FFN, D) bf16
        "b2":      p["b2"][:, None, :],                  # (L, 1, D)
        "g2":      p["g2"][:, None, :], "be2": p["be2"][:, None, :],
        "w_out_row": p["w_out"],                         # (1, D)
        "b_out":   p["b_out"],                           # (1, 1)
    }


def _make_attention_mask(tile_rows, seq_len):
    """Block-diagonal (head, batch) additive bias; row r = head * tile_rows + (b * S + s)."""
    r_rows = tile_rows * NUM_HEADS
    r = np.arange(r_rows)
    head = r // tile_rows
    batch = (r % tile_rows) // seq_len
    same = (head[:, None] == head[None, :]) & (batch[:, None] == batch[None, :])
    return jnp.asarray(np.where(same, 0.0, NEG_INF).astype(np.float32))


# ---------------------------------- wrapper ---------------------------------------------
def transformer_forward(src, params, batch_tile=None):
    """src: (S, B, INPUT_DIM) float32 (PyTorch seq-major). Returns (S, B, 1)."""
    S, B, _ = src.shape
    if batch_tile is None:
        batch_tile = B          # fold the whole batch into one grid step (best on v5e/v6e/v7x)
    assert B % batch_tile == 0
    n_tiles = B // batch_tile
    tile_rows = batch_tile * S
    assert n_tiles == 1 or tile_rows % 8 == 0

    x = jnp.transpose(src, (1, 0, 2)).reshape(B * S, INPUT_DIM)       # (B*S, INPUT_DIM), row = b*S + s

    mask_bias = _make_attention_mask(tile_rows, S)                    # (R, R) host-precomputed
    kp = prepare_kernel_params(params)
    weight_args = [kp[k] for k in KERNEL_PARAM_ORDER]

    def full_spec(a):  # invariant block: whole array, constant index map
        return pl.BlockSpec(a.shape, lambda i, _nd=a.ndim: (0,) * _nd)

    in_specs = [pl.BlockSpec((tile_rows, INPUT_DIM), lambda i: (i, 0)),
                full_spec(mask_bias)]
    in_specs += [full_spec(w) for w in weight_args]

    out = pl.pallas_call(
        transformer_kernel,
        out_shape=jax.ShapeDtypeStruct((B * S, 1), jnp.float32),
        grid_spec=pltpu.PrefetchScalarGridSpec(
            num_scalar_prefetch=0,
            grid=(n_tiles,),
            in_specs=in_specs,
            out_specs=pl.BlockSpec((tile_rows, 1), lambda i: (i, 0)),
        ),
        compiler_params=pltpu.CompilerParams(
            # single-core: splitting tiles across TCs would re-DMA all weights per core
            dimension_semantics=("arbitrary",),
            vmem_limit_bytes=16 << 20,
        ),
    )(x, mask_bias, *weight_args)

    return jnp.transpose(out.reshape(B, S, 1), (1, 0, 2))             # (S, B, 1)


# ---------------------------------- params & reference ----------------------------------
def init_params(key):
    keys = jax.random.split(key, 12)

    def rnd(k, shape, scale=0.05):
        return jax.random.normal(k, shape, jnp.float32) * scale

    p = {
        "w_in":  rnd(keys[0], (MODEL_DIM, INPUT_DIM)),
        "b_in":  rnd(keys[1], (1, MODEL_DIM)),
        "wqkv":  rnd(keys[2], (NUM_LAYERS, 3 * MODEL_DIM, MODEL_DIM)),
        "bqkv":  rnd(keys[3], (NUM_LAYERS, 3 * MODEL_DIM)),
        "wo":    rnd(keys[4], (NUM_LAYERS, MODEL_DIM, MODEL_DIM)),
        "bo":    rnd(keys[5], (NUM_LAYERS, MODEL_DIM)),
        "g1":    jnp.ones((NUM_LAYERS, MODEL_DIM), jnp.float32),
        "be1":   jnp.zeros((NUM_LAYERS, MODEL_DIM), jnp.float32),
        "w1":    rnd(keys[6], (NUM_LAYERS, FFN_DIM, MODEL_DIM)),
        "b1":    rnd(keys[7], (NUM_LAYERS, FFN_DIM)),
        "w2":    rnd(keys[8], (NUM_LAYERS, MODEL_DIM, FFN_DIM)),
        "b2":    rnd(keys[9], (NUM_LAYERS, MODEL_DIM)),
        "g2":    jnp.ones((NUM_LAYERS, MODEL_DIM), jnp.float32),
        "be2":   jnp.zeros((NUM_LAYERS, MODEL_DIM), jnp.float32),
        "w_out": rnd(keys[10], (1, MODEL_DIM)),
        "b_out": rnd(keys[11], (1, 1)),
    }
    return p


def reference_forward(src, p):
    x = jnp.transpose(src, (1, 0, 2))
    h = x @ p["w_in"].T + p["b_in"]
    scale = 1.0 / (HEAD_DIM ** 0.5)
    B, S, _ = h.shape
    for l in range(NUM_LAYERS):
        qkv = h @ p["wqkv"][l].T + p["bqkv"][l]
        q, k, v = jnp.split(qkv, 3, axis=-1)
        qh = q.reshape(B, S, NUM_HEADS, HEAD_DIM).transpose(0, 2, 1, 3)
        kh = k.reshape(B, S, NUM_HEADS, HEAD_DIM).transpose(0, 2, 1, 3)
        vh = v.reshape(B, S, NUM_HEADS, HEAD_DIM).transpose(0, 2, 1, 3)
        s = jnp.einsum('bhqd,bhkd->bhqk', qh, kh) * scale
        pr = jax.nn.softmax(s, axis=-1)
        attn = jnp.einsum('bhqk,bhkd->bhqd', pr, vh).transpose(0, 2, 1, 3).reshape(B, S, MODEL_DIM)
        attn = attn @ p["wo"][l].T + p["bo"][l]
        h = _layer_norm(h + attn, p["g1"][l], p["be1"][l])
        ff = jax.nn.relu(h @ p["w1"][l].T + p["b1"][l]) @ p["w2"][l].T + p["b2"][l]
        h = _layer_norm(h + ff, p["g2"][l], p["be2"][l])
    out = h @ p["w_out"].T + p["b_out"]
    return jnp.transpose(out, (1, 0, 2))


if __name__ == "__main__":
    key = jax.random.PRNGKey(0)
    pkey, xkey = jax.random.split(key)
    params = init_params(pkey)

    S, B = 8, 2
    src = jax.random.normal(xkey, (S, B, INPUT_DIM), jnp.float32)

    out = transformer_forward(src, params)
    out = jax.block_until_ready(out)
    assert out.shape == (S, B, 1), out.shape

    ref = reference_forward(src, params)
    # bf16 FFN weights (f32 accumulation): tolerance relaxed from 1e-4 to 1e-2 (observed ~1e-3).
    np.testing.assert_allclose(np.asarray(out), np.asarray(ref), rtol=1e-2, atol=1e-2)

    print("KERNEL_OK")
</pallas_src>

<mosaic_0001>
module attributes {stable_mosaic.version = 11 : i64} {
  func.func @transformer_kernel(%arg0: i32, %arg1: memref<16x16xf32, #tpu.memory_space<vmem>>, %arg2: memref<64x64xf32, #tpu.memory_space<vmem>>, %arg3: memref<16x32xf32, #tpu.memory_space<vmem>>, %arg4: memref<1x32xf32, #tpu.memory_space<vmem>>, %arg5: memref<2x32x96xf32, #tpu.memory_space<vmem>>, %arg6: memref<2x1x96xf32, #tpu.memory_space<vmem>>, %arg7: memref<2x32x32xf32, #tpu.memory_space<vmem>>, %arg8: memref<2x1x32xf32, #tpu.memory_space<vmem>>, %arg9: memref<2x1x32xf32, #tpu.memory_space<vmem>>, %arg10: memref<2x1x32xf32, #tpu.memory_space<vmem>>, %arg11: memref<2x32x2048xbf16, #tpu.memory_space<vmem>>, %arg12: memref<2x1x2048xf32, #tpu.memory_space<vmem>>, %arg13: memref<2x2048x32xbf16, #tpu.memory_space<vmem>>, %arg14: memref<2x1x32xf32, #tpu.memory_space<vmem>>, %arg15: memref<2x1x32xf32, #tpu.memory_space<vmem>>, %arg16: memref<2x1x32xf32, #tpu.memory_space<vmem>>, %arg17: memref<1x32xf32, #tpu.memory_space<vmem>>, %arg18: memref<1x1xf32, #tpu.memory_space<vmem>>, %arg19: memref<16x1xf32, #tpu.memory_space<vmem>>) attributes {dimension_semantics = [#tpu.dimension_semantics<arbitrary>], iteration_bounds = array<i64: 1>, scalar_prefetch = 0 : i64, scratch_operands = 0 : i64, tpu.core_type = #tpu.core_type<tc>, window_params = [{transform_indices = @transform_0, window_bounds = array<i64: 16, 16>}, {pipeline_mode = #tpu.pipeline_mode<synchronous>, transform_indices = @transform_1, window_bounds = array<i64: 64, 64>}, {pipeline_mode = #tpu.pipeline_mode<synchronous>, transform_indices = @transform_2, window_bounds = array<i64: 16, 32>}, {pipeline_mode = #tpu.pipeline_mode<synchronous>, transform_indices = @transform_3, window_bounds = array<i64: 1, 32>}, {pipeline_mode = #tpu.pipeline_mode<synchronous>, transform_indices = @transform_4, window_bounds = array<i64: 2, 32, 96>}, {pipeline_mode = #tpu.pipeline_mode<synchronous>, transform_indices = @transform_5, window_bounds = array<i64: 2, 1, 96>}, {pipeline_mode = #tpu.pipeline_mode<synchronous>, transform_indices = @transform_6, window_bounds = array<i64: 2, 32, 32>}, {pipeline_mode = #tpu.pipeline_mode<synchronous>, transform_indices = @transform_7, window_bounds = array<i64: 2, 1, 32>}, {pipeline_mode = #tpu.pipeline_mode<synchronous>, transform_indices = @transform_8, window_bounds = array<i64: 2, 1, 32>}, {pipeline_mode = #tpu.pipeline_mode<synchronous>, transform_indices = @transform_9, window_bounds = array<i64: 2, 1, 32>}, {pipeline_mode = #tpu.pipeline_mode<synchronous>, transform_indices = @transform_10, window_bounds = array<i64: 2, 32, 2048>}, {pipeline_mode = #tpu.pipeline_mode<synchronous>, transform_indices = @transform_11, window_bounds = array<i64: 2, 1, 2048>}, {pipeline_mode = #tpu.pipeline_mode<synchronous>, transform_indices = @transform_12, window_bounds = array<i64: 2, 2048, 32>}, {pipeline_mode = #tpu.pipeline_mode<synchronous>, transform_indices = @transform_13, window_bounds = array<i64: 2, 1, 32>}, {pipeline_mode = #tpu.pipeline_mode<synchronous>, transform_indices = @transform_14, window_bounds = array<i64: 2, 1, 32>}, {pipeline_mode = #tpu.pipeline_mode<synchronous>, transform_indices = @transform_15, window_bounds = array<i64: 2, 1, 32>}, {pipeline_mode = #tpu.pipeline_mode<synchronous>, transform_indices = @transform_16, window_bounds = array<i64: 1, 32>}, {pipeline_mode = #tpu.pipeline_mode<synchronous>, transform_indices = @transform_17, window_bounds = array<i64: 1, 1>}, {transform_indices = @transform_18, window_bounds = array<i64: 16, 1>}]} {
    %c0 = arith.constant 0 : index
    %c0_0 = arith.constant 0 : index
    %0 = vector.load %arg1[%c0, %c0_0] : memref<16x16xf32, #tpu.memory_space<vmem>>, vector<16x16xf32>
    %c0_1 = arith.constant 0 : index
    %c0_2 = arith.constant 0 : index
    %1 = vector.load %arg2[%c0_1, %c0_2] : memref<64x64xf32, #tpu.memory_space<vmem>>, vector<64x64xf32>
    %c0_3 = arith.constant 0 : index
    %c0_4 = arith.constant 0 : index
    %2 = vector.load %arg3[%c0_3, %c0_4] : memref<16x32xf32, #tpu.memory_space<vmem>>, vector<16x32xf32>
    %cst = arith.constant dense<0.000000e+00> : vector<16x32xf32>
    %3 = tpu.matmul %0, %2, %cst {dimension_numbers = #tpu.dot_dimension_numbers<[1], [0], [0], [1], [0, 0, 1, 1], [], []>} : vector<16x16xf32>, vector<16x32xf32>, vector<16x32xf32> -> vector<16x32xf32>
    %c0_5 = arith.constant 0 : index
    %c0_6 = arith.constant 0 : index
    %4 = vector.load %arg4[%c0_5, %c0_6] : memref<1x32xf32, #tpu.memory_space<vmem>>, vector<1x32xf32>
    %5 = vector.broadcast %4 : vector<1x32xf32> to vector<16x32xf32>
    %6 = arith.addf %3, %5 : vector<16x32xf32>
    %c0_7 = arith.constant 0 : index
    %c0_8 = arith.constant 0 : index
    %c0_9 = arith.constant 0 : index
    %7 = vector.load %arg5[%c0_7, %c0_8, %c0_9] : memref<2x32x96xf32, #tpu.memory_space<vmem>>, vector<1x32x96xf32>
    %8 = vector.shape_cast %7 : vector<1x32x96xf32> to vector<32x96xf32>
    %cst_10 = arith.constant dense<0.000000e+00> : vector<16x96xf32>
    %9 = tpu.matmul %6, %8, %cst_10 {dimension_numbers = #tpu.dot_dimension_numbers<[1], [0], [0], [1], [0, 0, 1, 1], [], []>} : vector<16x32xf32>, vector<32x96xf32>, vector<16x96xf32> -> vector<16x96xf32>
    %c0_11 = arith.constant 0 : index
    %c0_12 = arith.constant 0 : index
    %c0_13 = arith.constant 0 : index
    %10 = vector.load %arg6[%c0_11, %c0_12, %c0_13] : memref<2x1x96xf32, #tpu.memory_space<vmem>>, vector<1x1x96xf32>
    %11 = vector.shape_cast %10 : vector<1x1x96xf32> to vector<1x96xf32>
    %12 = vector.broadcast %11 : vector<1x96xf32> to vector<16x96xf32>
    %13 = arith.addf %9, %12 : vector<16x96xf32>
    %14 = vector.extract_strided_slice %13 {offsets = [0, 0], sizes = [16, 8], strides = [1, 1]} : vector<16x96xf32> to vector<16x8xf32>
    %15 = vector.extract_strided_slice %13 {offsets = [0, 8], sizes = [16, 8], strides = [1, 1]} : vector<16x96xf32> to vector<16x8xf32>
    %16 = vector.extract_strided_slice %13 {offsets = [0, 16], sizes = [16, 8], strides = [1, 1]} : vector<16x96xf32> to vector<16x8xf32>
    %17 = vector.extract_strided_slice %13 {offsets = [0, 24], sizes = [16, 8], strides = [1, 1]} : vector<16x96xf32> to vector<16x8xf32>
    %18 = tpu.concatenate %14, %15, %16, %17 in 0 : vector<16x8xf32>, vector<16x8xf32>, vector<16x8xf32>, vector<16x8xf32> -> vector<64x8xf32>
    %19 = vector.extract_strided_slice %13 {offsets = [0, 32], sizes = [16, 8], strides = [1, 1]} : vector<16x96xf32> to vector<16x8xf32>
    %20 = vector.extract_strided_slice %13 {offsets = [0, 40], sizes = [16, 8], strides = [1, 1]} : vector<16x96xf32> to vector<16x8xf32>
    %21 = vector.extract_strided_slice %13 {offsets = [0, 48], sizes = [16, 8], strides = [1, 1]} : vector<16x96xf32> to vector<16x8xf32>
    %22 = vector.extract_strided_slice %13 {offsets = [0, 56], sizes = [16, 8], strides = [1, 1]} : vector<16x96xf32> to vector<16x8xf32>
    %23 = tpu.concatenate %19, %20, %21, %22 in 0 : vector<16x8xf32>, vector<16x8xf32>, vector<16x8xf32>, vector<16x8xf32> -> vector<64x8xf32>
    %24 = vector.extract_strided_slice %13 {offsets = [0, 64], sizes = [16, 8], strides = [1, 1]} : vector<16x96xf32> to vector<16x8xf32>
    %25 = vector.extract_strided_slice %13 {offsets = [0, 72], sizes = [16, 8], strides = [1, 1]} : vector<16x96xf32> to vector<16x8xf32>
    %26 = vector.extract_strided_slice %13 {offsets = [0, 80], sizes = [16, 8], strides = [1, 1]} : vector<16x96xf32> to vector<16x8xf32>
    %27 = vector.extract_strided_slice %13 {offsets = [0, 88], sizes = [16, 8], strides = [1, 1]} : vector<16x96xf32> to vector<16x8xf32>
    %28 = tpu.concatenate %24, %25, %26, %27 in 0 : vector<16x8xf32>, vector<16x8xf32>, vector<16x8xf32>, vector<16x8xf32> -> vector<64x8xf32>
    %cst_14 = arith.constant dense<0.000000e+00> : vector<64x64xf32>
    %29 = tpu.matmul %18, %23, %cst_14 {dimension_numbers = #tpu.dot_dimension_numbers<[1], [1], [0], [0], [0, 0, 1, 0], [], []>} : vector<64x8xf32>, vector<64x8xf32>, vector<64x64xf32> -> vector<64x64xf32>
    %cst_15 = arith.constant 0.353553385 : f32
    %30 = vector.broadcast %cst_15 : f32 to vector<64x64xf32>
    %31 = arith.mulf %29, %30 : vector<64x64xf32>
    %32 = arith.addf %31, %1 : vector<64x64xf32>
    %cst_16 = arith.constant dense<0xFF800000> : vector<64xf32>
    %33 = vector.multi_reduction <maximumf>, %32, %cst_16 [1] : vector<64x64xf32> to vector<64xf32>
    %34 = vector.shape_cast %33 : vector<64xf32> to vector<64x1xf32>
    %35 = vector.broadcast %34 : vector<64x1xf32> to vector<64x64xf32>
    %36 = arith.subf %32, %35 : vector<64x64xf32>
    %37 = math.exp %36 : vector<64x64xf32>
    %cst_17 = arith.constant dense<0.000000e+00> : vector<64xf32>
    %38 = vector.multi_reduction <add>, %37, %cst_17 [1] : vector<64x64xf32> to vector<64xf32>
    %39 = vector.shape_cast %38 : vector<64xf32> to vector<64x1xf32>
    %40 = vector.broadcast %39 : vector<64x1xf32> to vector<64x64xf32>
    %41 = arith.divf %37, %40 : vector<64x64xf32>
    %cst_18 = arith.constant dense<0.000000e+00> : vector<64x8xf32>
    %42 = tpu.matmul %41, %28, %cst_18 {dimension_numbers = #tpu.dot_dimension_numbers<[1], [0], [0], [1], [0, 0, 1, 1], [], []>} : vector<64x64xf32>, vector<64x8xf32>, vector<64x8xf32> -> vector<64x8xf32>
    %43 = vector.extract_strided_slice %42 {offsets = [0, 0], sizes = [16, 8], strides = [1, 1]} : vector<64x8xf32> to vector<16x8xf32>
    %44 = vector.extract_strided_slice %42 {offsets = [16, 0], sizes = [16, 8], strides = [1, 1]} : vector<64x8xf32> to vector<16x8xf32>
    %45 = vector.extract_strided_slice %42 {offsets = [32, 0], sizes = [16, 8], strides = [1, 1]} : vector<64x8xf32> to vector<16x8xf32>
    %46 = vector.extract_strided_slice %42 {offsets = [48, 0], sizes = [16, 8], strides = [1, 1]} : vector<64x8xf32> to vector<16x8xf32>
    %47 = tpu.concatenate %43, %44, %45, %46 in 1 : vector<16x8xf32>, vector<16x8xf32>, vector<16x8xf32>, vector<16x8xf32> -> vector<16x32xf32>
    %c0_19 = arith.constant 0 : index
    %c0_20 = arith.constant 0 : index
    %c0_21 = arith.constant 0 : index
    %48 = vector.load %arg7[%c0_19, %c0_20, %c0_21] : memref<2x32x32xf32, #tpu.memory_space<vmem>>, vector<1x32x32xf32>
    %49 = vector.shape_cast %48 : vector<1x32x32xf32> to vector<32x32xf32>
    %cst_22 = arith.constant dense<0.000000e+00> : vector<16x32xf32>
    %50 = tpu.matmul %47, %49, %cst_22 {dimension_numbers = #tpu.dot_dimension_numbers<[1], [0], [0], [1], [0, 0, 1, 1], [], []>} : vector<16x32xf32>, vector<32x32xf32>, vector<16x32xf32> -> vector<16x32xf32>
    %c0_23 = arith.constant 0 : index
    %c0_24 = arith.constant 0 : index
    %c0_25 = arith.constant 0 : index
    %51 = vector.load %arg8[%c0_23, %c0_24, %c0_25] : memref<2x1x32xf32, #tpu.memory_space<vmem>>, vector<1x1x32xf32>
    %52 = vector.shape_cast %51 : vector<1x1x32xf32> to vector<1x32xf32>
    %53 = vector.broadcast %52 : vector<1x32xf32> to vector<16x32xf32>
    %54 = arith.addf %50, %53 : vector<16x32xf32>
    %55 = arith.addf %6, %54 : vector<16x32xf32>
    %c0_26 = arith.constant 0 : index
    %c0_27 = arith.constant 0 : index
    %c0_28 = arith.constant 0 : index
    %56 = vector.load %arg9[%c0_26, %c0_27, %c0_28] : memref<2x1x32xf32, #tpu.memory_space<vmem>>, vector<1x1x32xf32>
    %57 = vector.shape_cast %56 : vector<1x1x32xf32> to vector<1x32xf32>
    %c0_29 = arith.constant 0 : index
    %c0_30 = arith.constant 0 : index
    %c0_31 = arith.constant 0 : index
    %58 = vector.load %arg10[%c0_29, %c0_30, %c0_31] : memref<2x1x32xf32, #tpu.memory_space<vmem>>, vector<1x1x32xf32>
    %59 = vector.shape_cast %58 : vector<1x1x32xf32> to vector<1x32xf32>
    %cst_32 = arith.constant dense<0.000000e+00> : vector<16xf32>
    %60 = vector.multi_reduction <add>, %55, %cst_32 [1] : vector<16x32xf32> to vector<16xf32>
    %61 = vector.shape_cast %60 : vector<16xf32> to vector<16x1xf32>
    %cst_33 = arith.constant 3.200000e+01 : f32
    %62 = vector.broadcast %cst_33 : f32 to vector<16x1xf32>
    %63 = arith.divf %61, %62 : vector<16x1xf32>
    %64 = vector.broadcast %63 : vector<16x1xf32> to vector<16x32xf32>
    %65 = arith.subf %55, %64 : vector<16x32xf32>
    %66 = arith.mulf %65, %65 : vector<16x32xf32>
    %cst_34 = arith.constant dense<0.000000e+00> : vector<16xf32>
    %67 = vector.multi_reduction <add>, %66, %cst_34 [1] : vector<16x32xf32> to vector<16xf32>
    %68 = vector.shape_cast %67 : vector<16xf32> to vector<16x1xf32>
    %cst_35 = arith.constant 3.200000e+01 : f32
    %69 = vector.broadcast %cst_35 : f32 to vector<16x1xf32>
    %70 = arith.divf %68, %69 : vector<16x1xf32>
    %71 = vector.broadcast %63 : vector<16x1xf32> to vector<16x32xf32>
    %72 = arith.subf %55, %71 : vector<16x32xf32>
    %cst_36 = arith.constant 9.99999974E-6 : f32
    %73 = vector.broadcast %cst_36 : f32 to vector<16x1xf32>
    %74 = arith.addf %70, %73 : vector<16x1xf32>
    %75 = math.rsqrt %74 : vector<16x1xf32>
    %76 = vector.broadcast %75 : vector<16x1xf32> to vector<16x32xf32>
    %77 = arith.mulf %72, %76 : vector<16x32xf32>
    %78 = vector.broadcast %57 : vector<1x32xf32> to vector<16x32xf32>
    %79 = arith.mulf %77, %78 : vector<16x32xf32>
    %80 = vector.broadcast %59 : vector<1x32xf32> to vector<16x32xf32>
    %81 = arith.addf %79, %80 : vector<16x32xf32>
    %82 = arith.truncf %81 : vector<16x32xf32> to vector<16x32xbf16>
    %c0_37 = arith.constant 0 : index
    %c0_38 = arith.constant 0 : index
    %c0_39 = arith.constant 0 : index
    %83 = vector.load %arg11[%c0_37, %c0_38, %c0_39] : memref<2x32x2048xbf16, #tpu.memory_space<vmem>>, vector<1x32x2048xbf16>
    %84 = vector.shape_cast %83 : vector<1x32x2048xbf16> to vector<32x2048xbf16>
    %cst_40 = arith.constant dense<0.000000e+00> : vector<16x2048xf32>
    %85 = tpu.matmul %82, %84, %cst_40 {dimension_numbers = #tpu.dot_dimension_numbers<[1], [0], [0], [1], [0, 0, 1, 1], [], []>} : vector<16x32xbf16>, vector<32x2048xbf16>, vector<16x2048xf32> -> vector<16x2048xf32>
    %c0_41 = arith.constant 0 : index
    %c0_42 = arith.constant 0 : index
    %c0_43 = arith.constant 0 : index
    %86 = vector.load %arg12[%c0_41, %c0_42, %c0_43] : memref<2x1x2048xf32, #tpu.memory_space<vmem>>, vector<1x1x2048xf32>
    %87 = vector.shape_cast %86 : vector<1x1x2048xf32> to vector<1x2048xf32>
    %88 = vector.broadcast %87 : vector<1x2048xf32> to vector<16x2048xf32>
    %89 = arith.addf %85, %88 : vector<16x2048xf32>
    %cst_44 = arith.constant 0.000000e+00 : f32
    %90 = vector.broadcast %cst_44 : f32 to vector<16x2048xf32>
    %91 = arith.maximumf %89, %90 : vector<16x2048xf32>
    %92 = arith.truncf %91 : vector<16x2048xf32> to vector<16x2048xbf16>
    %c0_45 = arith.constant 0 : index
    %c0_46 = arith.constant 0 : index
    %c0_47 = arith.constant 0 : index
    %93 = vector.load %arg13[%c0_45, %c0_46, %c0_47] : memref<2x2048x32xbf16, #tpu.memory_space<vmem>>, vector<1x2048x32xbf16>
    %94 = vector.shape_cast %93 : vector<1x2048x32xbf16> to vector<2048x32xbf16>
    %cst_48 = arith.constant dense<0.000000e+00> : vector<16x32xf32>
    %95 = tpu.matmul %92, %94, %cst_48 {dimension_numbers = #tpu.dot_dimension_numbers<[1], [0], [0], [1], [0, 0, 1, 1], [], []>} : vector<16x2048xbf16>, vector<2048x32xbf16>, vector<16x32xf32> -> vector<16x32xf32>
    %c0_49 = arith.constant 0 : index
    %c0_50 = arith.constant 0 : index
    %c0_51 = arith.constant 0 : index
    %96 = vector.load %arg14[%c0_49, %c0_50, %c0_51] : memref<2x1x32xf32, #tpu.memory_space<vmem>>, vector<1x1x32xf32>
    %97 = vector.shape_cast %96 : vector<1x1x32xf32> to vector<1x32xf32>
    %98 = vector.broadcast %97 : vector<1x32xf32> to vector<16x32xf32>
    %99 = arith.addf %95, %98 : vector<16x32xf32>
    %100 = arith.addf %81, %99 : vector<16x32xf32>
    %c0_52 = arith.constant 0 : index
    %c0_53 = arith.constant 0 : index
    %c0_54 = arith.constant 0 : index
    %101 = vector.load %arg15[%c0_52, %c0_53, %c0_54] : memref<2x1x32xf32, #tpu.memory_space<vmem>>, vector<1x1x32xf32>
    %102 = vector.shape_cast %101 : vector<1x1x32xf32> to vector<1x32xf32>
    %c0_55 = arith.constant 0 : index
    %c0_56 = arith.constant 0 : index
    %c0_57 = arith.constant 0 : index
    %103 = vector.load %arg16[%c0_55, %c0_56, %c0_57] : memref<2x1x32xf32, #tpu.memory_space<vmem>>, vector<1x1x32xf32>
    %104 = vector.shape_cast %103 : vector<1x1x32xf32> to vector<1x32xf32>
    %cst_58 = arith.constant dense<0.000000e+00> : vector<16xf32>
    %105 = vector.multi_reduction <add>, %100, %cst_58 [1] : vector<16x32xf32> to vector<16xf32>
    %106 = vector.shape_cast %105 : vector<16xf32> to vector<16x1xf32>
    %cst_59 = arith.constant 3.200000e+01 : f32
    %107 = vector.broadcast %cst_59 : f32 to vector<16x1xf32>
    %108 = arith.divf %106, %107 : vector<16x1xf32>
    %109 = vector.broadcast %108 : vector<16x1xf32> to vector<16x32xf32>
    %110 = arith.subf %100, %109 : vector<16x32xf32>
    %111 = arith.mulf %110, %110 : vector<16x32xf32>
    %cst_60 = arith.constant dense<0.000000e+00> : vector<16xf32>
    %112 = vector.multi_reduction <add>, %111, %cst_60 [1] : vector<16x32xf32> to vector<16xf32>
    %113 = vector.shape_cast %112 : vector<16xf32> to vector<16x1xf32>
    %cst_61 = arith.constant 3.200000e+01 : f32
    %114 = vector.broadcast %cst_61 : f32 to vector<16x1xf32>
    %115 = arith.divf %113, %114 : vector<16x1xf32>
    %116 = vector.broadcast %108 : vector<16x1xf32> to vector<16x32xf32>
    %117 = arith.subf %100, %116 : vector<16x32xf32>
    %cst_62 = arith.constant 9.99999974E-6 : f32
    %118 = vector.broadcast %cst_62 : f32 to vector<16x1xf32>
    %119 = arith.addf %115, %118 : vector<16x1xf32>
    %120 = math.rsqrt %119 : vector<16x1xf32>
    %121 = vector.broadcast %120 : vector<16x1xf32> to vector<16x32xf32>
    %122 = arith.mulf %117, %121 : vector<16x32xf32>
    %123 = vector.broadcast %102 : vector<1x32xf32> to vector<16x32xf32>
    %124 = arith.mulf %122, %123 : vector<16x32xf32>
    %125 = vector.broadcast %104 : vector<1x32xf32> to vector<16x32xf32>
    %126 = arith.addf %124, %125 : vector<16x32xf32>
    %c1 = arith.constant 1 : index
    %c0_63 = arith.constant 0 : index
    %c0_64 = arith.constant 0 : index
    %127 = vector.load %arg5[%c1, %c0_63, %c0_64] : memref<2x32x96xf32, #tpu.memory_space<vmem>>, vector<1x32x96xf32>
    %128 = vector.shape_cast %127 : vector<1x32x96xf32> to vector<32x96xf32>
    %cst_65 = arith.constant dense<0.000000e+00> : vector<16x96xf32>
    %129 = tpu.matmul %126, %128, %cst_65 {dimension_numbers = #tpu.dot_dimension_numbers<[1], [0], [0], [1], [0, 0, 1, 1], [], []>} : vector<16x32xf32>, vector<32x96xf32>, vector<16x96xf32> -> vector<16x96xf32>
    %c1_66 = arith.constant 1 : index
    %c0_67 = arith.constant 0 : index
    %c0_68 = arith.constant 0 : index
    %130 = vector.load %arg6[%c1_66, %c0_67, %c0_68] : memref<2x1x96xf32, #tpu.memory_space<vmem>>, vector<1x1x96xf32>
    %131 = vector.shape_cast %130 : vector<1x1x96xf32> to vector<1x96xf32>
    %132 = vector.broadcast %131 : vector<1x96xf32> to vector<16x96xf32>
    %133 = arith.addf %129, %132 : vector<16x96xf32>
    %134 = vector.extract_strided_slice %133 {offsets = [0, 0], sizes = [16, 8], strides = [1, 1]} : vector<16x96xf32> to vector<16x8xf32>
    %135 = vector.extract_strided_slice %133 {offsets = [0, 8], sizes = [16, 8], strides = [1, 1]} : vector<16x96xf32> to vector<16x8xf32>
    %136 = vector.extract_strided_slice %133 {offsets = [0, 16], sizes = [16, 8], strides = [1, 1]} : vector<16x96xf32> to vector<16x8xf32>
    %137 = vector.extract_strided_slice %133 {offsets = [0, 24], sizes = [16, 8], strides = [1, 1]} : vector<16x96xf32> to vector<16x8xf32>
    %138 = tpu.concatenate %134, %135, %136, %137 in 0 : vector<16x8xf32>, vector<16x8xf32>, vector<16x8xf32>, vector<16x8xf32> -> vector<64x8xf32>
    %139 = vector.extract_strided_slice %133 {offsets = [0, 32], sizes = [16, 8], strides = [1, 1]} : vector<16x96xf32> to vector<16x8xf32>
    %140 = vector.extract_strided_slice %133 {offsets = [0, 40], sizes = [16, 8], strides = [1, 1]} : vector<16x96xf32> to vector<16x8xf32>
    %141 = vector.extract_strided_slice %133 {offsets = [0, 48], sizes = [16, 8], strides = [1, 1]} : vector<16x96xf32> to vector<16x8xf32>
    %142 = vector.extract_strided_slice %133 {offsets = [0, 56], sizes = [16, 8], strides = [1, 1]} : vector<16x96xf32> to vector<16x8xf32>
    %143 = tpu.concatenate %139, %140, %141, %142 in 0 : vector<16x8xf32>, vector<16x8xf32>, vector<16x8xf32>, vector<16x8xf32> -> vector<64x8xf32>
    %144 = vector.extract_strided_slice %133 {offsets = [0, 64], sizes = [16, 8], strides = [1, 1]} : vector<16x96xf32> to vector<16x8xf32>
    %145 = vector.extract_strided_slice %133 {offsets = [0, 72], sizes = [16, 8], strides = [1, 1]} : vector<16x96xf32> to vector<16x8xf32>
    %146 = vector.extract_strided_slice %133 {offsets = [0, 80], sizes = [16, 8], strides = [1, 1]} : vector<16x96xf32> to vector<16x8xf32>
    %147 = vector.extract_strided_slice %133 {offsets = [0, 88], sizes = [16, 8], strides = [1, 1]} : vector<16x96xf32> to vector<16x8xf32>
    %148 = tpu.concatenate %144, %145, %146, %147 in 0 : vector<16x8xf32>, vector<16x8xf32>, vector<16x8xf32>, vector<16x8xf32> -> vector<64x8xf32>
    %cst_69 = arith.constant dense<0.000000e+00> : vector<64x64xf32>
    %149 = tpu.matmul %138, %143, %cst_69 {dimension_numbers = #tpu.dot_dimension_numbers<[1], [1], [0], [0], [0, 0, 1, 0], [], []>} : vector<64x8xf32>, vector<64x8xf32>, vector<64x64xf32> -> vector<64x64xf32>
    %cst_70 = arith.constant 0.353553385 : f32
    %150 = vector.broadcast %cst_70 : f32 to vector<64x64xf32>
    %151 = arith.mulf %149, %150 : vector<64x64xf32>
    %152 = arith.addf %151, %1 : vector<64x64xf32>
    %cst_71 = arith.constant dense<0xFF800000> : vector<64xf32>
    %153 = vector.multi_reduction <maximumf>, %152, %cst_71 [1] : vector<64x64xf32> to vector<64xf32>
    %154 = vector.shape_cast %153 : vector<64xf32> to vector<64x1xf32>
    %155 = vector.broadcast %154 : vector<64x1xf32> to vector<64x64xf32>
    %156 = arith.subf %152, %155 : vector<64x64xf32>
    %157 = math.exp %156 : vector<64x64xf32>
    %cst_72 = arith.constant dense<0.000000e+00> : vector<64xf32>
    %158 = vector.multi_reduction <add>, %157, %cst_72 [1] : vector<64x64xf32> to vector<64xf32>
    %159 = vector.shape_cast %158 : vector<64xf32> to vector<64x1xf32>
    %160 = vector.broadcast %159 : vector<64x1xf32> to vector<64x64xf32>
    %161 = arith.divf %157, %160 : vector<64x64xf32>
    %cst_73 = arith.constant dense<0.000000e+00> : vector<64x8xf32>
    %162 = tpu.matmul %161, %148, %cst_73 {dimension_numbers = #tpu.dot_dimension_numbers<[1], [0], [0], [1], [0, 0, 1, 1], [], []>} : vector<64x64xf32>, vector<64x8xf32>, vector<64x8xf32> -> vector<64x8xf32>
    %163 = vector.extract_strided_slice %162 {offsets = [0, 0], sizes = [16, 8], strides = [1, 1]} : vector<64x8xf32> to vector<16x8xf32>
    %164 = vector.extract_strided_slice %162 {offsets = [16, 0], sizes = [16, 8], strides = [1, 1]} : vector<64x8xf32> to vector<16x8xf32>
    %165 = vector.extract_strided_slice %162 {offsets = [32, 0], sizes = [16, 8], strides = [1, 1]} : vector<64x8xf32> to vector<16x8xf32>
    %166 = vector.extract_strided_slice %162 {offsets = [48, 0], sizes = [16, 8], strides = [1, 1]} : vector<64x8xf32> to vector<16x8xf32>
    %167 = tpu.concatenate %163, %164, %165, %166 in 1 : vector<16x8xf32>, vector<16x8xf32>, vector<16x8xf32>, vector<16x8xf32> -> vector<16x32xf32>
    %c1_74 = arith.constant 1 : index
    %c0_75 = arith.constant 0 : index
    %c0_76 = arith.constant 0 : index
    %168 = vector.load %arg7[%c1_74, %c0_75, %c0_76] : memref<2x32x32xf32, #tpu.memory_space<vmem>>, vector<1x32x32xf32>
    %169 = vector.shape_cast %168 : vector<1x32x32xf32> to vector<32x32xf32>
    %cst_77 = arith.constant dense<0.000000e+00> : vector<16x32xf32>
    %170 = tpu.matmul %167, %169, %cst_77 {dimension_numbers = #tpu.dot_dimension_numbers<[1], [0], [0], [1], [0, 0, 1, 1], [], []>} : vector<16x32xf32>, vector<32x32xf32>, vector<16x32xf32> -> vector<16x32xf32>
    %c1_78 = arith.constant 1 : index
    %c0_79 = arith.constant 0 : index
    %c0_80 = arith.constant 0 : index
    %171 = vector.load %arg8[%c1_78, %c0_79, %c0_80] : memref<2x1x32xf32, #tpu.memory_space<vmem>>, vector<1x1x32xf32>
    %172 = vector.shape_cast %171 : vector<1x1x32xf32> to vector<1x32xf32>
    %173 = vector.broadcast %172 : vector<1x32xf32> to vector<16x32xf32>
    %174 = arith.addf %170, %173 : vector<16x32xf32>
    %175 = arith.addf %126, %174 : vector<16x32xf32>
    %c1_81 = arith.constant 1 : index
    %c0_82 = arith.constant 0 : index
    %c0_83 = arith.constant 0 : index
    %176 = vector.load %arg9[%c1_81, %c0_82, %c0_83] : memref<2x1x32xf32, #tpu.memory_space<vmem>>, vector<1x1x32xf32>
    %177 = vector.shape_cast %176 : vector<1x1x32xf32> to vector<1x32xf32>
    %c1_84 = arith.constant 1 : index
    %c0_85 = arith.constant 0 : index
    %c0_86 = arith.constant 0 : index
    %178 = vector.load %arg10[%c1_84, %c0_85, %c0_86] : memref<2x1x32xf32, #tpu.memory_space<vmem>>, vector<1x1x32xf32>
    %179 = vector.shape_cast %178 : vector<1x1x32xf32> to vector<1x32xf32>
    %cst_87 = arith.constant dense<0.000000e+00> : vector<16xf32>
    %180 = vector.multi_reduction <add>, %175, %cst_87 [1] : vector<16x32xf32> to vector<16xf32>
    %181 = vector.shape_cast %180 : vector<16xf32> to vector<16x1xf32>
    %cst_88 = arith.constant 3.200000e+01 : f32
    %182 = vector.broadcast %cst_88 : f32 to vector<16x1xf32>
    %183 = arith.divf %181, %182 : vector<16x1xf32>
    %184 = vector.broadcast %183 : vector<16x1xf32> to vector<16x32xf32>
    %185 = arith.subf %175, %184 : vector<16x32xf32>
    %186 = arith.mulf %185, %185 : vector<16x32xf32>
    %cst_89 = arith.constant dense<0.000000e+00> : vector<16xf32>
    %187 = vector.multi_reduction <add>, %186, %cst_89 [1] : vector<16x32xf32> to vector<16xf32>
    %188 = vector.shape_cast %187 : vector<16xf32> to vector<16x1xf32>
    %cst_90 = arith.constant 3.200000e+01 : f32
    %189 = vector.broadcast %cst_90 : f32 to vector<16x1xf32>
    %190 = arith.divf %188, %189 : vector<16x1xf32>
    %191 = vector.broadcast %183 : vector<16x1xf32> to vector<16x32xf32>
    %192 = arith.subf %175, %191 : vector<16x32xf32>
    %cst_91 = arith.constant 9.99999974E-6 : f32
    %193 = vector.broadcast %cst_91 : f32 to vector<16x1xf32>
    %194 = arith.addf %190, %193 : vector<16x1xf32>
    %195 = math.rsqrt %194 : vector<16x1xf32>
    %196 = vector.broadcast %195 : vector<16x1xf32> to vector<16x32xf32>
    %197 = arith.mulf %192, %196 : vector<16x32xf32>
    %198 = vector.broadcast %177 : vector<1x32xf32> to vector<16x32xf32>
    %199 = arith.mulf %197, %198 : vector<16x32xf32>
    %200 = vector.broadcast %179 : vector<1x32xf32> to vector<16x32xf32>
    %201 = arith.addf %199, %200 : vector<16x32xf32>
    %202 = arith.truncf %201 : vector<16x32xf32> to vector<16x32xbf16>
    %c1_92 = arith.constant 1 : index
    %c0_93 = arith.constant 0 : index
    %c0_94 = arith.constant 0 : index
    %203 = vector.load %arg11[%c1_92, %c0_93, %c0_94] : memref<2x32x2048xbf16, #tpu.memory_space<vmem>>, vector<1x32x2048xbf16>
    %204 = vector.shape_cast %203 : vector<1x32x2048xbf16> to vector<32x2048xbf16>
    %cst_95 = arith.constant dense<0.000000e+00> : vector<16x2048xf32>
    %205 = tpu.matmul %202, %204, %cst_95 {dimension_numbers = #tpu.dot_dimension_numbers<[1], [0], [0], [1], [0, 0, 1, 1], [], []>} : vector<16x32xbf16>, vector<32x2048xbf16>, vector<16x2048xf32> -> vector<16x2048xf32>
    %c1_96 = arith.constant 1 : index
    %c0_97 = arith.constant 0 : index
    %c0_98 = arith.constant 0 : index
    %206 = vector.load %arg12[%c1_96, %c0_97, %c0_98] : memref<2x1x2048xf32, #tpu.memory_space<vmem>>, vector<1x1x2048xf32>
    %207 = vector.shape_cast %206 : vector<1x1x2048xf32> to vector<1x2048xf32>
    %208 = vector.broadcast %207 : vector<1x2048xf32> to vector<16x2048xf32>
    %209 = arith.addf %205, %208 : vector<16x2048xf32>
    %cst_99 = arith.constant 0.000000e+00 : f32
    %210 = vector.broadcast %cst_99 : f32 to vector<16x2048xf32>
    %211 = arith.maximumf %209, %210 : vector<16x2048xf32>
    %212 = arith.truncf %211 : vector<16x2048xf32> to vector<16x2048xbf16>
    %c1_100 = arith.constant 1 : index
    %c0_101 = arith.constant 0 : index
    %c0_102 = arith.constant 0 : index
    %213 = vector.load %arg13[%c1_100, %c0_101, %c0_102] : memref<2x2048x32xbf16, #tpu.memory_space<vmem>>, vector<1x2048x32xbf16>
    %214 = vector.shape_cast %213 : vector<1x2048x32xbf16> to vector<2048x32xbf16>
    %cst_103 = arith.constant dense<0.000000e+00> : vector<16x32xf32>
    %215 = tpu.matmul %212, %214, %cst_103 {dimension_numbers = #tpu.dot_dimension_numbers<[1], [0], [0], [1], [0, 0, 1, 1], [], []>} : vector<16x2048xbf16>, vector<2048x32xbf16>, vector<16x32xf32> -> vector<16x32xf32>
    %c1_104 = arith.constant 1 : index
    %c0_105 = arith.constant 0 : index
    %c0_106 = arith.constant 0 : index
    %216 = vector.load %arg14[%c1_104, %c0_105, %c0_106] : memref<2x1x32xf32, #tpu.memory_space<vmem>>, vector<1x1x32xf32>
    %217 = vector.shape_cast %216 : vector<1x1x32xf32> to vector<1x32xf32>
    %218 = vector.broadcast %217 : vector<1x32xf32> to vector<16x32xf32>
    %219 = arith.addf %215, %218 : vector<16x32xf32>
    %220 = arith.addf %201, %219 : vector<16x32xf32>
    %c1_107 = arith.constant 1 : index
    %c0_108 = arith.constant 0 : index
    %c0_109 = arith.constant 0 : index
    %221 = vector.load %arg15[%c1_107, %c0_108, %c0_109] : memref<2x1x32xf32, #tpu.memory_space<vmem>>, vector<1x1x32xf32>
    %222 = vector.shape_cast %221 : vector<1x1x32xf32> to vector<1x32xf32>
    %c1_110 = arith.constant 1 : index
    %c0_111 = arith.constant 0 : index
    %c0_112 = arith.constant 0 : index
    %223 = vector.load %arg16[%c1_110, %c0_111, %c0_112] : memref<2x1x32xf32, #tpu.memory_space<vmem>>, vector<1x1x32xf32>
    %224 = vector.shape_cast %223 : vector<1x1x32xf32> to vector<1x32xf32>
    %cst_113 = arith.constant dense<0.000000e+00> : vector<16xf32>
    %225 = vector.multi_reduction <add>, %220, %cst_113 [1] : vector<16x32xf32> to vector<16xf32>
    %226 = vector.shape_cast %225 : vector<16xf32> to vector<16x1xf32>
    %cst_114 = arith.constant 3.200000e+01 : f32
    %227 = vector.broadcast %cst_114 : f32 to vector<16x1xf32>
    %228 = arith.divf %226, %227 : vector<16x1xf32>
    %229 = vector.broadcast %228 : vector<16x1xf32> to vector<16x32xf32>
    %230 = arith.subf %220, %229 : vector<16x32xf32>
    %231 = arith.mulf %230, %230 : vector<16x32xf32>
    %cst_115 = arith.constant dense<0.000000e+00> : vector<16xf32>
    %232 = vector.multi_reduction <add>, %231, %cst_115 [1] : vector<16x32xf32> to vector<16xf32>
    %233 = vector.shape_cast %232 : vector<16xf32> to vector<16x1xf32>
    %cst_116 = arith.constant 3.200000e+01 : f32
    %234 = vector.broadcast %cst_116 : f32 to vector<16x1xf32>
    %235 = arith.divf %233, %234 : vector<16x1xf32>
    %236 = vector.broadcast %228 : vector<16x1xf32> to vector<16x32xf32>
    %237 = arith.subf %220, %236 : vector<16x32xf32>
    %cst_117 = arith.constant 9.99999974E-6 : f32
    %238 = vector.broadcast %cst_117 : f32 to vector<16x1xf32>
    %239 = arith.addf %235, %238 : vector<16x1xf32>
    %240 = math.rsqrt %239 : vector<16x1xf32>
    %241 = vector.broadcast %240 : vector<16x1xf32> to vector<16x32xf32>
    %242 = arith.mulf %237, %241 : vector<16x32xf32>
    %243 = vector.broadcast %222 : vector<1x32xf32> to vector<16x32xf32>
    %244 = arith.mulf %242, %243 : vector<16x32xf32>
    %245 = vector.broadcast %224 : vector<1x32xf32> to vector<16x32xf32>
    %246 = arith.addf %244, %245 : vector<16x32xf32>
    %c0_118 = arith.constant 0 : index
    %c0_119 = arith.constant 0 : index
    %247 = vector.load %arg17[%c0_118, %c0_119] : memref<1x32xf32, #tpu.memory_space<vmem>>, vector<1x32xf32>
    %248 = vector.broadcast %247 : vector<1x32xf32> to vector<16x32xf32>
    %249 = arith.mulf %246, %248 : vector<16x32xf32>
    %cst_120 = arith.constant dense<0.000000e+00> : vector<16xf32>
    %250 = vector.multi_reduction <add>, %249, %cst_120 [1] : vector<16x32xf32> to vector<16xf32>
    %251 = vector.shape_cast %250 : vector<16xf32> to vector<16x1xf32>
    %c0_121 = arith.constant 0 : index
    %c0_122 = arith.constant 0 : index
    %252 = vector.load %arg18[%c0_121, %c0_122] : memref<1x1xf32, #tpu.memory_space<vmem>>, vector<1x1xf32>
    %253 = vector.broadcast %252 : vector<1x1xf32> to vector<16x1xf32>
    %254 = arith.addf %251, %253 : vector<16x1xf32>
    %c0_123 = arith.constant 0 : index
    %c0_124 = arith.constant 0 : index
    %255 = vector.load %arg19[%c0_123, %c0_124] : memref<16x1xf32, #tpu.memory_space<vmem>>, vector<16x1xf32>
    tpu.vector_store %arg19[%c0_123, %c0_124], %254 {strides = array<i32>} : memref<16x1xf32, #tpu.memory_space<vmem>>, vector<16x1xf32>,
    return
  }
  func.func @transform_0(%arg0: i32) -> (i32, i32) {
    %c0_i32 = arith.constant 0 : i32
    %c0_i32_0 = arith.constant 0 : i32
    return %arg0, %c0_i32 : i32, i32
  }
  func.func @transform_1(%arg0: i32) -> (i32, i32) {
    %c0_i32 = arith.constant 0 : i32
    %c0_i32_0 = arith.constant 0 : i32
    %c0_i32_1 = arith.constant 0 : i32
    return %c0_i32, %c0_i32_0 : i32, i32
  }
  func.func @transform_2(%arg0: i32) -> (i32, i32) {
    %c0_i32 = arith.constant 0 : i32
    %c0_i32_0 = arith.constant 0 : i32
    %c0_i32_1 = arith.constant 0 : i32
    return %c0_i32, %c0_i32_0 : i32, i32
  }
  func.func @transform_3(%arg0: i32) -> (i32, i32) {
    %c0_i32 = arith.constant 0 : i32
    %c0_i32_0 = arith.constant 0 : i32
    %c0_i32_1 = arith.constant 0 : i32
    return %c0_i32, %c0_i32_0 : i32, i32
  }
  func.func @transform_4(%arg0: i32) -> (i32, i32, i32) {
    %c0_i32 = arith.constant 0 : i32
    %c0_i32_0 = arith.constant 0 : i32
    %c0_i32_1 = arith.constant 0 : i32
    %c0_i32_2 = arith.constant 0 : i32
    return %c0_i32, %c0_i32_0, %c0_i32_1 : i32, i32, i32
  }
  func.func @transform_5(%arg0: i32) -> (i32, i32, i32) {
    %c0_i32 = arith.constant 0 : i32
    %c0_i32_0 = arith.constant 0 : i32
    %c0_i32_1 = arith.constant 0 : i32
    %c0_i32_2 = arith.constant 0 : i32
    return %c0_i32, %c0_i32_0, %c0_i32_1 : i32, i32, i32
  }
  func.func @transform_6(%arg0: i32) -> (i32, i32, i32) {
    %c0_i32 = arith.constant 0 : i32
    %c0_i32_0 = arith.constant 0 : i32
    %c0_i32_1 = arith.constant 0 : i32
    %c0_i32_2 = arith.constant 0 : i32
    return %c0_i32, %c0_i32_0, %c0_i32_1 : i32, i32, i32
  }
  func.func @transform_7(%arg0: i32) -> (i32, i32, i32) {
    %c0_i32 = arith.constant 0 : i32
    %c0_i32_0 = arith.constant 0 : i32
    %c0_i32_1 = arith.constant 0 : i32
    %c0_i32_2 = arith.constant 0 : i32
    return %c0_i32, %c0_i32_0, %c0_i32_1 : i32, i32, i32
  }
  func.func @transform_8(%arg0: i32) -> (i32, i32, i32) {
    %c0_i32 = arith.constant 0 : i32
    %c0_i32_0 = arith.constant 0 : i32
    %c0_i32_1 = arith.constant 0 : i32
    %c0_i32_2 = arith.constant 0 : i32
    return %c0_i32, %c0_i32_0, %c0_i32_1 : i32, i32, i32
  }
  func.func @transform_9(%arg0: i32) -> (i32, i32, i32) {
    %c0_i32 = arith.constant 0 : i32
    %c0_i32_0 = arith.constant 0 : i32
    %c0_i32_1 = arith.constant 0 : i32
    %c0_i32_2 = arith.constant 0 : i32
    return %c0_i32, %c0_i32_0, %c0_i32_1 : i32, i32, i32
  }
  func.func @transform_10(%arg0: i32) -> (i32, i32, i32) {
    %c0_i32 = arith.constant 0 : i32
    %c0_i32_0 = arith.constant 0 : i32
    %c0_i32_1 = arith.constant 0 : i32
    %c0_i32_2 = arith.constant 0 : i32
    return %c0_i32, %c0_i32_0, %c0_i32_1 : i32, i32, i32
  }
  func.func @transform_11(%arg0: i32) -> (i32, i32, i32) {
    %c0_i32 = arith.constant 0 : i32
    %c0_i32_0 = arith.constant 0 : i32
    %c0_i32_1 = arith.constant 0 : i32
    %c0_i32_2 = arith.constant 0 : i32
    return %c0_i32, %c0_i32_0, %c0_i32_1 : i32, i32, i32
  }
  func.func @transform_12(%arg0: i32) -> (i32, i32, i32) {
    %c0_i32 = arith.constant 0 : i32
    %c0_i32_0 = arith.constant 0 : i32
    %c0_i32_1 = arith.constant 0 : i32
    %c0_i32_2 = arith.constant 0 : i32
    return %c0_i32, %c0_i32_0, %c0_i32_1 : i32, i32, i32
  }
  func.func @transform_13(%arg0: i32) -> (i32, i32, i32) {
    %c0_i32 = arith.constant 0 : i32
    %c0_i32_0 = arith.constant 0 : i32
    %c0_i32_1 = arith.constant 0 : i32
    %c0_i32_2 = arith.constant 0 : i32
    return %c0_i32, %c0_i32_0, %c0_i32_1 : i32, i32, i32
  }
  func.func @transform_14(%arg0: i32) -> (i32, i32, i32) {
    %c0_i32 = arith.constant 0 : i32
    %c0_i32_0 = arith.constant 0 : i32
    %c0_i32_1 = arith.constant 0 : i32
    %c0_i32_2 = arith.constant 0 : i32
    return %c0_i32, %c0_i32_0, %c0_i32_1 : i32, i32, i32
  }
  func.func @transform_15(%arg0: i32) -> (i32, i32, i32) {
    %c0_i32 = arith.constant 0 : i32
    %c0_i32_0 = arith.constant 0 : i32
    %c0_i32_1 = arith.constant 0 : i32
    %c0_i32_2 = arith.constant 0 : i32
    return %c0_i32, %c0_i32_0, %c0_i32_1 : i32, i32, i32
  }
  func.func @transform_16(%arg0: i32) -> (i32, i32) {
    %c0_i32 = arith.constant 0 : i32
    %c0_i32_0 = arith.constant 0 : i32
    %c0_i32_1 = arith.constant 0 : i32
    return %c0_i32, %c0_i32_0 : i32, i32
  }
  func.func @transform_17(%arg0: i32) -> (i32, i32) {
    %c0_i32 = arith.constant 0 : i32
    %c0_i32_0 = arith.constant 0 : i32
    %c0_i32_1 = arith.constant 0 : i32
    return %c0_i32, %c0_i32_0 : i32, i32
  }
  func.func @transform_18(%arg0: i32) -> (i32, i32) {
    %c0_i32 = arith.constant 0 : i32
    %c0_i32_0 = arith.constant 0 : i32
    return %arg0, %c0_i32 : i32, i32
  }
}

</mosaic_0001>

<bundles_post_ra>
// kernel: tpu_custom_call.1
= control target key start
LH: loop header
LB: loop body
LE: loop exit
PB: predicated region body
PF: predicated region fallthrough
CT: control target
= control target key end

     0   :  { %vm81_vm0 = vcmask 130048   ;;  %vm174_vm1 = vcmask 261120   ;;  %vm286_vm2 = vcmask 64512   ;;  %s7410_s21 = smov 104   ;;  %s7411_s22 = smov 120   ;;  %vm440_vm3 = vcmask 523264   ;;  %s9249_s2 = inlined_call_operand.vmem [shape: f32[16,32], index: 2, kind: input, shape index: {}]   ;;  %s9250_s0 = inlined_call_operand.vmem [shape: f32[16,16], index: 0, kind: input, shape index: {}]   ;;  %s9251_s4 = inlined_call_operand.vmem [shape: f32[2,32,96], index: 4, kind: input, shape index: {}]   ;;  %s9252_s3 = inlined_call_operand.vmem [shape: f32[1,32], index: 3, kind: input, shape index: {}]   ;;  %s9253_s5 = inlined_call_operand.vmem [shape: f32[2,1,96], index: 5, kind: input, shape index: {}]   ;;  %s9254_s1 = inlined_call_operand.vmem [shape: f32[64,64], index: 1, kind: input, shape index: {}]   ;;  %s9255_s6 = inlined_call_operand.vmem [shape: f32[2,32,32], index: 6, kind: input, shape index: {}]   ;;  %s9256_s7 = inlined_call_operand.vmem [shape: f32[2,1,32], index: 7, kind: input, shape index: {}]   ;;  %s9257_s10 = inlined_call_operand.vmem [shape: bf16[2,32,2048], index: 10, kind: input, shape index: {}]   ;;  %s9258_s12 = inlined_call_operand.vmem [shape: bf16[2,2048,32], index: 12, kind: input, shape index: {}]   ;;  %s9259_s8 = inlined_call_operand.vmem [shape: f32[2,1,32], index: 8, kind: input, shape index: {}]   ;;  %s9260_s9 = inlined_call_operand.vmem [shape: f32[2,1,32], index: 9, kind: input, shape index: {}]   ;;  %s9261_s11 = inlined_call_operand.vmem [shape: f32[2,1,2048], index: 11, kind: input, shape index: {}]   ;;  %s9262_s13 = inlined_call_operand.vmem [shape: f32[2,1,32], index: 13, kind: input, shape index: {}]   ;;  %s9263_s14 = inlined_call_operand.vmem [shape: f32[2,1,32], index: 14, kind: input, shape index: {}]   ;;  %s9264_s15 = inlined_call_operand.vmem [shape: f32[2,1,32], index: 15, kind: input, shape index: {}]   ;;  %s9265_s17 = inlined_call_operand.<no memory space> [shape: f32[1,1], index: 17, kind: input, shape index: {}]   ;;  %s9266_s16 = inlined_call_operand.vmem [shape: f32[1,32], index: 16, kind: input, shape index: {}]   ;;  %s9267_s18 = inlined_call_operand.vmem [shape: f32[16,1], index: 18, kind: output, shape index: {}]  }
   0x1   :  { %9277 = sst [smem:[#allocation3_spill]] %s9249_s2  ;;  %v5733_v9 = vld [vmem:[%s9252_s3] ss:$0 sm:$0xff]  ;;  %s7409_s3 = smov 112   ;;  %v65_v33 = vld [vmem:[%s9254_s1 + $0x8] sm:$0xff]  ;;  %v66_v43 = vld [vmem:[%s9254_s1 + $0x10] sm:$0xff] }
   0x2   :  { %9278 = sst [smem:[#allocation4_spill]] %s9250_s0  ;;  %v5736_v13 = vld [vmem:[%s9253_s5] ss:$0 sm:$0xff]  ;;  %s7412_s23 = smov 96   ;;  %v67_v48 = vld [vmem:[%s9254_s1 + $0x18] sm:$0xff]  ;;  %v69_v57 = vld [vmem:[%s9254_s1 + $0x28] sm:$0xff] }
   0x3   :  { %9279 = sst [smem:[#allocation5_spill]] %s9251_s4  ;;  %v64_v36 = vld [vmem:[%s9254_s1] sm:$0xff]  ;;  %v71_v63 = vld [vmem:[%s9254_s1 + $0x38] sm:$0xff]  ;;  %s7413_s27 = smov 64   ;;  %vm710_vm4 = vcmask 195584   ;;  %vm5726_vm5 = vcmask 7168  }
   0x4   :  { %s9280_s29 = sld [smem:[#allocation3_spill]]  ;;  %v68_v51 = vld [vmem:[%s9254_s1 + $0x20] sm:$0xff]  ;;  %s9275_s28 = smov 8  }
   0x5   :  { %s9281_s20 = sld [smem:[#allocation4_spill]]  ;;  %s9271_s30 = smov 24  }
   0x6   :  { %s9282_s4 = sld [smem:[#allocation5_spill]]  ;;  %s9283_s0 = smov 8  }
   0x7   :  { %s9285_s24 = smov 24  }
   0xa   :  { %v73_v0 = vld [vmem:[%s9280_s29 + $0x8] sm:$0xff]  ;;  %v72_v1 = vld [vmem:[%s9280_s29] sm:$0xff]  ;;  %s9273_s29 = smov 16  }
   0xb   :  { %v62_v2 = vld [vmem:[%s9281_s20] sm:$0xff]  ;;  %6893 = vmatprep.subr.mxu0 %v73_v0  ;;  %v63_v4 = vld [vmem:[%s9281_s20 + $0x8] sm:$0xff]  ;;  %s9284_s20 = smov 16  }
   0xc   :  { %6897 = vmatprep.mubr.msk.f32.mxu0 %vm81_vm0, %v62_v2  ;;  %v166_v3 = vld [vmem:[%s9282_s4 + $0x18] sm:$0xff]  ;;  %6894 = vmatpush3.msra.mxu0 %v73_v0  ;;  %v165_v5 = vld [vmem:[%s9282_s4 + $0x10] sm:$0xff]  ;;  %v164_v6 = vld [vmem:[%s9282_s4 + $0x8] sm:$0xff] }
   0xd   :  { %6900 = vmatprep.subr.mxu1 %v166_v3  ;;  %6895 = vmatprep.subr.mxu0 %v72_v1  ;;  %v163_v7 = vld [vmem:[%s9282_s4] sm:$0xff] }
   0xe   :  { %6901 = vmatpush3.msra.mxu1 %v166_v3  ;;  %6896 = vmatpush3.msra.mxu0 %v72_v1 }
   0xf   :  { %6898 = vmatmul.mubr.msk.f32.vlgmr.msra.gmra.mxu0 %vm81_vm0, %v63_v4  ;;  %6902 = vmatprep.subr.mxu1 %v165_v5 }
  0x10   :  { %6903 = vmatpush3.msra.mxu1 %v165_v5  ;;  %v70_v5 = vld [vmem:[%s9254_s1 + $0x30] sm:$0xff] }
  0x11   :  { %6904 = vmatprep.subr.mxu1 %v164_v6 }
  0x12   :  { %6905 = vmatpush3.msra.mxu1 %v164_v6 }
  0x13   :  { %6906 = vmatprep.subr.mxu1 %v163_v7 }
  0x14   :  { %6907 = vmatpush3.msra.mxu1 %v163_v7 }
  0xcf   :  { %v6899_v8 = vpop.f32.mrf.mxu0 }
  0xd0   :  { %v7544_v12 = vadd.f32 %v6899_v8, %v5733_v9 }
  0xd1   :  { %v154_v10 = vpop.f32.mrf.mxu0 }
  0xd2   :  { %v7542_v11 = vadd.f32 %v5733_v9, %v154_v10 }
  0xd4   :  { %6908 = vmatprep.mubr.msk.f32.mxu1 %vm174_vm1, %v7542_v11 }
  0xd5   :  { %6909 = vmatmul.mubr.msk.f32.vlgmr.msra.gmra.mxu1 %vm174_vm1, %v7544_v12 }
 0x195   :  { %v6910_v14 = vpop.f32.mrf.mxu1 }
 0x196   :  { %v7553_v15 = vadd.f32 %v6910_v14, %v5736_v13 }
 0x197   :  { %v247_v16 = vpop.f32.mrf.mxu1 }
 0x198   :  { %v7555_v17 = vadd.f32 %v5736_v13, %v247_v16  ;;  %264 = vrot.lane.b32.xlu1 %v7553_v15, %s7409_s3  ;;  %268 = vrot.lane.b32.xlu0 %v7553_v15, %s7410_s21 }
 0x19a   :  { %6927 = vmatprep.mubr.msk.f32.mxu0 %vm286_vm2, %v7555_v17 }
 0x19c   :  { %262 = vrot.lane.b32.xlu1 %v7555_v17, %s7409_s3  ;;  %266 = vrot.lane.b32.xlu0 %v7555_v17, %s7410_s21 }
 0x1a0   :  { %258 = vrot.lane.b32.xlu1 %v7555_v17, %s7411_s22  ;;  %260 = vrot.lane.b32.xlu0 %v7553_v15, %s7411_s22 }
 0x20a   :  { %v7571_v18 = vpop.permute.xlu1 %264  ;;  %v7573_v19 = vpop.permute.xlu0 %268 }
 0x20b   :  { %284 = vrot.lane.b32.xlu0 %v7573_v19, %s7412_s23 }
 0x20e   :  { %v7577_v20 = vpop.permute.xlu0 %266  ;;  %v7583_v21 = vpop.permute.xlu1 %262 }
 0x20f   :  { %280 = vrot.lane.b32.xlu0 %v7571_v18, %s7412_s23  ;;  %282 = vrot.lane.b32.xlu1 %v7577_v20, %s7412_s23 }
 0x212   :  { %v7585_v22 = vpop.permute.xlu0 %260  ;;  %v7591_v23 = vpop.permute.xlu1 %258 }
 0x213   :  { %278 = vrot.lane.b32.xlu1 %v7583_v21, %s7412_s23  ;;  %276 = vrot.lane.b32.xlu0 %v7585_v22, %s7412_s23 }
 0x217   :  { %274 = vrot.lane.b32.xlu1 %v7591_v23, %s7412_s23  ;;  %272 = vrot.lane.b32.xlu0 %v7553_v15, %s7412_s23 }
 0x21b   :  { %270 = vrot.lane.b32.xlu1 %v7555_v17, %s7412_s23 }
 0x27d   :  { %v285_v24 = vpop.permute.xlu0 %284 }
 0x27e   :  { %6911 = vmatprep.subr.msk.mxu0 %vm286_vm2, %v285_v24 }
 0x27f   :  { %6912 = vmatpush3.xpose.msk.msra.mxu0 %vm286_vm2, %v285_v24 }
 0x281   :  { %v283_v25 = vpop.permute.xlu1 %282  ;;  %v281_v26 = vpop.permute.xlu0 %280 }
 0x282   :  { %6913 = vmatprep.subr.msk.mxu0 %vm286_vm2, %v283_v25 }
 0x283   :  { %6914 = vmatpush3.xpose.msk.msra.mxu0 %vm286_vm2, %v283_v25 }
 0x284   :  { %6915 = vmatprep.subr.msk.mxu0 %vm286_vm2, %v281_v26 }
 0x285   :  { %v279_v27 = vpop.permute.xlu1 %278  ;;  %v277_v28 = vpop.permute.xlu0 %276 }
 0x287   :  { %6916 = vmatpush3.xpose.msk.msra.mxu0 %vm286_vm2, %v281_v26 }
 0x288   :  { %6917 = vmatprep.subr.msk.mxu0 %vm286_vm2, %v279_v27 }
 0x289   :  { %v275_v29 = vpop.permute.xlu1 %274  ;;  %v273_v30 = vpop.permute.xlu0 %272 }
 0x28b   :  { %6918 = vmatpush3.xpose.msk.msra.mxu0 %vm286_vm2, %v279_v27 }
 0x28c   :  { %6919 = vmatprep.subr.msk.mxu0 %vm286_vm2, %v277_v28 }
 0x28d   :  { %v271_v31 = vpop.permute.xlu1 %270 }
 0x28f   :  { %6920 = vmatpush3.xpose.msk.msra.mxu0 %vm286_vm2, %v277_v28 }
 0x290   :  { %6921 = vmatprep.subr.msk.mxu0 %vm286_vm2, %v275_v29 }
 0x293   :  { %6922 = vmatpush3.xpose.msk.msra.mxu0 %vm286_vm2, %v275_v29 }
 0x294   :  { %6923 = vmatprep.subr.msk.mxu0 %vm286_vm2, %v273_v30 }
 0x297   :  { %6924 = vmatpush3.xpose.msk.msra.mxu0 %vm286_vm2, %v273_v30 }
 0x298   :  { %6925 = vmatprep.subr.msk.mxu0 %vm286_vm2, %v271_v31 }
 0x29b   :  { %6926 = vmatpush3.xpose.msk.msra.mxu0 %vm286_vm2, %v271_v31 }
 0x29e   :  { %6928 = vmatmul.mubr.msk.f32.vlgmr.msra.gmra.mxu0 %vm286_vm2, %v7553_v15 }
 0x29f   :  { %6930 = vmatprep.mubr.msk.f32.mxu0 %vm286_vm2, %v7591_v23 }
 0x2a2   :  { %6931 = vmatmul.mubr.msk.f32.gmra.mxu0 %vm286_vm2, %v7585_v22 }
 0x2a3   :  { %6933 = vmatprep.mubr.msk.f32.mxu0 %vm286_vm2, %v7583_v21 }
 0x2a6   :  { %6934 = vmatmul.mubr.msk.f32.gmra.mxu0 %vm286_vm2, %v7571_v18 }
 0x2a7   :  { %6936 = vmatprep.mubr.msk.f32.mxu0 %vm286_vm2, %v7577_v20 }
 0x2aa   :  { %6937 = vmatmul.mubr.msk.f32.gmra.mxu0 %vm286_vm2, %v7573_v19 }
 0x35e   :  { %v6929_v32 = vpop.f32.mrf.mxu0 }
 0x35f   :  { %v425_v34 = vmul.f32 0.35355338, %v6929_v32 }
 0x360   :  { %v385_v35 = vpop.f32.mrf.mxu0 }
 0x361   :  { %v424_v37 = vmul.f32 0.35355338, %v385_v35  ;;  %v433_v38 = vadd.f32 %v425_v34, %v65_v33 }
 0x362   :  { %v6932_v39 = vpop.f32.mrf.mxu0 }
 0x363   :  { %v444_v40 = vsel %vm440_vm3, %v433_v38, -inf  ;;  %v432_v41 = vadd.f32 %v424_v37, %v64_v36  ;;  %v427_v44 = vmul.f32 0.35355338, %v6932_v39 }
 0x364   :  { %445 = vmax.xlane.f32.xlu1 %v444_v40  ;;  %v395_v42 = vpop.f32.mrf.mxu0 }
 0x365   :  { %v426_v45 = vmul.f32 0.35355338, %v395_v42  ;;  %v441_v46 = vsel %vm440_vm3, %v432_v41, -inf  ;;  %v435_v55 = vadd.f32 %v427_v44, %v67_v48 }
 0x366   :  { %442 = vmax.xlane.f32.xlu0 %v441_v46  ;;  %v6935_v47 = vpop.f32.mrf.mxu0 }
 0x367   :  { %v434_v49 = vadd.f32 %v426_v45, %v66_v43  ;;  %v429_v52 = vmul.f32 0.35355338, %v6935_v47  ;;  %v450_v60 = vsel %vm440_vm3, %v435_v55, -inf }
 0x368   :  { %v405_v50 = vpop.f32.mrf.mxu0 }
 0x369   :  { %v428_v53 = vmul.f32 0.35355338, %v405_v50  ;;  %v447_v54 = vsel %vm440_vm3, %v434_v49, -inf  ;;  %v437_v62 = vadd.f32 %v429_v52, %v69_v57 }
 0x36a   :  { %448 = vmax.xlane.f32.xlu0 %v447_v54  ;;  %v6938_v56 = vpop.f32.mrf.mxu0 }
 0x36b   :  { %v436_v58 = vadd.f32 %v428_v53, %v68_v51  ;;  %v431_v59 = vmul.f32 0.35355338, %v6938_v56  ;;  %v456_v0 = vsel %vm440_vm3, %v437_v62, -inf }
 0x36c   :  { %v415_v3 = vpop.f32.mrf.mxu0 }
 0x36d   :  { %v453_v61 = vsel %vm440_vm3, %v436_v58, -inf  ;;  %v439_v1 = vadd.f32 %v431_v59, %v71_v63  ;;  %v430_v4 = vmul.f32 0.35355338, %v415_v3 }
 0x36e   :  { %451 = vmax.xlane.f32.xlu0 %v450_v60  ;;  %454 = vmax.xlane.f32.xlu1 %v453_v61 }
 0x36f   :  { %v462_v2 = vsel %vm440_vm3, %v439_v1, -inf  ;;  %v7668_v6 = vadd.f32 %v430_v4, %v70_v5 }
 0x371   :  { %v459_v7 = vsel %vm440_vm3, %v7668_v6, -inf }
 0x372   :  { %457 = vmax.xlane.f32.xlu0 %v456_v0 }
 0x376   :  { %463 = vmax.xlane.f32.xlu0 %v462_v2 }
 0x37f   :  { %543 = vrot.lane.b32.xlu1 %v7573_v19, %s7413_s27 }
 0x383   :  { %539 = vrot.lane.b32.xlu1 %v7571_v18, %s7413_s27 }
 0x38c   :  { %541 = vrot.lane.b32.xlu0 %v7577_v20, %s7413_s27 }
 0x390   :  { %535 = vrot.lane.b32.xlu0 %v7585_v22, %s7413_s27 }
 0x3a7   :  { %460 = vmax.xlane.f32.xlu1 %v459_v7 }
 0x3b8   :  { %537 = vrot.lane.b32.xlu1 %v7583_v21, %s7413_s27 }
 0x3bc   :  { %533 = vrot.lane.b32.xlu1 %v7591_v23, %s7413_s27 }
 0x3ed   :  { %v446_v8 = vpop.xlane.xlu1 %445 }
 0x3ee   :  { %v466_v9 = vsub.f32 %v433_v38, %v446_v8 }
 0x3ef   :  { %v443_v10 = vpop.xlane.xlu0 %442 }
 0x3f0   :  { %v475_v13 = vmul.f32 1.442695, %v466_v9  ;;  %v465_v14 = vsub.f32 %v432_v41, %v443_v10 }
 0x3f2   :  { %7321 = vpow2.f32 %v475_v13  ;;  %v473_v16 = vmul.f32 1.442695, %v465_v14 }
 0x3f3   :  { %v449_v18 = vpop.xlane.xlu0 %448 }
 0x3f4   :  { %7323 = vpow2.f32 %v473_v16  ;;  %v467_v19 = vsub.f32 %v434_v49, %v449_v18 }
 0x3f6   :  { %v477_v20 = vmul.f32 1.442695, %v467_v19 }
 0x3f7   :  { %v452_v22 = vpop.xlane.xlu0 %451  ;;  %v455_v24 = vpop.xlane.xlu1 %454 }
 0x3f8   :  { %7325 = vpow2.f32 %v477_v20  ;;  %v468_v25 = vsub.f32 %v435_v55, %v452_v22  ;;  %v469_v26 = vsub.f32 %v436_v58, %v455_v24  ;;  %v716_v24 = vld [vmem:[%s9255_s6 + $0x18] sm:$0xff] }
 0x3fa   :  { %v479_v21 = vmul.f32 1.442695, %v468_v25  ;;  %v481_v27 = vmul.f32 1.442695, %v469_v26  ;;  %v715_v25 = vld [vmem:[%s9255_s6 + $0x10] sm:$0xff]  ;;  %v714_v26 = vld [vmem:[%s9255_s6 + $0x8] sm:$0xff] }
 0x3fb   :  { %v458_v28 = vpop.xlane.xlu0 %457  ;;  %v544_v23 = vpop.permute.xlu1 %543 }
 0x3fc   :  { %7327 = vpow2.f32 %v479_v21  ;;  %v470_v29 = vsub.f32 %v437_v62, %v458_v28  ;;  %6939 = vmatprep.subr.mxu1 %v544_v23  ;;  %v713_v21 = vld [vmem:[%s9255_s6] sm:$0xff] }
 0x3fd   :  { %7329 = vpow2.f32 %v481_v27  ;;  %6940 = vmatpush3.msra.mxu1 %v544_v23 }
 0x3fe   :  { %v483_v30 = vmul.f32 1.442695, %v470_v29 }
 0x3ff   :  { %v7676_v31 = vpop.eup %7321  ;;  %v464_v32 = vpop.xlane.xlu0 %463 }
 0x400   :  { %7331 = vpow2.f32 %v483_v30  ;;  %v472_v33 = vsub.f32 %v439_v1, %v464_v32  ;;  %v492_v34 = vsel %vm440_vm3, %v7676_v31, 0.0  ;;  %v540_v40 = vpop.permute.xlu1 %539 }
 0x401   :  { %v7324_v35 = vpop.eup %7323  ;;  %493 = vadd.xlane.f32.xlu0 %v492_v34 }
 0x402   :  { %v487_v36 = vmul.f32 1.442695, %v472_v33  ;;  %v489_v37 = vsel %vm440_vm3, %v7324_v35, 0.0 }
 0x403   :  { %v542_v38 = vpop.permute.xlu0 %541  ;;  %490 = vadd.xlane.f32.xlu1 %v489_v37 }
 0x404   :  { %7333 = vpow2.f32 %v487_v36  ;;  %6941 = vmatprep.subr.mxu1 %v542_v38 }
 0x405   :  { %v7681_v39 = vpop.eup %7325  ;;  %6942 = vmatpush3.msra.mxu1 %v542_v38 }
 0x406   :  { %6943 = vmatprep.subr.mxu1 %v540_v40  ;;  %v495_v41 = vsel %vm440_vm3, %v7681_v39, 0.0 }
 0x407   :  { %6944 = vmatpush3.msra.mxu1 %v540_v40  ;;  %496 = vadd.xlane.f32.xlu1 %v495_v41  ;;  %v536_v54 = vpop.permute.xlu0 %535 }
 0x409   :  { %v7685_v42 = vpop.eup %7327 }
 0x40a   :  { %v7687_v43 = vpop.eup %7329  ;;  %v498_v44 = vsel %vm440_vm3, %v7685_v42, 0.0 }
 0x40b   :  { %499 = vadd.xlane.f32.xlu0 %v498_v44  ;;  %v501_v45 = vsel %vm440_vm3, %v7687_v43, 0.0 }
 0x40c   :  { %502 = vadd.xlane.f32.xlu1 %v501_v45 }
 0x40d   :  { %v7693_v46 = vpop.eup %7331 }
 0x40e   :  { %v504_v47 = vsel %vm440_vm3, %v7693_v46, 0.0 }
 0x40f   :  { %505 = vadd.xlane.f32.xlu0 %v504_v47 }
 0x411   :  { %v7697_v48 = vpop.eup %7333 }
 0x412   :  { %v510_v49 = vsel %vm440_vm3, %v7697_v48, 0.0 }
 0x413   :  { %511 = vadd.xlane.f32.xlu0 %v510_v49 }
 0x429   :  { %531 = vrot.lane.b32.xlu0 %v7553_v15, %s7413_s27 }
 0x430   :  { %v461_v50 = vpop.xlane.xlu1 %460 }
 0x431   :  { %v471_v51 = vsub.f32 %v7668_v6, %v461_v50 }
 0x433   :  { %v485_v52 = vmul.f32 1.442695, %v471_v51 }
 0x434   :  { %v538_v53 = vpop.permute.xlu1 %537 }
 0x435   :  { %7335 = vpow2.f32 %v485_v52  ;;  %6945 = vmatprep.subr.mxu1 %v538_v53 }
 0x436   :  { %6946 = vmatpush3.msra.mxu1 %v538_v53 }
 0x437   :  { %6947 = vmatprep.subr.mxu1 %v536_v54 }
 0x438   :  { %6948 = vmatpush3.msra.mxu1 %v536_v54  ;;  %v534_v55 = vpop.permute.xlu1 %533 }
 0x439   :  { %6949 = vmatprep.subr.mxu1 %v534_v55 }
 0x43a   :  { %6950 = vmatpush3.msra.mxu1 %v534_v55 }
 0x442   :  { %v7336_v56 = vpop.eup %7335 }
 0x443   :  { %v507_v57 = vsel %vm440_vm3, %v7336_v56, 0.0 }
 0x444   :  { %508 = vadd.xlane.f32.xlu1 %v507_v57 }
 0x455   :  { %529 = vrot.lane.b32.xlu1 %v7555_v17, %s7413_s27 }
 0x48a   :  { %v494_v58 = vpop.xlane.xlu0 %493 }
 0x48c   :  { %v491_v15 = vpop.xlane.xlu1 %490 }
 0x48d   :  { %7337 = vrcp.f32 %v491_v15 }
 0x48e   :  { %7339 = vrcp.f32 %v494_v58 }
 0x490   :  { %v497_v1 = vpop.xlane.xlu1 %496 }
 0x491   :  { %7341 = vrcp.f32 %v497_v1 }
 0x494   :  { %v500_v59 = vpop.xlane.xlu0 %499 }
 0x495   :  { %v503_v2 = vpop.xlane.xlu1 %502  ;;  %7343 = vrcp.f32 %v500_v59 }
 0x496   :  { %7345 = vrcp.f32 %v503_v2  ;;  %v877_v2 = vld [vmem:[%s9257_s10 + $0xc0] sm:$0xff] }
 0x498   :  { %v506_v60 = vpop.xlane.xlu0 %505 }
 0x499   :  { %7347 = vrcp.f32 %v506_v60 }
 0x49a   :  { %v7338_v61 = vpop.eup %7337 }
 0x49b   :  { %v514_v62 = vmul.f32 %v7338_v61, %v7324_v35  ;;  %v7340_v3 = vpop.eup %7339 }
 0x49c   :  { %v512_v63 = vpop.xlane.xlu0 %511  ;;  %v516_v6 = vmul.f32 %v7340_v3, %v7676_v31 }
 0x49d   :  { %6955 = vmatprep.mubr.msk.f32.mxu1 %vm440_vm3, %v514_v62  ;;  %7349 = vrcp.f32 %v512_v63  ;;  %v870_v62 = vld [vmem:[%s9257_s10 + $0x88] sm:$0xff] }
 0x49e   :  { %v7342_v4 = vpop.eup %7341  ;;  %v878_v63 = vld [vmem:[%s9257_s10 + $0xc8] sm:$0xff] }
 0x49f   :  { %v518_v8 = vmul.f32 %v7342_v4, %v7681_v39  ;;  %v5787_v1 = vcombine.high %v870_v62, %v878_v63 }
 0x4a0   :  { %v532_v0 = vpop.permute.xlu0 %531 }
 0x4a1   :  { %6951 = vmatprep.subr.mxu1 %v532_v0  ;;  %1187 = vmatprep.subr.bf16.mxu0 %v5787_v1 }
 0x4a2   :  { %6952 = vmatpush3.msra.mxu1 %v532_v0  ;;  %v7344_v7 = vpop.eup %7343  ;;  %v869_v0 = vld [vmem:[%s9257_s10 + $0x80] sm:$0xff] }
 0x4a3   :  { %v7346_v9 = vpop.eup %7345  ;;  %v520_v10 = vmul.f32 %v7344_v7, %v7685_v42  ;;  %v5784_v3 = vcombine.low %v869_v0, %v877_v2  ;;  %v5785_v4 = vcombine.high %v869_v0, %v877_v2  ;;  %v853_v7 = vld [vmem:[%s9257_s10] sm:$0xff] }
 0x4a4   :  { %v522_v14 = vmul.f32 %v7346_v9, %v7687_v43  ;;  %v861_v9 = vld [vmem:[%s9257_s10 + $0x40] sm:$0xff] }
 0x4a6   :  { %v7348_v13 = vpop.eup %7347 }
 0x4a7   :  { %v524_v18 = vmul.f32 %v7348_v13, %v7693_v46  ;;  %v5763_v46 = vld [vmem:[%s9256_s7] ss:$0 sm:$0xff]  ;;  %v5768_v13 = vcombine.low %v853_v7, %v861_v9 }
 0x4aa   :  { %v7350_v16 = vpop.eup %7349 }
 0x4ab   :  { %v528_v22 = vmul.f32 %v7350_v16, %v7697_v48  ;;  %v871_v16 = vld [vmem:[%s9257_s10 + $0x90] sm:$0xff] }
 0x4cd   :  { %v509_v17 = vpop.xlane.xlu1 %508 }
 0x4ce   :  { %7351 = vrcp.f32 %v509_v17  ;;  %v5786_v17 = vcombine.low %v870_v62, %v878_v63  ;;  %v876_v62 = vld [vmem:[%s9257_s10 + $0xb8] sm:$0xff] }
 0x4cf   :  { %v884_v63 = vld [vmem:[%s9257_s10 + $0xf8] sm:$0xff] }
 0x4d0   :  { %1188 = vmatpush1.bf16.msra.mxu0 %v5786_v17 }
 0x4d1   :  { %v530_v5 = vpop.permute.xlu1 %529 }
 0x4d2   :  { %6953 = vmatprep.subr.mxu1 %v530_v5 }
 0x4d3   :  { %6954 = vmatpush3.msra.mxu1 %v530_v5  ;;  %v854_v5 = vld [vmem:[%s9257_s10 + $0x8] sm:$0xff] }
 0x4d4   :  { %6956 = vmatmul.mubr.msk.f32.vlgmr.msra.gmra.mxu1 %vm440_vm3, %v516_v6  ;;  %6967 = vmatprep.subr.mxu1 %v716_v24  ;;  %v862_v6 = vld [vmem:[%s9257_s10 + $0x48] sm:$0xff] }
 0x4d5   :  { %6958 = vmatprep.mubr.msk.f32.mxu1 %vm440_vm3, %v518_v8  ;;  %6968 = vmatpush3.msra.mxu1 %v716_v24  ;;  %v5771_v8 = vcombine.high %v854_v5, %v862_v6  ;;  %v880_v24 = vld [vmem:[%s9257_s10 + $0xd8] sm:$0xff] }
 0x4d6   :  { %6969 = vmatprep.subr.mxu1 %v715_v25 }
 0x4d7   :  { %6970 = vmatpush3.msra.mxu1 %v715_v25  ;;  %1189 = vmatprep.subr.bf16.mxu0 %v5771_v8  ;;  %v5799_v8 = vcombine.high %v876_v62, %v884_v63 }
 0x4d8   :  { %6959 = vmatmul.mubr.msk.f32.gmra.mxu1 %vm440_vm3, %v520_v10  ;;  %6971 = vmatprep.subr.mxu1 %v714_v26  ;;  %v5770_v10 = vcombine.low %v854_v5, %v862_v6  ;;  %v860_v5 = vld [vmem:[%s9257_s10 + $0x38] sm:$0xff] }
 0x4d9   :  { %6961 = vmatprep.mubr.msk.f32.mxu1 %vm440_vm3, %v522_v14  ;;  %6972 = vmatpush3.msra.mxu1 %v714_v26  ;;  %v5769_v14 = vcombine.high %v853_v7, %v861_v9  ;;  %v868_v6 = vld [vmem:[%s9257_s10 + $0x78] sm:$0xff] }
 0x4da   :  { %6973 = vmatprep.subr.mxu1 %v713_v21  ;;  %1190 = vmatpush1.bf16.msra.mxu0 %v5770_v10  ;;  %v5798_v10 = vcombine.low %v876_v62, %v884_v63 }
 0x4db   :  { %v7352_v19 = vpop.eup %7351  ;;  %6974 = vmatpush3.msra.mxu1 %v713_v21 }
 0x4dc   :  { %6962 = vmatmul.mubr.msk.f32.gmra.mxu1 %vm440_vm3, %v524_v18  ;;  %v526_v20 = vmul.f32 %v7352_v19, %v7336_v56  ;;  %1144 = vmatprep.subr.bf16.mxu1 %v5785_v4  ;;  %v879_v18 = vld [vmem:[%s9257_s10 + $0xd0] sm:$0xff]  ;;  %v872_v19 = vld [vmem:[%s9257_s10 + $0x98] sm:$0xff] }
 0x4dd   :  { %v5788_v25 = vcombine.low %v871_v16, %v879_v18  ;;  %v5790_v26 = vcombine.low %v872_v19, %v880_v24  ;;  %v5791_v21 = vcombine.high %v872_v19, %v880_v24  ;;  %v867_v4 = vld [vmem:[%s9257_s10 + $0x70] sm:$0xff]  ;;  %v7067_v24 = vld [vmem:[%s9258_s12 + $0x38] sm:$0xff]  }
 0x4de   :  { %6964 = vmatprep.mubr.msk.f32.mxu1 %vm440_vm3, %v526_v20  ;;  %v7417_v20 = vmov 0  }
 0x4df   :  { %1207 = vmatprep.mubr.bf16.mxu0 %v7417_v20  ;;  %1273 = vmatprep.subr.bf16.mxu0 %v5791_v21  ;;  %v7070_v21 = vld [vmem:[%s9258_s12 + $0xf0] sm:$0xff]  }
 0x4e0   :  { %6965 = vmatmul.mubr.msk.f32.gmra.mxu1 %vm440_vm3, %v528_v22  ;;  %v5789_v22 = vcombine.high %v871_v16, %v879_v18  ;;  %v7065_v16 = vld [vmem:[%s9258_s12 + $0x78] sm:$0xff]  }
 0x4e1   :  { %v7066_v18 = vld [vmem:[%s9258_s12 + $0xf8] sm:$0xff]  }
 0x594   :  { %v6957_v27 = vpop.f32.mrf.mxu1 }
 0x596   :  { %v643_v28 = vpop.f32.mrf.mxu1 }
 0x598   :  { %v6960_v23 = vpop.f32.mrf.mxu1 }
 0x599   :  { %686 = vrot.lane.b32.xlu1 %v6960_v23, %s9275_s28 }
 0x59a   :  { %v653_v29 = vpop.f32.mrf.mxu1 }
 0x59b   :  { %684 = vrot.lane.b32.xlu0 %v653_v29, %s9275_s28 }
 0x59c   :  { %v6963_v30 = vpop.f32.mrf.mxu1 }
 0x59d   :  { %694 = vrot.lane.b32.xlu1 %v6963_v30, %s9273_s29 }
 0x59e   :  { %v663_v31 = vpop.f32.mrf.mxu1 }
 0x59f   :  { %692 = vrot.lane.b32.xlu0 %v663_v31, %s9273_s29 }
 0x5a0   :  { %v6966_v32 = vpop.f32.mrf.mxu1 }
 0x5a1   :  { %702 = vrot.lane.b32.xlu1 %v6966_v32, %s9271_s30 }
 0x5a2   :  { %v673_v33 = vpop.f32.mrf.mxu1 }
 0x5a3   :  { %700 = vrot.lane.b32.xlu0 %v673_v33, %s9271_s30  ;;  %v5766_v33 = vld [vmem:[%s9259_s8] ss:$0 sm:$0xff] }
 0x60b   :  { %v687_v34 = vpop.permute.xlu1 %686 }
 0x60c   :  { %v707_v40 = vsel %vm286_vm2, %v6957_v27, %v687_v34 }
 0x60d   :  { %v685_v35 = vpop.permute.xlu0 %684 }
 0x60e   :  { %v706_v38 = vsel %vm286_vm2, %v643_v28, %v685_v35 }
 0x60f   :  { %v695_v36 = vpop.permute.xlu1 %694 }
 0x610   :  { %v709_v43 = vsel %vm81_vm0, %v707_v40, %v695_v36  ;;  %v5767_v36 = vld [vmem:[%s9260_s9] ss:$0 sm:$0xff]  ;;  %v863_v40 = vld [vmem:[%s9257_s10 + $0x50] sm:$0xff] }
 0x611   :  { %v693_v37 = vpop.permute.xlu0 %692 }
 0x612   :  { %v708_v41 = vsel %vm81_vm0, %v706_v38, %v693_v37 }
 0x613   :  { %v703_v39 = vpop.permute.xlu1 %702 }
 0x614   :  { %v712_v45 = vsel %vm710_vm4, %v709_v43, %v703_v39  ;;  %v855_v39 = vld [vmem:[%s9257_s10 + $0x10] sm:$0xff] }
 0x615   :  { %v701_v42 = vpop.permute.xlu0 %700 }
 0x616   :  { %v711_v44 = vsel %vm710_vm4, %v708_v41, %v701_v42  ;;  %v856_v41 = vld [vmem:[%s9257_s10 + $0x18] sm:$0xff] }
 0x617   :  { %6975 = vmatprep.mubr.msk.f32.mxu1 %vm174_vm1, %v711_v44  ;;  %v864_v42 = vld [vmem:[%s9257_s10 + $0x58] sm:$0xff] }
 0x618   :  { %6976 = vmatmul.mubr.msk.f32.vlgmr.msra.gmra.mxu1 %vm174_vm1, %v712_v45 }
 0x619   :  { %1145 = vmatpush1.bf16.msra.mxu1 %v5784_v3  ;;  %1164 = vmatprep.mubr.bf16.mxu1 %v7417_v20  ;;  %v859_v3 = vld [vmem:[%s9257_s10 + $0x30] sm:$0xff] }
 0x61a   :  { %1146 = vmatprep.subr.bf16.mxu1 %v5769_v14  ;;  %v5783_v14 = vcombine.high %v860_v5, %v868_v6  ;;  %v5780_v19 = vcombine.low %v859_v3, %v867_v4 }
 0x61d   :  { %1147 = vmatpush1.bf16.msra.mxu1 %v5768_v13  ;;  %v5781_v13 = vcombine.high %v859_v3, %v867_v4 }
 0x61e   :  { %1230 = vmatprep.subr.bf16.mxu1 %v5789_v22  ;;  %v5782_v22 = vcombine.low %v860_v5, %v868_v6 }
 0x6d8   :  { %v6977_v47 = vpop.f32.mrf.mxu1 }
 0x6d9   :  { %v802_v48 = vadd.f32 %v6977_v47, %v5763_v46  ;;  %v881_v47 = vld [vmem:[%s9257_s10 + $0xe0] sm:$0xff] }
 0x6da   :  { %v796_v49 = vpop.f32.mrf.mxu1 }
 0x6db   :  { %v797_v50 = vadd.f32 %v5763_v46, %v796_v49  ;;  %v806_v51 = vadd.f32 %v802_v48, %v7544_v12  ;;  %v873_v46 = vld [vmem:[%s9257_s10 + $0xa0] sm:$0xff]  ;;  %v874_v48 = vld [vmem:[%s9257_s10 + $0xa8] sm:$0xff] }
 0x6dc   :  { %v882_v49 = vld [vmem:[%s9257_s10 + $0xe8] sm:$0xff] }
 0x6dd   :  { %v812_v52 = vsel %vm174_vm1, %v806_v51, 0.0  ;;  %v805_v53 = vadd.f32 %v797_v50, %v7542_v11 }
 0x6de   :  { %813 = vadd.xlane.f32.xlu1 %v812_v52  ;;  %v5775_v52 = vcombine.high %v856_v41, %v864_v42 }
 0x6df   :  { %v809_v54 = vsel %vm174_vm1, %v805_v53, 0.0 }
 0x6e0   :  { %810 = vadd.xlane.f32.xlu0 %v809_v54  ;;  %v5774_v54 = vcombine.low %v856_v41, %v864_v42  ;;  %v7086_v41 = vld [vmem:[%s9258_s12 + $0xd0] sm:$0xff]  }
 0x6e1   :  { %v7087_v42 = vld [vmem:[%s9258_s12 + $0x10] sm:$0xff]  }
 0x767   :  { %v814_v55 = vpop.xlane.xlu1 %813 }
 0x768   :  { %v817_v56 = vmul.f32 0.03125, %v814_v55  ;;  %v857_v55 = vld [vmem:[%s9257_s10 + $0x20] sm:$0xff] }
 0x769   :  { %v811_v57 = vpop.xlane.xlu0 %810 }
 0x76a   :  { %v816_v15 = vmul.f32 0.03125, %v811_v57  ;;  %v7754_v58 = vsub.f32 %v806_v51, %v817_v56  ;;  %v5773_v51 = vcombine.high %v855_v39, %v863_v40  ;;  %v865_v56 = vld [vmem:[%s9257_s10 + $0x60] sm:$0xff]  ;;  %v858_v57 = vld [vmem:[%s9257_s10 + $0x28] sm:$0xff] }
 0x76b   :  { %v5777_v0 = vcombine.high %v857_v55, %v865_v56  ;;  %v5776_v2 = vcombine.low %v857_v55, %v865_v56  ;;  %v7098_v55 = vld [vmem:[%s9258_s12 + $0x1f8] sm:$0xff]   ;;  %v889_v56 = vlaneseq }
 0x76c   :  { %v818_v59 = vsub.f32 %v805_v53, %v816_v15  ;;  %v821_v12 = vmul.f32 %v7754_v58, %v7754_v58  ;;  %v5772_v53 = vcombine.low %v855_v39, %v863_v40  ;;  %v866_v15 = vld [vmem:[%s9257_s10 + $0x68] sm:$0xff]  ;;  %v7084_v39 = vld [vmem:[%s9258_s12 + $0x98] sm:$0xff]   ;;  %v7085_v40 = vld [vmem:[%s9258_s12 + $0x50] sm:$0xff]  }
 0x76d   :  { %v5779_v1 = vcombine.high %v858_v57, %v866_v15  ;;  %v5778_v17 = vcombine.low %v858_v57, %v866_v15  ;;  %v7997_v57 = vshrl.u32 %v889_v56, 7  ;;  %v7105_v56 = vld [vmem:[%s9258_s12 + $0x168] sm:$0xff]  }
 0x76e   :  { %v820_v60 = vmul.f32 %v818_v59, %v818_v59  ;;  %v825_v11 = vsel %vm174_vm1, %v821_v12, 0.0  ;;  %v875_v12 = vld [vmem:[%s9257_s10 + $0xb0] sm:$0xff] }
 0x76f   :  { %v8000_v15 = vsub.s32 1, %v7997_v57  ;;  %v8025_v5 = vsub.s32 5, %v7997_v57  ;;  %v8028_v6 = vsub.s32 7, %v7997_v57 }
 0x770   :  { %v822_v61 = vsel %vm174_vm1, %v820_v60, 0.0  ;;  %v5792_v60 = vcombine.low %v873_v46, %v881_v47 }
 0x771   :  { %823 = vadd.xlane.f32.xlu0 %v822_v61  ;;  %v5794_v61 = vcombine.low %v874_v48, %v882_v49 }
 0x775   :  { %826 = vadd.xlane.f32.xlu0 %v825_v11  ;;  %v883_v11 = vld [vmem:[%s9257_s10 + $0xf0] sm:$0xff] }
 0x776   :  { %v5797_v7 = vcombine.high %v875_v12, %v883_v11  ;;  %v5796_v9 = vcombine.low %v875_v12, %v883_v11 }
 0x7fa   :  { %v824_v27 = vpop.xlane.xlu0 %823 }
 0x7fb   :  { %v828_v28 = vmul.f32 0.03125, %v824_v27  ;;  %v7071_v27 = vld [vmem:[%s9258_s12 + $0x30] sm:$0xff]  }
 0x7fd   :  { %v830_v23 = vadd.f32 1e-05, %v828_v28  ;;  %v7072_v28 = vld [vmem:[%s9258_s12 + $0xb0] sm:$0xff]  }
 0x7fe   :  { %v827_v29 = vpop.xlane.xlu0 %826 }
 0x7ff   :  { %7353 = vrsqrt.f32 %v830_v23  ;;  %v829_v30 = vmul.f32 0.03125, %v827_v29  ;;  %v7073_v23 = vld [vmem:[%s9258_s12 + $0x68] sm:$0xff]  }
 0x800   :  { %v7074_v29 = vld [vmem:[%s9258_s12 + $0xe8] sm:$0xff]  }
 0x801   :  { %v831_v31 = vadd.f32 1e-05, %v829_v30  ;;  %v7075_v30 = vld [vmem:[%s9258_s12 + $0x28] sm:$0xff]  }
 0x803   :  { %7355 = vrsqrt.f32 %v831_v31  ;;  %v7076_v31 = vld [vmem:[%s9258_s12 + $0xa8] sm:$0xff]  }
 0x80c   :  { %v7354_v32 = vpop.eup %7353 }
 0x80d   :  { %v834_v34 = vmul.f32 %v7354_v32, %v818_v59  ;;  %v5795_v59 = vcombine.high %v874_v48, %v882_v49  ;;  %v7077_v32 = vld [vmem:[%s9258_s12 + $0x60] sm:$0xff]   ;;  %v7091_v48 = vld [vmem:[%s9258_s12 + $0x8] sm:$0xff]  }
 0x80e   :  { %v7092_v49 = vld [vmem:[%s9258_s12 + $0x88] sm:$0xff]  }
 0x80f   :  { %v842_v37 = vmul.f32 %v5766_v33, %v834_v34  ;;  %v7079_v34 = vld [vmem:[%s9258_s12 + $0x20] sm:$0xff]  }
 0x810   :  { %v7356_v35 = vpop.eup %7355 }
 0x811   :  { %v835_v38 = vmul.f32 %v7356_v35, %v7754_v58  ;;  %v7817_v44 = vadd.f32 %v5767_v36, %v842_v37  ;;  %v5793_v58 = vcombine.high %v873_v46, %v881_v47  ;;  %v7080_v35 = vld [vmem:[%s9258_s12 + $0xa0] sm:$0xff]   ;;  %v7082_v37 = vld [vmem:[%s9258_s12 + $0xd8] sm:$0xff]   ;;  %v7089_v46 = vld [vmem:[%s9258_s12 + $0x48] sm:$0xff]  }
 0x812   :  { %v7090_v47 = vld [vmem:[%s9258_s12 + $0xc8] sm:$0xff]  }
 0x813   :  { %v843_v43 = vmul.f32 %v5766_v33, %v835_v38  ;;  %v7078_v33 = vld [vmem:[%s9258_s12 + $0xe0] sm:$0xff]   ;;  %v7083_v38 = vld [vmem:[%s9258_s12 + $0x18] sm:$0xff]  }
 0x815   :  { %v7819_v45 = vadd.f32 %v5767_v36, %v843_v43  ;;  %v7081_v36 = vld [vmem:[%s9258_s12 + $0x58] sm:$0xff]   ;;  %v7088_v43 = vld [vmem:[%s9258_s12 + $0x90] sm:$0xff]  }
 0x817   :  { %v7835_v50 = vpack.c.bf16 %v7819_v45, %v7817_v44 }
 0x819   :  { %5800 = vmatmul.mubr.msk.bf16.vlgmr.msra.gmra.mxu1 %vm174_vm1, %v7835_v50  ;;  %5801 = vmatmul.mubr.msk.bf16.vlgmr.msra.gmra.mxu0 %vm174_vm1, %v7835_v50 }
 0x81a   :  { %1231 = vmatpush1.bf16.msra.mxu1 %v5788_v25  ;;  %1274 = vmatpush1.bf16.msra.mxu0 %v5790_v26  ;;  %v7068_v25 = vld [vmem:[%s9258_s12 + $0xb8] sm:$0xff]   ;;  %v7069_v26 = vld [vmem:[%s9258_s12 + $0x70] sm:$0xff]  }
 0x81b   :  { %1232 = vmatprep.subr.bf16.mxu1 %v5773_v51  ;;  %1275 = vmatprep.subr.bf16.mxu0 %v5775_v52  ;;  %v7094_v51 = vld [vmem:[%s9258_s12 + $0xc0] sm:$0xff]  }
 0x81c   :  { %1250 = vmatprep.mubr.bf16.mxu1 %v7417_v20  ;;  %1293 = vmatprep.mubr.bf16.mxu0 %v7417_v20  ;;  %v7095_v52 = vld [vmem:[%s9258_s12] sm:$0xff]  }
 0x81e   :  { %1233 = vmatpush1.bf16.msra.mxu1 %v5772_v53  ;;  %1276 = vmatpush1.bf16.msra.mxu0 %v5774_v54  ;;  %v7096_v53 = vld [vmem:[%s9258_s12 + $0x80] sm:$0xff]   ;;  %v7097_v54 = vld [vmem:[%s9258_s12 + $0x178] sm:$0xff]  }
 0x81f   :  { %1316 = vmatprep.subr.bf16.mxu1 %v5793_v58  ;;  %1359 = vmatprep.subr.bf16.mxu0 %v5795_v59  ;;  %v8003_v58 = vsub.s32 3, %v7997_v57  ;;  %v8006_v59 = vsub.s32 0, %v7997_v57 }
 0x821   :  { %5802 = vmatmul.mubr.msk.bf16.vlgmr.msra.gmra.mxu1 %vm174_vm1, %v7835_v50  ;;  %5803 = vmatmul.mubr.msk.bf16.vlgmr.msra.gmra.mxu0 %vm174_vm1, %v7835_v50 }
 0x822   :  { %1317 = vmatpush1.bf16.msra.mxu1 %v5792_v60  ;;  %1360 = vmatpush1.bf16.msra.mxu0 %v5794_v61  ;;  %v8009_v60 = vsub.s32 2, %v7997_v57  ;;  %v8014_v61 = vld [vmem:[%s9261_s11] sm:$0xff] }
 0x823   :  { %1318 = vmatprep.subr.bf16.mxu1 %v5777_v0  ;;  %1361 = vmatprep.subr.bf16.mxu0 %v5779_v1  ;;  %v896_v62 = vrot.slane %v8014_v61, %v8000_v15  ;;  %v904_v63 = vrot.slane %v8014_v61, %v8003_v58  ;;  %v892_v0 = vrot.slane %v8014_v61, %v8006_v59 }
 0x824   :  { %1336 = vmatprep.mubr.bf16.mxu1 %v7417_v20  ;;  %1379 = vmatprep.mubr.bf16.mxu0 %v7417_v20  ;;  %v900_v1 = vrot.slane %v8014_v61, %v8009_v60 }
 0x826   :  { %1319 = vmatpush1.bf16.msra.mxu1 %v5776_v2  ;;  %1362 = vmatpush1.bf16.msra.mxu0 %v5778_v17 }
 0x827   :  { %1402 = vmatprep.subr.bf16.mxu1 %v5797_v7  ;;  %1445 = vmatprep.subr.bf16.mxu0 %v5799_v8 }
 0x829   :  { %5804 = vmatmul.mubr.msk.bf16.vlgmr.msra.gmra.mxu1 %vm174_vm1, %v7835_v50  ;;  %5805 = vmatmul.mubr.msk.bf16.vlgmr.msra.gmra.mxu0 %vm174_vm1, %v7835_v50 }
 0x82a   :  { %1403 = vmatpush1.bf16.msra.mxu1 %v5796_v9  ;;  %1446 = vmatpush1.bf16.msra.mxu0 %v5798_v10 }
 0x82b   :  { %1404 = vmatprep.subr.bf16.mxu1 %v5781_v13  ;;  %1447 = vmatprep.subr.bf16.mxu0 %v5783_v14 }
 0x82c   :  { %1422 = vmatprep.mubr.bf16.mxu1 %v7417_v20  ;;  %1465 = vmatprep.mubr.bf16.mxu0 %v7417_v20 }
 0x82e   :  { %1405 = vmatpush1.bf16.msra.mxu1 %v5780_v19  ;;  %1448 = vmatpush1.bf16.msra.mxu0 %v5782_v22 }
 0x82f   :  { %6497 = vmatprep.subr.bf16.mxu1 %v7065_v16  ;;  %6519 = vmatprep.subr.bf16.mxu0 %v7066_v18 }
 0x831   :  { %5806 = vmatmul.mubr.msk.bf16.vlgmr.msra.gmra.mxu1 %vm174_vm1, %v7835_v50  ;;  %5807 = vmatmul.mubr.msk.bf16.vlgmr.msra.gmra.mxu0 %vm174_vm1, %v7835_v50  ;;  %v7093_v50 = vld [vmem:[%s9258_s12 + $0x40] sm:$0xff]  }
 0x832   :  { %6498 = vmatpush3.bf16.msra.mxu1 %v7067_v24  ;;  %6520 = vmatpush3.bf16.msra.mxu0 %v7068_v25 }
 0x833   :  { %6499 = vmatprep.subr.bf16.mxu1 %v7069_v26  ;;  %6521 = vmatprep.subr.bf16.mxu0 %v7070_v21 }
 0x836   :  { %6500 = vmatpush3.bf16.msra.mxu1 %v7071_v27  ;;  %6522 = vmatpush3.bf16.msra.mxu0 %v7072_v28  ;;  %v912_v27 = vrot.slane %v8014_v61, %v8025_v5  ;;  %v920_v28 = vrot.slane %v8014_v61, %v8028_v6 }
 0x837   :  { %6501 = vmatprep.subr.bf16.mxu1 %v7073_v23  ;;  %6523 = vmatprep.subr.bf16.mxu0 %v7074_v29 }
 0x83a   :  { %6502 = vmatpush3.bf16.msra.mxu1 %v7075_v30  ;;  %6524 = vmatpush3.bf16.msra.mxu0 %v7076_v31 }
 0x83b   :  { %6503 = vmatprep.subr.bf16.mxu1 %v7077_v32  ;;  %6525 = vmatprep.subr.bf16.mxu0 %v7078_v33 }
 0x83e   :  { %6504 = vmatpush3.bf16.msra.mxu1 %v7079_v34  ;;  %6526 = vmatpush3.bf16.msra.mxu0 %v7080_v35 }
 0x83f   :  { %6505 = vmatprep.subr.bf16.mxu1 %v7081_v36  ;;  %6527 = vmatprep.subr.bf16.mxu0 %v7082_v37 }
 0x842   :  { %6506 = vmatpush3.bf16.msra.mxu1 %v7083_v38  ;;  %6528 = vmatpush3.bf16.msra.mxu0 %v7084_v39  ;;  %v7099_v38 = vld [vmem:[%s9258_s12 + $0x138] sm:$0xff]  }
 0x843   :  { %6507 = vmatprep.subr.bf16.mxu1 %v7085_v40  ;;  %6529 = vmatprep.subr.bf16.mxu0 %v7086_v41  ;;  %v7100_v39 = vld [vmem:[%s9258_s12 + $0x1b8] sm:$0xff]  }
 0x846   :  { %6508 = vmatpush3.bf16.msra.mxu1 %v7087_v42  ;;  %6530 = vmatpush3.bf16.msra.mxu0 %v7088_v43 }
 0x847   :  { %6509 = vmatprep.subr.bf16.mxu1 %v7089_v46  ;;  %6531 = vmatprep.subr.bf16.mxu0 %v7090_v47  ;;  %v7101_v46 = vld [vmem:[%s9258_s12 + $0x170] sm:$0xff]  }
 0x848   :  { %v7102_v47 = vld [vmem:[%s9258_s12 + $0x1f0] sm:$0xff]  }
 0x84a   :  { %6510 = vmatpush3.bf16.msra.mxu1 %v7091_v48  ;;  %6532 = vmatpush3.bf16.msra.mxu0 %v7092_v49 }
 0x84b   :  { %6511 = vmatprep.subr.bf16.mxu1 %v7093_v50  ;;  %6533 = vmatprep.subr.bf16.mxu0 %v7094_v51 }
 0x84e   :  { %6512 = vmatpush3.bf16.msra.mxu1 %v7095_v52  ;;  %6534 = vmatpush3.bf16.msra.mxu0 %v7096_v53 }
 0x84f   :  { %6541 = vmatprep.subr.bf16.mxu1 %v7097_v54  ;;  %6563 = vmatprep.subr.bf16.mxu0 %v7098_v55  ;;  %v7103_v54 = vld [vmem:[%s9258_s12 + $0x130] sm:$0xff]  }
 0x850   :  { %v7104_v55 = vld [vmem:[%s9258_s12 + $0x1b0] sm:$0xff]  }
 0x8d9   :  { %v1166_v12 = vpop.f32.mrf.mxu1  ;;  %v1209_v11 = vpop.f32.mrf.mxu0 }
 0x8da   :  { %v1167_v13 = vadd.f32 %v1166_v12, %v892_v0  ;;  %v1210_v14 = vadd.f32 %v1209_v11, %v900_v1 }
 0x8db   :  { %v1168_v2 = vpop.f32.mrf.mxu1  ;;  %v1211_v17 = vpop.f32.mrf.mxu0 }
 0x8dc   :  { %v1169_v7 = vadd.f32 %v1168_v2, %v896_v62  ;;  %v1212_v8 = vadd.f32 %v1211_v17, %v904_v63  ;;  %v1476_v32 = vmax.f32 %v1167_v13, 0.0  ;;  %v1478_v33 = vmax.f32 %v1210_v14, 0.0  ;;  %v7107_v17 = vld [vmem:[%s9258_s12 + $0x128] sm:$0xff]   ;;  %v7112_v13 = vld [vmem:[%s9258_s12 + $0x1a0] sm:$0xff]   ;;  %v7113_v14 = vld [vmem:[%s9258_s12 + $0x158] sm:$0xff]  }
 0x8dd   :  { %v1170_v3 = vpop.f32.mrf.mxu1  ;;  %v1213_v4 = vpop.f32.mrf.mxu0 }
 0x8de   :  { %v1171_v9 = vadd.f32 %v1170_v3, %v892_v0  ;;  %v1214_v10 = vadd.f32 %v1213_v4, %v900_v1  ;;  %v1477_v23 = vmax.f32 %v1169_v7, 0.0  ;;  %v1479_v29 = vmax.f32 %v1212_v8, 0.0  ;;  %v7106_v0 = vld [vmem:[%s9258_s12 + $0x1e8] sm:$0xff]   ;;  %v7109_v4 = vld [vmem:[%s9258_s12 + $0x160] sm:$0xff]  }
 0x8df   :  { %v1172_v16 = vpop.f32.mrf.mxu1  ;;  %v1215_v18 = vpop.f32.mrf.mxu0  ;;  %v7108_v3 = vld [vmem:[%s9258_s12 + $0x1a8] sm:$0xff]   ;;  %v7110_v7 = vld [vmem:[%s9258_s12 + $0x1e0] sm:$0xff]  }
 0x8e0   :  { %v1173_v19 = vadd.f32 %v1172_v16, %v896_v62  ;;  %v1216_v22 = vadd.f32 %v1215_v18, %v904_v63  ;;  %v1492_v24 = vmax.f32 %v1171_v9, 0.0  ;;  %v1494_v25 = vmax.f32 %v1214_v10, 0.0  ;;  %v7111_v9 = vld [vmem:[%s9258_s12 + $0x120] sm:$0xff]   ;;  %v7114_v16 = vld [vmem:[%s9258_s12 + $0x1d8] sm:$0xff]  }
 0x8e1   :  { %v8030_v26 = vpop.f32.mrf.mxu1  ;;  %v8032_v21 = vpop.f32.mrf.mxu0 }
 0x8e2   :  { %v1493_v30 = vmax.f32 %v1173_v19, 0.0  ;;  %v1495_v31 = vmax.f32 %v1216_v22, 0.0  ;;  %v1508_v40 = vpack.c.bf16 %v1492_v24, %v1476_v32  ;;  %v1510_v41 = vpack.c.bf16 %v1494_v25, %v1478_v33  ;;  %v7115_v19 = vld [vmem:[%s9258_s12 + $0x118] sm:$0xff]   ;;  %v7117_v25 = vld [vmem:[%s9258_s12 + $0x150] sm:$0xff]   ;;  %v7122_v33 = vld [vmem:[%s9258_s12 + $0x1c8] sm:$0xff]  }
 0x8e3   :  { %v1254_v34 = vpop.f32.mrf.mxu1  ;;  %v1297_v35 = vpop.f32.mrf.mxu0  ;;  %v7116_v24 = vld [vmem:[%s9258_s12 + $0x198] sm:$0xff]   ;;  %v7120_v32 = vld [vmem:[%s9258_s12 + $0x190] sm:$0xff]  }
 0x8e4   :  { %v1509_v36 = vpack.c.bf16 %v1493_v30, %v1477_v23  ;;  %v1511_v37 = vpack.c.bf16 %v1495_v31, %v1479_v29  ;;  %v1255_v48 = vadd.f32 %v1254_v34, %v912_v27  ;;  %v1298_v49 = vadd.f32 %v1297_v35, %v920_v28  ;;  %v7119_v30 = vld [vmem:[%s9258_s12 + $0x110] sm:$0xff]  }
 0x8e5   :  { %v8044_v42 = vpop.f32.mrf.mxu1  ;;  %v8046_v43 = vpop.f32.mrf.mxu0  ;;  %v8110_v23 = vsub.s32 6, %v7997_v57 }
 0x8e6   :  { %2587 = vmatprep.mubr.bf16.mxu1 %v1509_v36  ;;  %2628 = vmatprep.mubr.bf16.mxu0 %v1511_v37  ;;  %v1481_v12 = vmax.f32 %v1255_v48, 0.0  ;;  %v1483_v11 = vmax.f32 %v1298_v49, 0.0  ;;  %v8135_v36 = vld [vmem:[%s9261_s11 + $0x8] sm:$0xff] }
 0x8e7   :  { %v1258_v50 = vpop.f32.mrf.mxu1  ;;  %v1301_v51 = vpop.f32.mrf.mxu0  ;;  %2588 = vmatmul.mubr.bf16.vlgmr.msra.gmra.mxu1 %v1508_v40  ;;  %2629 = vmatmul.mubr.bf16.vlgmr.msra.gmra.mxu0 %v1510_v41  ;;  %v916_v35 = vrot.slane %v8014_v61, %v8110_v23  ;;  %v928_v40 = vrot.slane %v8135_v36, %v8000_v15  ;;  %v936_v48 = vrot.slane %v8135_v36, %v8003_v58 }
 0x8e8   :  { %v1259_v52 = vadd.f32 %v1258_v50, %v912_v27  ;;  %v1302_v53 = vadd.f32 %v1301_v51, %v920_v28  ;;  %6542 = vmatpush3.bf16.msra.mxu1 %v7099_v38  ;;  %6564 = vmatpush3.bf16.msra.mxu0 %v7100_v39  ;;  %v7118_v27 = vld [vmem:[%s9258_s12 + $0x1d0] sm:$0xff]   ;;  %v8107_v28 = vsub.s32 4, %v7997_v57  ;;  %v7121_v57 = vld [vmem:[%s9258_s12 + $0x148] sm:$0xff]  }
 0x8e9   :  { %6543 = vmatprep.subr.bf16.mxu1 %v7101_v46  ;;  %6565 = vmatprep.subr.bf16.mxu0 %v7102_v47  ;;  %v8078_v8 = vpop.f32.mrf.mxu1  ;;  %v8083_v10 = vpop.f32.mrf.mxu0  ;;  %v7123_v38 = vld [vmem:[%s9258_s12 + $0x108] sm:$0xff]   ;;  %v7125_v46 = vld [vmem:[%s9258_s12 + $0x140] sm:$0xff]   ;;  %v1300_v47 = vadd.f32 %v8046_v43, %v916_v35  ;;  %v1296_v51 = vadd.f32 %v8032_v21, %v916_v35 }
 0x8ea   :  { %v1497_v62 = vmax.f32 %v1259_v52, 0.0  ;;  %v1499_v63 = vmax.f32 %v1302_v53, 0.0  ;;  %v908_v34 = vrot.slane %v8014_v61, %v8107_v28  ;;  %v7124_v61 = vld [vmem:[%s9258_s12 + $0x188] sm:$0xff]   ;;  %v7127_v53 = vld [vmem:[%s9258_s12 + $0x100] sm:$0xff]  }
 0x8eb   :  { %v1340_v18 = vpop.f32.mrf.mxu1  ;;  %v1383_v22 = vpop.f32.mrf.mxu0  ;;  %v7144_v35 = vld [vmem:[%s9258_s12 + $0x2a0] sm:$0xff]  }
 0x8ec   :  { %v1513_v1 = vpack.c.bf16 %v1497_v62, %v1481_v12  ;;  %v1515_v2 = vpack.c.bf16 %v1499_v63, %v1483_v11  ;;  %6544 = vmatpush3.bf16.msra.mxu1 %v7103_v54  ;;  %6566 = vmatpush3.bf16.msra.mxu0 %v7104_v55  ;;  %v1257_v39 = vadd.f32 %v8044_v42, %v908_v34  ;;  %v7126_v42 = vld [vmem:[%s9258_s12 + $0x1c0] sm:$0xff]   ;;  %v7130_v12 = vld [vmem:[%s9258_s12 + $0x2f8] sm:$0xff]   ;;  %v1482_v63 = vmax.f32 %v1296_v51, 0.0  ;;  %v7153_v51 = vld [vmem:[%s9258_s12 + $0x248] sm:$0xff]  }
 0x8ed   :  { %6545 = vmatprep.subr.bf16.mxu1 %v7105_v56  ;;  %6567 = vmatprep.subr.bf16.mxu0 %v7106_v0  ;;  %v8112_v29 = vpop.f32.mrf.mxu1  ;;  %v8117_v31 = vpop.f32.mrf.mxu0  ;;  %v1253_v49 = vadd.f32 %v8030_v26, %v908_v34  ;;  %v1341_v54 = vadd.f32 %v1340_v18, %v928_v40  ;;  %v7128_v55 = vld [vmem:[%s9258_s12 + $0x180] sm:$0xff]   ;;  %v7129_v26 = vld [vmem:[%s9258_s12 + $0x278] sm:$0xff]   ;;  %v1498_v56 = vmax.f32 %v1300_v47, 0.0  ;;  %v1384_v21 = vadd.f32 %v1383_v22, %v936_v48  ;;  %v7135_v18 = vld [vmem:[%s9258_s12 + $0x230] sm:$0xff]  }
 0x8ee   :  { %2669 = vmatprep.mubr.bf16.mxu1 %v1513_v1  ;;  %2710 = vmatprep.mubr.bf16.mxu0 %v1515_v2  ;;  %v1496_v43 = vmax.f32 %v1257_v39, 0.0  ;;  %v7131_v1 = vld [vmem:[%s9258_s12 + $0x238] sm:$0xff]   ;;  %v7137_v22 = vld [vmem:[%s9258_s12 + $0x268] sm:$0xff]   ;;  %v7150_v47 = vld [vmem:[%s9258_s12 + $0x2d0] sm:$0xff]  }
 0x8ef   :  { %v1344_v37 = vpop.f32.mrf.mxu1  ;;  %v1387_v41 = vpop.f32.mrf.mxu0  ;;  %v1480_v11 = vmax.f32 %v1253_v49, 0.0 }
 0x8f0   :  { %6546 = vmatpush3.bf16.msra.mxu1 %v7107_v17  ;;  %6568 = vmatpush3.bf16.msra.mxu0 %v7108_v3  ;;  %v1345_v50 = vadd.f32 %v1344_v37, %v928_v40  ;;  %v1388_v52 = vadd.f32 %v1387_v41, %v936_v48  ;;  %v1485_v17 = vmax.f32 %v1341_v54, 0.0  ;;  %v7132_v3 = vld [vmem:[%s9258_s12 + $0x2b8] sm:$0xff]  }
 0x8f1   :  { %6547 = vmatprep.subr.bf16.mxu1 %v7109_v4  ;;  %6569 = vmatprep.subr.bf16.mxu0 %v7110_v7  ;;  %v1512_v2 = vpack.c.bf16 %v1496_v43, %v1480_v11  ;;  %v1514_v4 = vpack.c.bf16 %v1498_v56, %v1482_v63  ;;  %v1487_v7 = vmax.f32 %v1384_v21, 0.0  ;;  %v8210_v34 = vpop.f32.mrf.mxu0  ;;  %v7145_v37 = vld [vmem:[%s9258_s12 + $0x258] sm:$0xff]   ;;  %v932_v43 = vrot.slane %v8135_v36, %v8009_v60  ;;  %v7157_v11 = vld [vmem:[%s9258_s12 + $0x240] sm:$0xff]  }
 0x8f2   :  { %v1501_v62 = vmax.f32 %v1345_v50, 0.0  ;;  %v1503_v0 = vmax.f32 %v1388_v52, 0.0  ;;  %v7147_v40 = vld [vmem:[%s9258_s12 + $0x218] sm:$0xff]   ;;  %v7152_v50 = vld [vmem:[%s9258_s12 + $0x290] sm:$0xff]   ;;  %v7154_v52 = vld [vmem:[%s9258_s12 + $0x2c8] sm:$0xff]   ;;  %v944_v56 = vrot.slane %v8135_v36, %v8025_v5  ;;  %v952_v63 = vrot.slane %v8135_v36, %v8028_v6 }
 0x8f3   :  { %v1469_v41 = vpop.f32.mrf.mxu0 }
 0x8f4   :  { %6548 = vmatpush3.bf16.msra.mxu1 %v7111_v9  ;;  %6570 = vmatpush3.bf16.msra.mxu0 %v7112_v13  ;;  %v7133_v9 = vld [vmem:[%s9258_s12 + $0x270] sm:$0xff]   ;;  %v1517_v13 = vpack.c.bf16 %v1501_v62, %v1485_v17  ;;  %v1386_v62 = vadd.f32 %v8117_v31, %v932_v43 }
 0x8f5   :  { %6549 = vmatprep.subr.bf16.mxu1 %v7113_v14  ;;  %6571 = vmatprep.subr.bf16.mxu0 %v7114_v16  ;;  %v7134_v14 = vld [vmem:[%s9258_s12 + $0x2f0] sm:$0xff]   ;;  %v1519_v16 = vpack.c.bf16 %v1503_v0, %v1487_v7  ;;  %v8238_v49 = vpop.f32.mrf.mxu0  ;;  %v7160_v7 = vld [vmem:[%s9258_s12 + $0x280] sm:$0xff]  }
 0x8f7   :  { %v1473_v21 = vpop.f32.mrf.mxu0 }
 0x8f8   :  { %6550 = vmatpush3.bf16.msra.mxu1 %v7115_v19  ;;  %6572 = vmatpush3.bf16.msra.mxu0 %v7116_v24  ;;  %v7136_v19 = vld [vmem:[%s9258_s12 + $0x2b0] sm:$0xff]   ;;  %v7138_v24 = vld [vmem:[%s9258_s12 + $0x2e8] sm:$0xff]   ;;  %v1474_v17 = vadd.f32 %v1473_v21, %v952_v63 }
 0x8f9   :  { %6551 = vmatprep.subr.bf16.mxu1 %v7117_v25  ;;  %6573 = vmatprep.subr.bf16.mxu0 %v7118_v27  ;;  %v7139_v25 = vld [vmem:[%s9258_s12 + $0x228] sm:$0xff]   ;;  %v7183_v21 = vld [vmem:[%s9258_s12 + $0x310] sm:$0xff]  }
 0x8fa   :  { %v7140_v27 = vld [vmem:[%s9258_s12 + $0x2a8] sm:$0xff]  }
 0x8fc   :  { %6552 = vmatpush3.bf16.msra.mxu1 %v7119_v30  ;;  %6574 = vmatpush3.bf16.msra.mxu0 %v7120_v32  ;;  %v7141_v30 = vld [vmem:[%s9258_s12 + $0x260] sm:$0xff]  }
 0x8fd   :  { %6553 = vmatprep.subr.bf16.mxu1 %v7121_v57  ;;  %6575 = vmatprep.subr.bf16.mxu0 %v7122_v33  ;;  %v7142_v32 = vld [vmem:[%s9258_s12 + $0x2e0] sm:$0xff]   ;;  %v8205_v57 = vpop.f32.mrf.mxu1 }
 0x8fe   :  { %v7143_v33 = vld [vmem:[%s9258_s12 + $0x220] sm:$0xff]  }
 0x8ff   :  { %v1426_v39 = vpop.f32.mrf.mxu1 }
 0x900   :  { %6554 = vmatpush3.bf16.msra.mxu1 %v7123_v38  ;;  %6576 = vmatpush3.bf16.msra.mxu0 %v7124_v61  ;;  %v7146_v38 = vld [vmem:[%s9258_s12 + $0x2d8] sm:$0xff]  }
 0x901   :  { %6555 = vmatprep.subr.bf16.mxu1 %v7125_v46  ;;  %6577 = vmatprep.subr.bf16.mxu0 %v7126_v42  ;;  %v7148_v61 = vld [vmem:[%s9258_s12 + $0x298] sm:$0xff]   ;;  %v7149_v46 = vld [vmem:[%s9258_s12 + $0x250] sm:$0xff]   ;;  %v8233_v48 = vpop.f32.mrf.mxu1 }
 0x902   :  { %v7151_v42 = vld [vmem:[%s9258_s12 + $0x210] sm:$0xff]  }
 0x903   :  { %v1430_v54 = vpop.f32.mrf.mxu1 }
 0x904   :  { %6556 = vmatpush3.bf16.msra.mxu1 %v7127_v53  ;;  %6578 = vmatpush3.bf16.msra.mxu0 %v7128_v55  ;;  %v924_v53 = vrot.slane %v8135_v36, %v8006_v59  ;;  %v7155_v55 = vld [vmem:[%s9258_s12 + $0x208] sm:$0xff]  }
 0x905   :  { %6585 = vmatprep.subr.bf16.mxu1 %v7129_v26  ;;  %6607 = vmatprep.subr.bf16.mxu0 %v7130_v12  ;;  %v7156_v12 = vld [vmem:[%s9258_s12 + $0x288] sm:$0xff]  }
 0x906   :  { %v1343_v26 = vadd.f32 %v8112_v29, %v924_v53  ;;  %v7158_v29 = vld [vmem:[%s9258_s12 + $0x2c0] sm:$0xff]   ;;  %v1339_v0 = vadd.f32 %v8078_v8, %v924_v53  ;;  %v7161_v8 = vld [vmem:[%s9258_s12 + $0x378] sm:$0xff]  }
 0x907   :  { %2670 = vmatmul.mubr.bf16.vlgmr.msra.gmra.mxu1 %v1512_v2  ;;  %2711 = vmatmul.mubr.bf16.vlgmr.msra.gmra.mxu0 %v1514_v4  ;;  %v1382_v2 = vadd.f32 %v8083_v10, %v932_v43  ;;  %v1427_v4 = vadd.f32 %v1426_v39, %v944_v56  ;;  %v1470_v10 = vadd.f32 %v1469_v41, %v952_v63  ;;  %v7167_v39 = vld [vmem:[%s9258_s12 + $0x330] sm:$0xff]   ;;  %v7169_v41 = vld [vmem:[%s9258_s12 + $0x368] sm:$0xff]   ;;  %v7177_v53 = vld [vmem:[%s9258_s12 + $0x358] sm:$0xff]  }
 0x908   :  { %6586 = vmatpush3.bf16.msra.mxu1 %v7131_v1  ;;  %2751 = vmatprep.mubr.bf16.mxu1 %v1517_v13  ;;  %v1431_v1 = vadd.f32 %v1430_v54, %v944_v56  ;;  %v1500_v31 = vmax.f32 %v1343_v26, 0.0  ;;  %v7162_v13 = vld [vmem:[%s9258_s12 + $0x3f8] sm:$0xff]   ;;  %v7181_v26 = vld [vmem:[%s9258_s12 + $0x350] sm:$0xff]   ;;  %v940_v63 = vrot.slane %v8135_v36, %v8107_v28 }
 0x909   :  { %6608 = vmatpush3.bf16.msra.mxu0 %v7132_v3  ;;  %2792 = vmatprep.mubr.bf16.mxu0 %v1519_v16  ;;  %v7159_v3 = vld [vmem:[%s9258_s12 + $0x200] sm:$0xff]   ;;  %v7178_v43 = vld [vmem:[%s9258_s12 + $0x3d8] sm:$0xff]   ;;  %v7182_v56 = vld [vmem:[%s9258_s12 + $0x3d0] sm:$0xff]  }
 0x90a   :  { %6587 = vmatprep.subr.bf16.mxu1 %v7133_v9  ;;  %6609 = vmatprep.subr.bf16.mxu0 %v7134_v14  ;;  %v1502_v9 = vmax.f32 %v1386_v62, 0.0  ;;  %v1484_v14 = vmax.f32 %v1339_v0, 0.0  ;;  %v1505_v16 = vmax.f32 %v1431_v1, 0.0  ;;  %v7179_v54 = vld [vmem:[%s9258_s12 + $0x318] sm:$0xff]   ;;  %v7186_v62 = vld [vmem:[%s9258_s12 + $0x3c8] sm:$0xff]   ;;  %v1429_v1 = vadd.f32 %v8233_v48, %v940_v63 }
 0x90b   :  { %v7187_v0 = vld [vmem:[%s9258_s12 + $0x308] sm:$0xff]  }
 0x90c   :  { %6588 = vmatpush3.bf16.msra.mxu1 %v7135_v18  ;;  %v1486_v18 = vmax.f32 %v1382_v2, 0.0  ;;  %v7188_v2 = vld [vmem:[%s9258_s12 + $0x388] sm:$0xff]  }
 0x90d   :  { %6610 = vmatpush3.bf16.msra.mxu0 %v7136_v19  ;;  %6589 = vmatprep.subr.bf16.mxu1 %v7137_v22  ;;  %v1507_v19 = vmax.f32 %v1474_v17, 0.0  ;;  %v7163_v22 = vld [vmem:[%s9258_s12 + $0x338] sm:$0xff]   ;;  %v7189_v17 = vld [vmem:[%s9258_s12 + $0x340] sm:$0xff]  }
 0x90e   :  { %6611 = vmatprep.subr.bf16.mxu0 %v7138_v24  ;;  %v1516_v24 = vpack.c.bf16 %v1500_v31, %v1484_v14  ;;  %v1425_v31 = vadd.f32 %v8205_v57, %v940_v63 }
 0x910   :  { %6590 = vmatpush3.bf16.msra.mxu1 %v7139_v25  ;;  %v1489_v25 = vmax.f32 %v1427_v4, 0.0  ;;  %v7191_v4 = vld [vmem:[%s9258_s12 + $0x300] sm:$0xff]  }
 0x911   :  { %6612 = vmatpush3.bf16.msra.mxu0 %v7140_v27  ;;  %6591 = vmatprep.subr.bf16.mxu1 %v7141_v30  ;;  %v7164_v27 = vld [vmem:[%s9258_s12 + $0x3b8] sm:$0xff]   ;;  %v1518_v30 = vpack.c.bf16 %v1502_v9, %v1486_v18  ;;  %v1488_v9 = vmax.f32 %v1425_v31, 0.0 }
 0x912   :  { %6613 = vmatprep.subr.bf16.mxu0 %v7142_v32  ;;  %v1491_v32 = vmax.f32 %v1470_v10, 0.0 }
 0x914   :  { %6592 = vmatpush3.bf16.msra.mxu1 %v7143_v33  ;;  %v7165_v33 = vld [vmem:[%s9258_s12 + $0x370] sm:$0xff]  }
 0x915   :  { %6614 = vmatpush3.bf16.msra.mxu0 %v7144_v35  ;;  %6593 = vmatprep.subr.bf16.mxu1 %v7145_v37  ;;  %v1521_v35 = vpack.c.bf16 %v1505_v16, %v1489_v25  ;;  %v7166_v37 = vld [vmem:[%s9258_s12 + $0x3f0] sm:$0xff]  }
 0x916   :  { %6615 = vmatprep.subr.bf16.mxu0 %v7146_v38  ;;  %v1523_v38 = vpack.c.bf16 %v1507_v19, %v1491_v32 }
 0x918   :  { %6594 = vmatpush3.bf16.msra.mxu1 %v7147_v40  ;;  %v7168_v40 = vld [vmem:[%s9258_s12 + $0x3b0] sm:$0xff]  }
 0x919   :  { %6616 = vmatpush3.bf16.msra.mxu0 %v7148_v61  ;;  %6595 = vmatprep.subr.bf16.mxu1 %v7149_v46  ;;  %v7170_v61 = vld [vmem:[%s9258_s12 + $0x3e8] sm:$0xff]  }
 0x91a   :  { %6617 = vmatprep.subr.bf16.mxu0 %v7150_v47  ;;  %v7171_v46 = vld [vmem:[%s9258_s12 + $0x328] sm:$0xff]  }
 0x91b   :  { %v7172_v47 = vld [vmem:[%s9258_s12 + $0x3a8] sm:$0xff]  }
 0x91c   :  { %6596 = vmatpush3.bf16.msra.mxu1 %v7151_v42  ;;  %v7173_v42 = vld [vmem:[%s9258_s12 + $0x360] sm:$0xff]  }
 0x91d   :  { %6618 = vmatpush3.bf16.msra.mxu0 %v7152_v50  ;;  %6597 = vmatprep.subr.bf16.mxu1 %v7153_v51  ;;  %v7174_v50 = vld [vmem:[%s9258_s12 + $0x3e0] sm:$0xff]  }
 0x91e   :  { %6619 = vmatprep.subr.bf16.mxu0 %v7154_v52  ;;  %v7175_v51 = vld [vmem:[%s9258_s12 + $0x320] sm:$0xff]  }
 0x91f   :  { %v7176_v52 = vld [vmem:[%s9258_s12 + $0x3a0] sm:$0xff]  }
 0x920   :  { %6598 = vmatpush3.bf16.msra.mxu1 %v7155_v55  ;;  %v7180_v55 = vld [vmem:[%s9258_s12 + $0x398] sm:$0xff]  }
 0x921   :  { %6620 = vmatpush3.bf16.msra.mxu0 %v7156_v12  ;;  %6599 = vmatprep.subr.bf16.mxu1 %v7157_v11  ;;  %v7184_v12 = vld [vmem:[%s9258_s12 + $0x390] sm:$0xff]   ;;  %v7185_v11 = vld [vmem:[%s9258_s12 + $0x348] sm:$0xff]  }
 0x922   :  { %6621 = vmatprep.subr.bf16.mxu0 %v7158_v29  ;;  %v948_v29 = vrot.slane %v8135_v36, %v8110_v23  ;;  %v7190_v36 = vld [vmem:[%s9258_s12 + $0x3c0] sm:$0xff]  }
 0x924   :  { %6600 = vmatpush3.bf16.msra.mxu1 %v7159_v3  ;;  %v1472_v3 = vadd.f32 %v8238_v49, %v948_v29  ;;  %v1468_v48 = vadd.f32 %v8210_v34, %v948_v29  ;;  %v7192_v49 = vld [vmem:[%s9258_s12 + $0x380] sm:$0xff]  }
 0x925   :  { %6622 = vmatpush3.bf16.msra.mxu0 %v7160_v7  ;;  %6629 = vmatprep.subr.bf16.mxu1 %v7161_v8  ;;  %v1504_v7 = vmax.f32 %v1429_v1, 0.0 }
 0x926   :  { %6651 = vmatprep.subr.bf16.mxu0 %v7162_v13  ;;  %v1506_v8 = vmax.f32 %v1472_v3, 0.0  ;;  %v1490_v10 = vmax.f32 %v1468_v48, 0.0 }
 0x927   :  { %2752 = vmatmul.mubr.bf16.vlgmr.msra.gmra.mxu1 %v1516_v24  ;;  %v1520_v57 = vpack.c.bf16 %v1504_v7, %v1488_v9 }
 0x928   :  { %2793 = vmatmul.mubr.bf16.vlgmr.msra.gmra.mxu0 %v1518_v30  ;;  %6630 = vmatpush3.bf16.msra.mxu1 %v7163_v22  ;;  %v1522_v34 = vpack.c.bf16 %v1506_v8, %v1490_v10 }
 0x929   :  { %2833 = vmatprep.mubr.bf16.mxu1 %v1521_v35  ;;  %6652 = vmatpush3.bf16.msra.mxu0 %v7164_v27 }
 0x92a   :  { %2874 = vmatprep.mubr.bf16.mxu0 %v1523_v38  ;;  %6631 = vmatprep.subr.bf16.mxu1 %v7165_v33 }
 0x92b   :  { %6653 = vmatprep.subr.bf16.mxu0 %v7166_v37 }
 0x92c   :  { %6632 = vmatpush3.bf16.msra.mxu1 %v7167_v39 }
 0x92d   :  { %6654 = vmatpush3.bf16.msra.mxu0 %v7168_v40  ;;  %6633 = vmatprep.subr.bf16.mxu1 %v7169_v41  ;;  %v5808_v40 = vld [vmem:[%s9262_s13] ss:$0 sm:$0xff] }
 0x92e   :  { %6655 = vmatprep.subr.bf16.mxu0 %v7170_v61 }
 0x930   :  { %6634 = vmatpush3.bf16.msra.mxu1 %v7171_v46 }
 0x931   :  { %6656 = vmatpush3.bf16.msra.mxu0 %v7172_v47  ;;  %6635 = vmatprep.subr.bf16.mxu1 %v7173_v42 }
 0x932   :  { %6657 = vmatprep.subr.bf16.mxu0 %v7174_v50 }
 0x934   :  { %6636 = vmatpush3.bf16.msra.mxu1 %v7175_v51 }
 0x935   :  { %6658 = vmatpush3.bf16.msra.mxu0 %v7176_v52  ;;  %6637 = vmatprep.subr.bf16.mxu1 %v7177_v53 }
 0x936   :  { %6659 = vmatprep.subr.bf16.mxu0 %v7178_v43 }
 0x938   :  { %6638 = vmatpush3.bf16.msra.mxu1 %v7179_v54 }
 0x939   :  { %6660 = vmatpush3.bf16.msra.mxu0 %v7180_v55  ;;  %6639 = vmatprep.subr.bf16.mxu1 %v7181_v26 }
 0x93a   :  { %6661 = vmatprep.subr.bf16.mxu0 %v7182_v56 }
 0x93c   :  { %6640 = vmatpush3.bf16.msra.mxu1 %v7183_v21 }
 0x93d   :  { %6662 = vmatpush3.bf16.msra.mxu0 %v7184_v12  ;;  %6641 = vmatprep.subr.bf16.mxu1 %v7185_v11 }
 0x93e   :  { %6663 = vmatprep.subr.bf16.mxu0 %v7186_v62 }
 0x940   :  { %6642 = vmatpush3.bf16.msra.mxu1 %v7187_v0 }
 0x941   :  { %6664 = vmatpush3.bf16.msra.mxu0 %v7188_v2  ;;  %6643 = vmatprep.subr.bf16.mxu1 %v7189_v17 }
 0x942   :  { %6665 = vmatprep.subr.bf16.mxu0 %v7190_v36 }
 0x944   :  { %6644 = vmatpush3.bf16.msra.mxu1 %v7191_v4 }
 0x945   :  { %6666 = vmatpush3.bf16.msra.mxu0 %v7192_v49 }
 0x947   :  { %2834 = vmatmul.mubr.bf16.vlgmr.msra.gmra.mxu1 %v1520_v57 }
 0x948   :  { %2875 = vmatmul.mubr.bf16.vlgmr.msra.gmra.mxu0 %v1522_v34 }
 0x9a7   :  { %v6513_v13 = vpop.f32.mrf.mxu1  ;;  %v6535_v14 = vpop.f32.mrf.mxu0 }
 0x9a9   :  { %v6514_v16 = vpop.f32.mrf.mxu1  ;;  %v6536_v18 = vpop.f32.mrf.mxu0 }
 0x9aa   :  { %v6515_v39 = vadd.f32 %v6514_v16, %v6513_v13  ;;  %v6537_v51 = vadd.f32 %v6536_v18, %v6535_v14 }
 0x9ab   :  { %v6516_v19 = vpop.f32.mrf.mxu1  ;;  %v6538_v22 = vpop.f32.mrf.mxu0 }
 0x9ac   :  { %v2590_v46 = vadd.f32 %v6515_v39, %v5808_v40 }
 0x9ad   :  { %v6517_v24 = vpop.f32.mrf.mxu1  ;;  %v6539_v27 = vpop.f32.mrf.mxu0 }
 0x9ae   :  { %v6518_v47 = vadd.f32 %v6517_v24, %v6516_v19  ;;  %v2631_v53 = vadd.f32 %v6537_v51, %v2590_v46  ;;  %v6540_v26 = vadd.f32 %v6539_v27, %v6538_v22 }
 0x9b0   :  { %v2593_v43 = vadd.f32 %v6518_v47, %v5808_v40 }
 0x9b2   :  { %v2634_v12 = vadd.f32 %v6540_v26, %v2593_v43  ;;  %v5940_v43 = vld [vmem:[%s9282_s4 + $0x28] sm:$0xff] }
 0x9c7   :  { %v6557_v25 = vpop.f32.mrf.mxu1  ;;  %v6579_v30 = vpop.f32.mrf.mxu0 }
 0x9c9   :  { %v6558_v32 = vpop.f32.mrf.mxu1  ;;  %v6580_v33 = vpop.f32.mrf.mxu0 }
 0x9ca   :  { %v6559_v52 = vadd.f32 %v6558_v32, %v6557_v25  ;;  %v6581_v11 = vadd.f32 %v6580_v33, %v6579_v30 }
 0x9cb   :  { %v6560_v35 = vpop.f32.mrf.mxu1  ;;  %v6582_v37 = vpop.f32.mrf.mxu0 }
 0x9cc   :  { %v2672_v56 = vadd.f32 %v6559_v52, %v2631_v53  ;;  %v5941_v53 = vld [vmem:[%s9282_s4 + $0x30] sm:$0xff] }
 0x9cd   :  { %v6561_v38 = vpop.f32.mrf.mxu1  ;;  %v6583_v61 = vpop.f32.mrf.mxu0 }
 0x9ce   :  { %v6562_v21 = vadd.f32 %v6561_v38, %v6560_v35  ;;  %v2713_v0 = vadd.f32 %v6581_v11, %v2672_v56  ;;  %v6584_v2 = vadd.f32 %v6583_v61, %v6582_v37 }
 0x9d0   :  { %v2675_v1 = vadd.f32 %v6562_v21, %v2634_v12 }
 0x9d2   :  { %v2716_v48 = vadd.f32 %v6584_v2, %v2675_v1 }
 0x9e7   :  { %v6601_v41 = vpop.f32.mrf.mxu1 }
 0x9e8   :  { %v6623_v42 = vpop.f32.mrf.mxu0 }
 0x9e9   :  { %v6602_v50 = vpop.f32.mrf.mxu1 }
 0x9ea   :  { %v6624_v54 = vpop.f32.mrf.mxu0  ;;  %v6603_v62 = vadd.f32 %v6602_v50, %v6601_v41 }
 0x9eb   :  { %v6604_v55 = vpop.f32.mrf.mxu1  ;;  %v6625_v4 = vadd.f32 %v6624_v54, %v6623_v42  ;;  %v5939_v54 = vld [vmem:[%s9282_s4 + $0x20] sm:$0xff] }
 0x9ec   :  { %v6626_v63 = vpop.f32.mrf.mxu0  ;;  %v2754_v17 = vadd.f32 %v6603_v62, %v2713_v0  ;;  %v5938_v0 = vld [vmem:[%s9264_s15] ss:$0 sm:$0xff] }
 0x9ed   :  { %v6605_v29 = vpop.f32.mrf.mxu1 }
 0x9ee   :  { %v6606_v3 = vadd.f32 %v6605_v29, %v6604_v55  ;;  %v6627_v36 = vpop.f32.mrf.mxu0  ;;  %v2795_v8 = vadd.f32 %v6625_v4, %v2754_v17 }
 0x9ef   :  { %v6628_v13 = vadd.f32 %v6627_v36, %v6626_v63  ;;  %v5937_v63 = vld [vmem:[%s9263_s14] ss:$0 sm:$0xff] }
 0x9f0   :  { %v2757_v9 = vadd.f32 %v6606_v3, %v2716_v48  ;;  %v5944_v48 = vld [vmem:[%s9253_s5 + $0x1] ss:$0 sm:$0xff] }
 0x9f2   :  { %v2798_v22 = vadd.f32 %v6628_v13, %v2757_v9 }
 0xa07   :  { %v6645_v31 = vpop.f32.mrf.mxu1 }
 0xa08   :  { %v6667_v7 = vpop.f32.mrf.mxu0 }
 0xa09   :  { %v6646_v49 = vpop.f32.mrf.mxu1 }
 0xa0a   :  { %v6647_v10 = vadd.f32 %v6646_v49, %v6645_v31  ;;  %v6668_v57 = vpop.f32.mrf.mxu0 }
 0xa0b   :  { %v6648_v34 = vpop.f32.mrf.mxu1  ;;  %v6669_v16 = vadd.f32 %v6668_v57, %v6667_v7 }
 0xa0c   :  { %v2836_v14 = vadd.f32 %v6647_v10, %v2795_v8  ;;  %v6670_v18 = vpop.f32.mrf.mxu0 }
 0xa0d   :  { %v6649_v19 = vpop.f32.mrf.mxu1 }
 0xa0e   :  { %v2877_v24 = vadd.f32 %v6669_v16, %v2836_v14  ;;  %v6650_v25 = vadd.f32 %v6649_v19, %v6648_v34  ;;  %v6671_v27 = vpop.f32.mrf.mxu0 }
 0xa0f   :  { %v6672_v32 = vadd.f32 %v6671_v27, %v6670_v18 }
 0xa10   :  { %v2839_v30 = vadd.f32 %v6650_v25, %v2798_v22  ;;  %v2883_v33 = vadd.f32 %v2877_v24, %v7817_v44 }
 0xa12   :  { %v2880_v35 = vadd.f32 %v6672_v32, %v2839_v30  ;;  %v2887_v37 = vsel %vm174_vm1, %v2883_v33, 0.0 }
 0xa13   :  { %2888 = vadd.xlane.f32.xlu1 %v2887_v37 }
 0xa14   :  { %v2884_v38 = vadd.f32 %v2880_v35, %v7819_v45  ;;  %v5942_v45 = vld [vmem:[%s9282_s4 + $0x38] sm:$0xff] }
 0xa15   :  { %6978 = vmatprep.subr.mxu1 %v5942_v45 }
 0xa16   :  { %v2890_v39 = vsel %vm174_vm1, %v2884_v38, 0.0  ;;  %6979 = vmatpush3.msra.mxu1 %v5942_v45 }
 0xa17   :  { %2891 = vadd.xlane.f32.xlu0 %v2890_v39  ;;  %6980 = vmatprep.subr.mxu1 %v5941_v53 }
 0xa18   :  { %6981 = vmatpush3.msra.mxu1 %v5941_v53 }
 0xa19   :  { %6982 = vmatprep.subr.mxu1 %v5940_v43 }
 0xa1a   :  { %6983 = vmatpush3.msra.mxu1 %v5940_v43 }
 0xa1b   :  { %6984 = vmatprep.subr.mxu1 %v5939_v54 }
 0xa1c   :  { %6985 = vmatpush3.msra.mxu1 %v5939_v54 }
 0xa9c   :  { %v2889_v40 = vpop.xlane.xlu1 %2888 }
 0xa9d   :  { %v2893_v41 = vmul.f32 0.03125, %v2889_v40 }
 0xa9f   :  { %v2895_v61 = vsub.f32 %v2883_v33, %v2893_v41 }
 0xaa0   :  { %v2892_v46 = vpop.xlane.xlu0 %2891 }
 0xaa1   :  { %v2894_v47 = vmul.f32 0.03125, %v2892_v46  ;;  %v2897_v42 = vmul.f32 %v2895_v61, %v2895_v61 }
 0xaa3   :  { %v2896_v50 = vsub.f32 %v2884_v38, %v2894_v47  ;;  %v2899_v51 = vsel %vm174_vm1, %v2897_v42, 0.0  ;;  %v7401_v38 = vld [vmem:[%s9254_s1 + $0x8] sm:$0xff] }
 0xaa4   :  { %2900 = vadd.xlane.f32.xlu1 %v2899_v51 }
 0xaa5   :  { %v2898_v44 = vmul.f32 %v2896_v50, %v2896_v50 }
 0xaa7   :  { %v2902_v52 = vsel %vm174_vm1, %v2898_v44, 0.0 }
 0xaa8   :  { %2903 = vadd.xlane.f32.xlu0 %v2902_v52  ;;  %v7403_v52 = vld [vmem:[%s9254_s1 + $0x10] sm:$0xff] }
 0xb2d   :  { %v2901_v55 = vpop.xlane.xlu1 %2900 }
 0xb2e   :  { %v2905_v26 = vmul.f32 0.03125, %v2901_v55 }
 0xb30   :  { %v2907_v56 = vadd.f32 1e-05, %v2905_v26  ;;  %v7404_v26 = vld [vmem:[%s9254_s1 + $0x18] sm:$0xff] }
 0xb31   :  { %v2904_v21 = vpop.xlane.xlu0 %2903 }
 0xb32   :  { %7357 = vrsqrt.f32 %v2907_v56  ;;  %v2906_v12 = vmul.f32 0.03125, %v2904_v21 }
 0xb34   :  { %v2908_v11 = vadd.f32 1e-05, %v2906_v12  ;;  %v7405_v12 = vld [vmem:[%s9254_s1 + $0x20] sm:$0xff] }
 0xb36   :  { %7359 = vrsqrt.f32 %v2908_v11 }
 0xb3f   :  { %v7358_v62 = vpop.eup %7357 }
 0xb40   :  { %v2911_v29 = vmul.f32 %v7358_v62, %v2895_v61  ;;  %v7402_v61 = vld [vmem:[%s9254_s1] sm:$0xff] }
 0xb42   :  { %v2919_v1 = vmul.f32 %v5937_v63, %v2911_v29 }
 0xb43   :  { %v7360_v2 = vpop.eup %7359 }
 0xb44   :  { %v2912_v17 = vmul.f32 %v7360_v2, %v2896_v50  ;;  %v8410_v3 = vadd.f32 %v5938_v0, %v2919_v1 }
 0xb46   :  { %v2920_v36 = vmul.f32 %v5937_v63, %v2912_v17  ;;  %6986 = vmatprep.mubr.msk.f32.mxu1 %vm174_vm1, %v8410_v3  ;;  %v7407_v17 = vld [vmem:[%s9254_s1 + $0x38] sm:$0xff] }
 0xb48   :  { %v8414_v31 = vadd.f32 %v5938_v0, %v2920_v36  ;;  %v7406_v0 = vld [vmem:[%s9254_s1 + $0x28] sm:$0xff] }
 0xb4a   :  { %6987 = vmatmul.mubr.msk.f32.vlgmr.msra.gmra.mxu1 %vm174_vm1, %v8414_v31 }
 0xc0a   :  { %v6988_v4 = vpop.f32.mrf.mxu1 }
 0xc0b   :  { %v8421_v7 = vadd.f32 %v6988_v4, %v5944_v48 }
 0xc0c   :  { %v3014_v49 = vpop.f32.mrf.mxu1 }
 0xc0d   :  { %v8423_v8 = vadd.f32 %v5944_v48, %v3014_v49  ;;  %3035 = vrot.lane.b32.xlu1 %v8421_v7, %s7410_s21 }
 0xc0f   :  { %3033 = vrot.lane.b32.xlu0 %v8423_v8, %s7410_s21  ;;  %7005 = vmatprep.mubr.msk.f32.mxu0 %vm286_vm2, %v8423_v8 }
 0xc11   :  { %3031 = vrot.lane.b32.xlu1 %v8421_v7, %s7409_s3 }
 0xc13   :  { %3027 = vrot.lane.b32.xlu0 %v8421_v7, %s7411_s22 }
 0xc15   :  { %3029 = vrot.lane.b32.xlu1 %v8423_v8, %s7409_s3 }
 0xc19   :  { %3025 = vrot.lane.b32.xlu1 %v8423_v8, %s7411_s22 }
 0xc7f   :  { %v8439_v9 = vpop.permute.xlu1 %3035 }
 0xc80   :  { %3051 = vrot.lane.b32.xlu0 %v8439_v9, %s7412_s23 }
 0xc81   :  { %v8443_v10 = vpop.permute.xlu0 %3033 }
 0xc82   :  { %3049 = vrot.lane.b32.xlu1 %v8443_v10, %s7412_s23 }
 0xc83   :  { %v8447_v57 = vpop.permute.xlu1 %3031 }
 0xc84   :  { %3047 = vrot.lane.b32.xlu0 %v8447_v57, %s7412_s23 }
 0xc85   :  { %v8451_v34 = vpop.permute.xlu0 %3027 }
 0xc87   :  { %v8453_v13 = vpop.permute.xlu1 %3029 }
 0xc88   :  { %3045 = vrot.lane.b32.xlu1 %v8453_v13, %s7412_s23  ;;  %3043 = vrot.lane.b32.xlu0 %v8451_v34, %s7412_s23 }
 0xc8b   :  { %v8459_v14 = vpop.permute.xlu1 %3025 }
 0xc8c   :  { %3041 = vrot.lane.b32.xlu1 %v8459_v14, %s7412_s23  ;;  %3039 = vrot.lane.b32.xlu0 %v8421_v7, %s7412_s23 }
 0xc90   :  { %3037 = vrot.lane.b32.xlu1 %v8423_v8, %s7412_s23 }
 0xcf2   :  { %v3052_v16 = vpop.permute.xlu0 %3051 }
 0xcf3   :  { %6989 = vmatprep.subr.msk.mxu0 %vm286_vm2, %v3052_v16 }
 0xcf4   :  { %v3050_v18 = vpop.permute.xlu1 %3049  ;;  %6990 = vmatpush3.xpose.msk.msra.mxu0 %vm286_vm2, %v3052_v16  ;;  %v7408_v16 = vld [vmem:[%s9254_s1 + $0x30] sm:$0xff] }
 0xcf5   :  { %6991 = vmatprep.subr.msk.mxu0 %vm286_vm2, %v3050_v18 }
 0xcf6   :  { %v3048_v19 = vpop.permute.xlu0 %3047 }
 0xcf8   :  { %6992 = vmatpush3.xpose.msk.msra.mxu0 %vm286_vm2, %v3050_v18 }
 0xcf9   :  { %6993 = vmatprep.subr.msk.mxu0 %vm286_vm2, %v3048_v19 }
 0xcfa   :  { %v3046_v22 = vpop.permute.xlu1 %3045  ;;  %v3044_v24 = vpop.permute.xlu0 %3043 }
 0xcfc   :  { %6994 = vmatpush3.xpose.msk.msra.mxu0 %vm286_vm2, %v3048_v19 }
 0xcfd   :  { %6995 = vmatprep.subr.msk.mxu0 %vm286_vm2, %v3046_v22 }
 0xcfe   :  { %v3042_v25 = vpop.permute.xlu1 %3041  ;;  %v3040_v27 = vpop.permute.xlu0 %3039 }
 0xd00   :  { %6996 = vmatpush3.xpose.msk.msra.mxu0 %vm286_vm2, %v3046_v22 }
 0xd01   :  { %6997 = vmatprep.subr.msk.mxu0 %vm286_vm2, %v3044_v24 }
 0xd02   :  { %v3038_v30 = vpop.permute.xlu1 %3037 }
 0xd04   :  { %6998 = vmatpush3.xpose.msk.msra.mxu0 %vm286_vm2, %v3044_v24 }
 0xd05   :  { %6999 = vmatprep.subr.msk.mxu0 %vm286_vm2, %v3042_v25 }
 0xd08   :  { %7000 = vmatpush3.xpose.msk.msra.mxu0 %vm286_vm2, %v3042_v25 }
 0xd09   :  { %7001 = vmatprep.subr.msk.mxu0 %vm286_vm2, %v3040_v27 }
 0xd0c   :  { %7002 = vmatpush3.xpose.msk.msra.mxu0 %vm286_vm2, %v3040_v27 }
 0xd0d   :  { %7003 = vmatprep.subr.msk.mxu0 %vm286_vm2, %v3038_v30 }
 0xd10   :  { %7004 = vmatpush3.xpose.msk.msra.mxu0 %vm286_vm2, %v3038_v30 }
 0xd13   :  { %7006 = vmatmul.mubr.msk.f32.vlgmr.msra.gmra.mxu0 %vm286_vm2, %v8421_v7 }
 0xd14   :  { %7008 = vmatprep.mubr.msk.f32.mxu0 %vm286_vm2, %v8459_v14 }
 0xd17   :  { %7009 = vmatmul.mubr.msk.f32.gmra.mxu0 %vm286_vm2, %v8451_v34 }
 0xd18   :  { %7011 = vmatprep.mubr.msk.f32.mxu0 %vm286_vm2, %v8453_v13 }
 0xd1b   :  { %7012 = vmatmul.mubr.msk.f32.gmra.mxu0 %vm286_vm2, %v8447_v57 }
 0xd1c   :  { %7014 = vmatprep.mubr.msk.f32.mxu0 %vm286_vm2, %v8443_v10 }
 0xd1f   :  { %7015 = vmatmul.mubr.msk.f32.gmra.mxu0 %vm286_vm2, %v8439_v9 }
 0xd20   :  { %3976 = vmatprep.mubr.bf16.mxu0 %v7417_v20 }
 0xdd3   :  { %v7007_v32 = vpop.f32.mrf.mxu0 }
 0xdd4   :  { %v3191_v33 = vmul.f32 0.35355338, %v7007_v32 }
 0xdd5   :  { %v3151_v35 = vpop.f32.mrf.mxu0 }
 0xdd6   :  { %v3190_v37 = vmul.f32 0.35355338, %v3151_v35  ;;  %v3199_v39 = vadd.f32 %v7401_v38, %v3191_v33 }
 0xdd7   :  { %v7010_v40 = vpop.f32.mrf.mxu0 }
 0xdd8   :  { %v3209_v41 = vsel %vm440_vm3, %v3199_v39, -inf  ;;  %v3198_v46 = vadd.f32 %v7402_v61, %v3190_v37  ;;  %v3193_v42 = vmul.f32 0.35355338, %v7010_v40 }
 0xdd9   :  { %3210 = vmax.xlane.f32.xlu1 %v3209_v41  ;;  %v3161_v47 = vpop.f32.mrf.mxu0 }
 0xdda   :  { %v3192_v50 = vmul.f32 0.35355338, %v3161_v47  ;;  %v3206_v51 = vsel %vm440_vm3, %v3198_v46, -inf  ;;  %v3201_v56 = vadd.f32 %v7404_v26, %v3193_v42 }
 0xddb   :  { %3207 = vmax.xlane.f32.xlu0 %v3206_v51  ;;  %v7013_v44 = vpop.f32.mrf.mxu0 }
 0xddc   :  { %v3200_v45 = vadd.f32 %v7403_v52, %v3192_v50  ;;  %v3195_v43 = vmul.f32 0.35355338, %v7013_v44  ;;  %v3215_v63 = vsel %vm440_vm3, %v3201_v56, -inf }
 0xddd   :  { %v3171_v53 = vpop.f32.mrf.mxu0 }
 0xdde   :  { %v3194_v54 = vmul.f32 0.35355338, %v3171_v53  ;;  %v3212_v55 = vsel %vm440_vm3, %v3200_v45, -inf  ;;  %v3203_v1 = vadd.f32 %v7406_v0, %v3195_v43 }
 0xddf   :  { %3213 = vmax.xlane.f32.xlu0 %v3212_v55  ;;  %v7016_v21 = vpop.f32.mrf.mxu0 }
 0xde0   :  { %v3202_v11 = vadd.f32 %v7405_v12, %v3194_v54  ;;  %v3197_v62 = vmul.f32 0.35355338, %v7016_v21  ;;  %v3221_v2 = vsel %vm440_vm3, %v3203_v1, -inf }
 0xde1   :  { %v3181_v4 = vpop.f32.mrf.mxu0 }
 0xde2   :  { %v3218_v29 = vsel %vm440_vm3, %v3202_v11, -inf  ;;  %v3205_v36 = vadd.f32 %v7407_v17, %v3197_v62  ;;  %v3196_v49 = vmul.f32 0.35355338, %v3181_v4 }
 0xde3   :  { %3216 = vmax.xlane.f32.xlu0 %v3215_v63  ;;  %3219 = vmax.xlane.f32.xlu1 %v3218_v29 }
 0xde4   :  { %v3227_v48 = vsel %vm440_vm3, %v3205_v36, -inf  ;;  %v8537_v18 = vadd.f32 %v7408_v16, %v3196_v49 }
 0xde7   :  { %3222 = vmax.xlane.f32.xlu0 %v3221_v2 }
 0xdeb   :  { %3228 = vmax.xlane.f32.xlu0 %v3227_v48 }
 0xdf4   :  { %3308 = vrot.lane.b32.xlu1 %v8439_v9, %s7413_s27  ;;  %v3224_v9 = vsel %vm440_vm3, %v8537_v18, -inf }
 0xdf8   :  { %3304 = vrot.lane.b32.xlu1 %v8447_v57, %s7413_s27 }
 0xe01   :  { %3306 = vrot.lane.b32.xlu0 %v8443_v10, %s7413_s27 }
 0xe05   :  { %3300 = vrot.lane.b32.xlu0 %v8451_v34, %s7413_s27 }
 0xe1c   :  { %3225 = vmax.xlane.f32.xlu1 %v3224_v9 }
 0xe2d   :  { %3302 = vrot.lane.b32.xlu1 %v8453_v13, %s7413_s27 }
 0xe31   :  { %3298 = vrot.lane.b32.xlu1 %v8459_v14, %s7413_s27 }
 0xe62   :  { %v3211_v10 = vpop.xlane.xlu1 %3210 }
 0xe63   :  { %v3231_v57 = vsub.f32 %v3199_v39, %v3211_v10 }
 0xe64   :  { %v3208_v34 = vpop.xlane.xlu0 %3207 }
 0xe65   :  { %v3240_v19 = vmul.f32 1.442695, %v3231_v57  ;;  %v3230_v22 = vsub.f32 %v3198_v46, %v3208_v34 }
 0xe67   :  { %7361 = vpow2.f32 %v3240_v19  ;;  %v3238_v24 = vmul.f32 1.442695, %v3230_v22 }
 0xe68   :  { %v3214_v25 = vpop.xlane.xlu0 %3213 }
 0xe69   :  { %7363 = vpow2.f32 %v3238_v24  ;;  %v3232_v27 = vsub.f32 %v3200_v45, %v3214_v25 }
 0xe6b   :  { %v3242_v30 = vmul.f32 1.442695, %v3232_v27 }
 0xe6c   :  { %v3217_v32 = vpop.xlane.xlu0 %3216  ;;  %v3220_v33 = vpop.xlane.xlu1 %3219 }
 0xe6d   :  { %7365 = vpow2.f32 %v3242_v30  ;;  %v3233_v35 = vsub.f32 %v3201_v56, %v3217_v32  ;;  %v3234_v37 = vsub.f32 %v3202_v11, %v3220_v33 }
 0xe6f   :  { %v3244_v13 = vmul.f32 1.442695, %v3233_v35  ;;  %v3246_v38 = vmul.f32 1.442695, %v3234_v37 }
 0xe70   :  { %v3223_v40 = vpop.xlane.xlu0 %3222  ;;  %v3309_v14 = vpop.permute.xlu1 %3308 }
 0xe71   :  { %7367 = vpow2.f32 %v3244_v13  ;;  %v3235_v39 = vsub.f32 %v3203_v1, %v3223_v40  ;;  %7017 = vmatprep.subr.mxu1 %v3309_v14 }
 0xe72   :  { %7369 = vpow2.f32 %v3246_v38  ;;  %7018 = vmatpush3.msra.mxu1 %v3309_v14 }
 0xe73   :  { %v3248_v41 = vmul.f32 1.442695, %v3235_v39 }
 0xe74   :  { %v8545_v61 = vpop.eup %7361  ;;  %v3229_v46 = vpop.xlane.xlu0 %3228 }
 0xe75   :  { %7371 = vpow2.f32 %v3248_v41  ;;  %v3237_v47 = vsub.f32 %v3205_v36, %v3229_v46  ;;  %v3257_v42 = vsel %vm440_vm3, %v8545_v61, 0.0  ;;  %v3305_v53 = vpop.permute.xlu1 %3304  ;;  %v5973_v46 = vld [vmem:[%s9255_s6 + $0x30] sm:$0xff] }
 0xe76   :  { %v7364_v50 = vpop.eup %7363  ;;  %3258 = vadd.xlane.f32.xlu0 %v3257_v42  ;;  %v5971_v42 = vld [vmem:[%s9255_s6 + $0x20] sm:$0xff] }
 0xe77   :  { %v3252_v51 = vmul.f32 1.442695, %v3237_v47  ;;  %v3254_v44 = vsel %vm440_vm3, %v7364_v50, 0.0  ;;  %v5972_v47 = vld [vmem:[%s9255_s6 + $0x28] sm:$0xff] }
 0xe78   :  { %v3307_v52 = vpop.permute.xlu0 %3306  ;;  %3255 = vadd.xlane.f32.xlu1 %v3254_v44 }
 0xe79   :  { %7373 = vpow2.f32 %v3252_v51  ;;  %7019 = vmatprep.subr.mxu1 %v3307_v52 }
 0xe7a   :  { %v8550_v45 = vpop.eup %7365  ;;  %7020 = vmatpush3.msra.mxu1 %v3307_v52 }
 0xe7b   :  { %7021 = vmatprep.subr.mxu1 %v3305_v53  ;;  %v3260_v43 = vsel %vm440_vm3, %v8550_v45, 0.0 }
 0xe7c   :  { %7022 = vmatpush3.msra.mxu1 %v3305_v53  ;;  %3261 = vadd.xlane.f32.xlu1 %v3260_v43  ;;  %v3301_v2 = vpop.permute.xlu0 %3300 }
 0xe7e   :  { %v8554_v54 = vpop.eup %7367 }
 0xe7f   :  { %v8556_v55 = vpop.eup %7369  ;;  %v3263_v26 = vsel %vm440_vm3, %v8554_v54, 0.0 }
 0xe80   :  { %3264 = vadd.xlane.f32.xlu0 %v3263_v26  ;;  %v3266_v56 = vsel %vm440_vm3, %v8556_v55, 0.0 }
 0xe81   :  { %3267 = vadd.xlane.f32.xlu1 %v3266_v56 }
 0xe82   :  { %v8562_v21 = vpop.eup %7371 }
 0xe83   :  { %v3269_v12 = vsel %vm440_vm3, %v8562_v21, 0.0 }
 0xe84   :  { %3270 = vadd.xlane.f32.xlu0 %v3269_v12 }
 0xe86   :  { %v8566_v11 = vpop.eup %7373 }
 0xe87   :  { %v3275_v62 = vsel %vm440_vm3, %v8566_v11, 0.0 }
 0xe88   :  { %3276 = vadd.xlane.f32.xlu0 %v3275_v62 }
 0xe9e   :  { %3296 = vrot.lane.b32.xlu0 %v8421_v7, %s7413_s27 }
 0xea5   :  { %v3226_v63 = vpop.xlane.xlu1 %3225 }
 0xea6   :  { %v3236_v29 = vsub.f32 %v8537_v18, %v3226_v63 }
 0xea8   :  { %v3250_v0 = vmul.f32 1.442695, %v3236_v29 }
 0xea9   :  { %v3303_v1 = vpop.permute.xlu1 %3302 }
 0xeaa   :  { %7375 = vpow2.f32 %v3250_v0  ;;  %7023 = vmatprep.subr.mxu1 %v3303_v1 }
 0xeab   :  { %7024 = vmatpush3.msra.mxu1 %v3303_v1 }
 0xeac   :  { %7025 = vmatprep.subr.mxu1 %v3301_v2 }
 0xead   :  { %7026 = vmatpush3.msra.mxu1 %v3301_v2  ;;  %v3299_v17 = vpop.permute.xlu1 %3298 }
 0xeae   :  { %7027 = vmatprep.subr.mxu1 %v3299_v17 }
 0xeaf   :  { %7028 = vmatpush3.msra.mxu1 %v3299_v17  ;;  %v5976_v17 = vld [vmem:[%s9256_s7 + $0x1] ss:$0 sm:$0xff] }
 0xeb7   :  { %v7376_v36 = vpop.eup %7375 }
 0xeb8   :  { %v3272_v48 = vsel %vm440_vm3, %v7376_v36, 0.0 }
 0xeb9   :  { %3273 = vadd.xlane.f32.xlu1 %v3272_v48 }
 0xeca   :  { %3294 = vrot.lane.b32.xlu1 %v8423_v8, %s7413_s27 }
 0xeff   :  { %v3259_v4 = vpop.xlane.xlu0 %3258 }
 0xf01   :  { %v3256_v7 = vpop.xlane.xlu1 %3255 }
 0xf02   :  { %7377 = vrcp.f32 %v3256_v7 }
 0xf03   :  { %7379 = vrcp.f32 %v3259_v4 }
 0xf05   :  { %v3262_v34 = vpop.xlane.xlu1 %3261 }
 0xf06   :  { %7381 = vrcp.f32 %v3262_v34 }
 0xf09   :  { %v3265_v49 = vpop.xlane.xlu0 %3264 }
 0xf0a   :  { %v3268_v19 = vpop.xlane.xlu1 %3267  ;;  %7383 = vrcp.f32 %v3265_v49 }
 0xf0b   :  { %7385 = vrcp.f32 %v3268_v19 }
 0xf0d   :  { %v3271_v16 = vpop.xlane.xlu0 %3270 }
 0xf0e   :  { %7387 = vrcp.f32 %v3271_v16 }
 0xf0f   :  { %v7378_v18 = vpop.eup %7377 }
 0xf10   :  { %v3279_v9 = vmul.f32 %v7378_v18, %v7364_v50  ;;  %v7380_v22 = vpop.eup %7379 }
 0xf11   :  { %v3277_v10 = vpop.xlane.xlu0 %3276  ;;  %v3281_v27 = vmul.f32 %v7380_v22, %v8545_v61  ;;  %v5974_v61 = vld [vmem:[%s9255_s6 + $0x38] sm:$0xff] }
 0xf12   :  { %7033 = vmatprep.mubr.msk.f32.mxu1 %vm440_vm3, %v3279_v9  ;;  %7389 = vrcp.f32 %v3277_v10 }
 0xf13   :  { %v7382_v24 = vpop.eup %7381 }
 0xf14   :  { %v3283_v32 = vmul.f32 %v7382_v24, %v8550_v45 }
 0xf15   :  { %v3297_v57 = vpop.permute.xlu0 %3296 }
 0xf16   :  { %7029 = vmatprep.subr.mxu1 %v3297_v57 }
 0xf17   :  { %7030 = vmatpush3.msra.mxu1 %v3297_v57  ;;  %v7384_v30 = vpop.eup %7383 }
 0xf18   :  { %v7386_v33 = vpop.eup %7385  ;;  %v3285_v35 = vmul.f32 %v7384_v30, %v8554_v54  ;;  %v6008_v30 = vld [vmem:[%s9257_s10 + $0x1c8] sm:$0xff] }
 0xf19   :  { %v3287_v13 = vmul.f32 %v7386_v33, %v8556_v55 }
 0xf1b   :  { %v7388_v37 = vpop.eup %7387 }
 0xf1c   :  { %v3289_v40 = vmul.f32 %v7388_v37, %v8562_v21 }
 0xf1f   :  { %v7390_v38 = vpop.eup %7389 }
 0xf20   :  { %v3293_v41 = vmul.f32 %v7390_v38, %v8566_v11 }
 0xf42   :  { %v3274_v8 = vpop.xlane.xlu1 %3273 }
 0xf43   :  { %7391 = vrcp.f32 %v3274_v8 }
 0xf46   :  { %v3295_v25 = vpop.permute.xlu1 %3294 }
 0xf47   :  { %7031 = vmatprep.subr.mxu1 %v3295_v25 }
 0xf48   :  { %7032 = vmatpush3.msra.mxu1 %v3295_v25 }
 0xf49   :  { %7034 = vmatmul.mubr.msk.f32.vlgmr.msra.gmra.mxu1 %vm440_vm3, %v3281_v27  ;;  %7045 = vmatprep.subr.mxu1 %v5974_v61 }
 0xf4a   :  { %7036 = vmatprep.mubr.msk.f32.mxu1 %vm440_vm3, %v3283_v32  ;;  %7046 = vmatpush3.msra.mxu1 %v5974_v61  ;;  %v5999_v32 = vld [vmem:[%s9257_s10 + $0x180] sm:$0xff] }
 0xf4b   :  { %7047 = vmatprep.subr.mxu1 %v5973_v46  ;;  %v5991_v61 = vld [vmem:[%s9257_s10 + $0x140] sm:$0xff] }
 0xf4c   :  { %7048 = vmatpush3.msra.mxu1 %v5973_v46 }
 0xf4d   :  { %7037 = vmatmul.mubr.msk.f32.gmra.mxu1 %vm440_vm3, %v3285_v35  ;;  %7049 = vmatprep.subr.mxu1 %v5972_v47  ;;  %v6007_v35 = vld [vmem:[%s9257_s10 + $0x1c0] sm:$0xff] }
 0xf4e   :  { %7039 = vmatprep.mubr.msk.f32.mxu1 %vm440_vm3, %v3287_v13  ;;  %7050 = vmatpush3.msra.mxu1 %v5972_v47  ;;  %v6033_v13 = vcombine.low %v5999_v32, %v6007_v35  ;;  %v6034_v38 = vcombine.high %v5999_v32, %v6007_v35  ;;  %v5988_v32 = vld [vmem:[%s9257_s10 + $0x128] sm:$0xff] }
 0xf4f   :  { %7051 = vmatprep.subr.mxu1 %v5971_v42 }
 0xf50   :  { %v7392_v14 = vpop.eup %7391  ;;  %7052 = vmatpush3.msra.mxu1 %v5971_v42 }
 0xf51   :  { %7040 = vmatmul.mubr.msk.f32.gmra.mxu1 %vm440_vm3, %v3289_v40  ;;  %v3291_v39 = vmul.f32 %v7392_v14, %v7376_v36  ;;  %3913 = vmatprep.subr.bf16.mxu1 %v6034_v38  ;;  %v5984_v40 = vld [vmem:[%s9257_s10 + $0x108] sm:$0xff] }
 0xf52   :  { %v5992_v14 = vld [vmem:[%s9257_s10 + $0x148] sm:$0xff] }
 0xf53   :  { %7042 = vmatprep.mubr.msk.f32.mxu1 %vm440_vm3, %v3291_v39  ;;  %v5983_v39 = vld [vmem:[%s9257_s10 + $0x100] sm:$0xff]  ;;  %v6019_v46 = vcombine.low %v5984_v40, %v5992_v14 }
 0xf54   :  { %v6017_v47 = vcombine.low %v5983_v39, %v5991_v61  ;;  %v6018_v42 = vcombine.high %v5983_v39, %v5991_v61  ;;  %v6006_v39 = vld [vmem:[%s9257_s10 + $0x1b8] sm:$0xff] }
 0xf55   :  { %7043 = vmatmul.mubr.msk.f32.gmra.mxu1 %vm440_vm3, %v3293_v41  ;;  %v6020_v41 = vcombine.high %v5984_v40, %v5992_v14  ;;  %v6005_v40 = vld [vmem:[%s9257_s10 + $0x1b0] sm:$0xff] }
 0xf56   :  { %v6013_v14 = vld [vmem:[%s9257_s10 + $0x1f0] sm:$0xff] }
0x1009   :  { %v7035_v50 = vpop.f32.mrf.mxu1 }
0x100b   :  { %v3408_v51 = vpop.f32.mrf.mxu1 }
0x100d   :  { %v7038_v44 = vpop.f32.mrf.mxu1 }
0x100e   :  { %3451 = vrot.lane.b32.xlu1 %v7038_v44, %s9283_s0  ;;  %v6002_v44 = vld [vmem:[%s9257_s10 + $0x198] sm:$0xff] }
0x100f   :  { %v3418_v52 = vpop.f32.mrf.mxu1 }
0x1010   :  { %3449 = vrot.lane.b32.xlu0 %v3418_v52, %s9283_s0 }
0x1011   :  { %v7041_v45 = vpop.f32.mrf.mxu1 }
0x1012   :  { %3459 = vrot.lane.b32.xlu1 %v7041_v45, %s9284_s20 }
0x1013   :  { %v3428_v53 = vpop.f32.mrf.mxu1 }
0x1014   :  { %3457 = vrot.lane.b32.xlu0 %v3428_v53, %s9284_s20  ;;  %v6010_v53 = vld [vmem:[%s9257_s10 + $0x1d8] sm:$0xff] }
0x1015   :  { %v7044_v43 = vpop.f32.mrf.mxu1 }
0x1016   :  { %3467 = vrot.lane.b32.xlu1 %v7044_v43, %s9285_s24  ;;  %v6039_v43 = vcombine.low %v6002_v44, %v6010_v53 }
0x1017   :  { %v3438_v54 = vpop.f32.mrf.mxu1 }
0x1018   :  { %3465 = vrot.lane.b32.xlu0 %v3438_v54, %s9285_s24  ;;  %v6040_v54 = vcombine.high %v6002_v44, %v6010_v53  ;;  %v5990_v44 = vld [vmem:[%s9257_s10 + $0x138] sm:$0xff] }
0x1080   :  { %v3452_v55 = vpop.permute.xlu1 %3451 }
0x1081   :  { %v3472_v62 = vsel %vm286_vm2, %v7035_v50, %v3452_v55  ;;  %v6001_v50 = vld [vmem:[%s9257_s10 + $0x190] sm:$0xff] }
0x1082   :  { %v3450_v26 = vpop.permute.xlu0 %3449 }
0x1083   :  { %v3471_v12 = vsel %vm286_vm2, %v3408_v51, %v3450_v26  ;;  %v6009_v51 = vld [vmem:[%s9257_s10 + $0x1d0] sm:$0xff] }
0x1084   :  { %v3460_v56 = vpop.permute.xlu1 %3459  ;;  %v6037_v52 = vcombine.low %v6001_v50, %v6009_v51  ;;  %v6038_v45 = vcombine.high %v6001_v50, %v6009_v51  ;;  %v5989_v50 = vld [vmem:[%s9257_s10 + $0x130] sm:$0xff] }
0x1085   :  { %v3474_v0 = vsel %vm81_vm0, %v3472_v62, %v3460_v56  ;;  %v5997_v51 = vld [vmem:[%s9257_s10 + $0x170] sm:$0xff] }
0x1086   :  { %v3458_v21 = vpop.permute.xlu0 %3457 }
0x1087   :  { %v3473_v63 = vsel %vm81_vm0, %v3471_v12, %v3458_v21 }
0x1088   :  { %v3468_v11 = vpop.permute.xlu1 %3467 }
0x1089   :  { %v3476_v2 = vsel %vm710_vm4, %v3474_v0, %v3468_v11 }
0x108a   :  { %v3466_v29 = vpop.permute.xlu0 %3465 }
0x108b   :  { %v3475_v1 = vsel %vm710_vm4, %v3473_v63, %v3466_v29  ;;  %v5981_v29 = vld [vmem:[%s9259_s8 + $0x1] ss:$0 sm:$0xff] }
0x108c   :  { %7053 = vmatprep.mubr.msk.f32.mxu1 %vm174_vm1, %v3475_v1 }
0x108d   :  { %7054 = vmatmul.mubr.msk.f32.vlgmr.msra.gmra.mxu1 %vm174_vm1, %v3476_v2 }
0x108e   :  { %3933 = vmatprep.mubr.bf16.mxu1 %v7417_v20  ;;  %3914 = vmatpush1.bf16.msra.mxu1 %v6033_v13 }
0x108f   :  { %3915 = vmatprep.subr.bf16.mxu1 %v6018_v42 }
0x1092   :  { %3916 = vmatpush1.bf16.msra.mxu1 %v6017_v47  ;;  %v6046_v47 = vcombine.high %v6005_v40, %v6013_v14 }
0x1093   :  { %3999 = vmatprep.subr.bf16.mxu1 %v6038_v45  ;;  %v6045_v45 = vcombine.low %v6005_v40, %v6013_v14 }
0x114d   :  { %v7055_v36 = vpop.f32.mrf.mxu1 }
0x114e   :  { %v3568_v48 = vadd.f32 %v7055_v36, %v5976_v17 }
0x114f   :  { %v3562_v7 = vpop.f32.mrf.mxu1 }
0x1150   :  { %v3563_v4 = vadd.f32 %v5976_v17, %v3562_v7  ;;  %v3572_v49 = vadd.f32 %v3568_v48, %v8414_v31  ;;  %v5982_v17 = vld [vmem:[%s9260_s9 + $0x1] ss:$0 sm:$0xff]  ;;  %v5985_v48 = vld [vmem:[%s9257_s10 + $0x110] sm:$0xff] }
0x1151   :  { %v5993_v7 = vld [vmem:[%s9257_s10 + $0x150] sm:$0xff] }
0x1152   :  { %v3580_v16 = vsel %vm174_vm1, %v3572_v49, 0.0  ;;  %v3571_v18 = vadd.f32 %v3563_v4, %v8410_v3  ;;  %v6000_v3 = vld [vmem:[%s9257_s10 + $0x188] sm:$0xff]  ;;  %v5986_v4 = vld [vmem:[%s9257_s10 + $0x118] sm:$0xff] }
0x1153   :  { %3581 = vadd.xlane.f32.xlu1 %v3580_v16  ;;  %v6036_v33 = vcombine.high %v6000_v3, %v6008_v30  ;;  %v6035_v37 = vcombine.low %v6000_v3, %v6008_v30  ;;  %v5987_v3 = vld [vmem:[%s9257_s10 + $0x120] sm:$0xff] }
0x1154   :  { %v3577_v9 = vsel %vm174_vm1, %v3571_v18, 0.0  ;;  %v5995_v30 = vld [vmem:[%s9257_s10 + $0x160] sm:$0xff] }
0x1155   :  { %3578 = vadd.xlane.f32.xlu0 %v3577_v9  ;;  %3956 = vmatprep.subr.bf16.mxu0 %v6036_v33  ;;  %v5996_v33 = vld [vmem:[%s9257_s10 + $0x168] sm:$0xff]  ;;  %v6026_v13 = vcombine.high %v5987_v3, %v5995_v30  ;;  %v6025_v61 = vcombine.low %v5987_v3, %v5995_v30  ;;  %v7221_v3 = vld [vmem:[%s9258_s12 + $0x440] sm:$0xff]  }
0x1156   :  { %3957 = vmatpush1.bf16.msra.mxu0 %v6035_v37  ;;  %v6028_v38 = vcombine.high %v5988_v32, %v5996_v33  ;;  %v7222_v30 = vld [vmem:[%s9258_s12 + $0x4c0] sm:$0xff]  }
0x1157   :  { %3958 = vmatprep.subr.bf16.mxu0 %v6020_v41  ;;  %v6014_v41 = vld [vmem:[%s9257_s10 + $0x1f8] sm:$0xff] }
0x1158   :  { %v6048_v42 = vcombine.high %v6006_v39, %v6014_v41  ;;  %v6047_v53 = vcombine.low %v6006_v39, %v6014_v41 }
0x115a   :  { %3959 = vmatpush1.bf16.msra.mxu0 %v6019_v46  ;;  %v6027_v46 = vcombine.low %v5988_v32, %v5996_v33  ;;  %v7223_v32 = vld [vmem:[%s9258_s12 + $0x400] sm:$0xff]  }
0x115b   :  { %4042 = vmatprep.subr.bf16.mxu0 %v6040_v54  ;;  %v7224_v33 = vld [vmem:[%s9258_s12 + $0x480] sm:$0xff]  }
0x11dc   :  { %v3582_v10 = vpop.xlane.xlu1 %3581 }
0x11dd   :  { %v3584_v57 = vmul.f32 0.03125, %v3582_v10  ;;  %v6022_v10 = vcombine.high %v5985_v48, %v5993_v7 }
0x11de   :  { %v3579_v34 = vpop.xlane.xlu0 %3578 }
0x11df   :  { %v3583_v19 = vmul.f32 0.03125, %v3579_v34  ;;  %v3586_v8 = vsub.f32 %v3572_v49, %v3584_v57  ;;  %v5994_v49 = vld [vmem:[%s9257_s10 + $0x158] sm:$0xff]  ;;  %v6003_v34 = vld [vmem:[%s9257_s10 + $0x1a0] sm:$0xff] }
0x11e0   :  { %v6024_v57 = vcombine.high %v5986_v4, %v5994_v49 }
0x11e1   :  { %v3585_v22 = vsub.f32 %v3571_v18, %v3583_v19  ;;  %v3588_v27 = vmul.f32 %v3586_v8, %v3586_v8  ;;  %v6011_v19 = vld [vmem:[%s9257_s10 + $0x1e0] sm:$0xff] }
0x11e2   :  { %v6041_v35 = vcombine.low %v6003_v34, %v6011_v19 }
0x11e3   :  { %v3587_v24 = vmul.f32 %v3585_v22, %v3585_v22  ;;  %v3592_v31 = vsel %vm174_vm1, %v3588_v27, 0.0  ;;  %v6042_v27 = vcombine.high %v6003_v34, %v6011_v19  ;;  %v7213_v34 = vld [vmem:[%s9258_s12 + $0x450] sm:$0xff]  }
0x11e4   :  { %v7214_v19 = vld [vmem:[%s9258_s12 + $0x4d0] sm:$0xff]  }
0x11e5   :  { %v3589_v25 = vsel %vm174_vm1, %v3587_v24, 0.0  ;;  %v6021_v24 = vcombine.low %v5985_v48, %v5993_v7  ;;  %v7206_v48 = vld [vmem:[%s9258_s12 + $0x4e0] sm:$0xff]  }
0x11e6   :  { %3590 = vadd.xlane.f32.xlu0 %v3589_v25  ;;  %v6023_v25 = vcombine.low %v5986_v4, %v5994_v49  ;;  %v7207_v7 = vld [vmem:[%s9258_s12 + $0x420] sm:$0xff]   ;;  %v7209_v49 = vld [vmem:[%s9258_s12 + $0x458] sm:$0xff]  }
0x11e7   :  { %v7208_v4 = vld [vmem:[%s9258_s12 + $0x4a0] sm:$0xff]  }
0x11ea   :  { %3593 = vadd.xlane.f32.xlu0 %v3592_v31 }
0x126f   :  { %v3591_v55 = vpop.xlane.xlu0 %3590 }
0x1270   :  { %v3595_v26 = vmul.f32 0.03125, %v3591_v55  ;;  %v6029_v55 = vcombine.low %v5989_v50, %v5997_v51 }
0x1272   :  { %v3597_v56 = vadd.f32 1e-05, %v3595_v26 }
0x1273   :  { %v3594_v21 = vpop.xlane.xlu0 %3593 }
0x1274   :  { %7393 = vrsqrt.f32 %v3597_v56  ;;  %v3596_v12 = vmul.f32 0.03125, %v3594_v21  ;;  %v7193_v56 = vld [vmem:[%s9258_s12 + $0x478] sm:$0xff]  }
0x1275   :  { %v7194_v21 = vld [vmem:[%s9258_s12 + $0x4f8] sm:$0xff]  }
0x1276   :  { %v3598_v11 = vadd.f32 1e-05, %v3596_v12  ;;  %v7195_v12 = vld [vmem:[%s9258_s12 + $0x438] sm:$0xff]  }
0x1278   :  { %7395 = vrsqrt.f32 %v3598_v11  ;;  %v7196_v11 = vld [vmem:[%s9258_s12 + $0x4b8] sm:$0xff]  }
0x1281   :  { %v7394_v62 = vpop.eup %7393 }
0x1282   :  { %v3601_v63 = vmul.f32 %v7394_v62, %v3585_v22  ;;  %v6012_v22 = vld [vmem:[%s9257_s10 + $0x1e8] sm:$0xff]  ;;  %v7197_v62 = vld [vmem:[%s9258_s12 + $0x470] sm:$0xff]  }
0x1284   :  { %v3609_v1 = vmul.f32 %v5981_v29, %v3601_v63  ;;  %v7199_v63 = vld [vmem:[%s9258_s12 + $0x430] sm:$0xff]  }
0x1285   :  { %v7396_v0 = vpop.eup %7395 }
0x1286   :  { %v3602_v2 = vmul.f32 %v7396_v0, %v3586_v8  ;;  %v8680_v16 = vadd.f32 %v5982_v17, %v3609_v1  ;;  %v6004_v8 = vld [vmem:[%s9257_s10 + $0x1a8] sm:$0xff] }
0x1287   :  { %v6044_v31 = vcombine.high %v6004_v8, %v6012_v22  ;;  %v6043_v37 = vcombine.low %v6004_v8, %v6012_v22  ;;  %v7201_v0 = vld [vmem:[%s9258_s12 + $0x468] sm:$0xff]   ;;  %v7215_v8 = vld [vmem:[%s9258_s12 + $0x410] sm:$0xff]  }
0x1288   :  { %v3610_v36 = vmul.f32 %v5981_v29, %v3602_v2  ;;  %v7200_v29 = vld [vmem:[%s9258_s12 + $0x4b0] sm:$0xff]   ;;  %v7202_v1 = vld [vmem:[%s9258_s12 + $0x4e8] sm:$0xff]  }
0x1289   :  { %v7203_v2 = vld [vmem:[%s9258_s12 + $0x428] sm:$0xff]   ;;  %v7216_v22 = vld [vmem:[%s9258_s12 + $0x490] sm:$0xff]  }
0x128a   :  { %v8682_v18 = vadd.f32 %v5982_v17, %v3610_v36  ;;  %v7204_v17 = vld [vmem:[%s9258_s12 + $0x4a8] sm:$0xff]   ;;  %v7205_v36 = vld [vmem:[%s9258_s12 + $0x460] sm:$0xff]  }
0x128c   :  { %v8686_v9 = vpack.c.bf16 %v8682_v18, %v8680_v16 }
0x128e   :  { %6049 = vmatmul.mubr.msk.bf16.vlgmr.msra.gmra.mxu1 %vm174_vm1, %v8686_v9  ;;  %6050 = vmatmul.mubr.msk.bf16.vlgmr.msra.gmra.mxu0 %vm174_vm1, %v8686_v9 }
0x128f   :  { %4000 = vmatpush1.bf16.msra.mxu1 %v6037_v52  ;;  %4043 = vmatpush1.bf16.msra.mxu0 %v6039_v43  ;;  %v5998_v52 = vld [vmem:[%s9257_s10 + $0x178] sm:$0xff]  ;;  %v6030_v43 = vcombine.high %v5989_v50, %v5997_v51 }
0x1290   :  { %4001 = vmatprep.subr.bf16.mxu1 %v6022_v10  ;;  %4044 = vmatprep.subr.bf16.mxu0 %v6024_v57  ;;  %v6032_v54 = vcombine.high %v5990_v44, %v5998_v52  ;;  %v6031_v26 = vcombine.low %v5990_v44, %v5998_v52  ;;  %v7211_v10 = vld [vmem:[%s9258_s12 + $0x418] sm:$0xff]  }
0x1291   :  { %4019 = vmatprep.mubr.bf16.mxu1 %v7417_v20  ;;  %4062 = vmatprep.mubr.bf16.mxu0 %v7417_v20  ;;  %v7212_v57 = vld [vmem:[%s9258_s12 + $0x498] sm:$0xff]  }
0x1293   :  { %4002 = vmatpush1.bf16.msra.mxu1 %v6021_v24  ;;  %4045 = vmatpush1.bf16.msra.mxu0 %v6023_v25  ;;  %v7217_v24 = vld [vmem:[%s9258_s12 + $0x448] sm:$0xff]  }
0x1294   :  { %4085 = vmatprep.subr.bf16.mxu1 %v6042_v27  ;;  %4128 = vmatprep.subr.bf16.mxu0 %v6044_v31  ;;  %v7218_v25 = vld [vmem:[%s9258_s12 + $0x4c8] sm:$0xff]  }
0x1295   :  { %v7219_v27 = vld [vmem:[%s9258_s12 + $0x408] sm:$0xff]  }
0x1296   :  { %6051 = vmatmul.mubr.msk.bf16.vlgmr.msra.gmra.mxu1 %vm174_vm1, %v8686_v9  ;;  %6052 = vmatmul.mubr.msk.bf16.vlgmr.msra.gmra.mxu0 %vm174_vm1, %v8686_v9  ;;  %v7220_v31 = vld [vmem:[%s9258_s12 + $0x488] sm:$0xff]  }
0x1297   :  { %4086 = vmatpush1.bf16.msra.mxu1 %v6041_v35  ;;  %4129 = vmatpush1.bf16.msra.mxu0 %v6043_v37  ;;  %v7225_v35 = vld [vmem:[%s9258_s12 + $0x578] sm:$0xff]  }
0x1298   :  { %4087 = vmatprep.subr.bf16.mxu1 %v6026_v13  ;;  %4130 = vmatprep.subr.bf16.mxu0 %v6028_v38  ;;  %v7226_v37 = vld [vmem:[%s9258_s12 + $0x5f8] sm:$0xff]   ;;  %v8863_v13 = vld [vmem:[%s9261_s11 + $0x10] sm:$0xff] }
0x1299   :  { %4105 = vmatprep.mubr.bf16.mxu1 %v7417_v20  ;;  %4148 = vmatprep.mubr.bf16.mxu0 %v7417_v20  ;;  %v3665_v14 = vrot.slane %v8863_v13, %v8000_v15  ;;  %v3673_v39 = vrot.slane %v8863_v13, %v8003_v58  ;;  %v3661_v41 = vrot.slane %v8863_v13, %v8006_v59 }
0x129b   :  { %4088 = vmatpush1.bf16.msra.mxu1 %v6025_v61  ;;  %4131 = vmatpush1.bf16.msra.mxu0 %v6027_v46  ;;  %v3669_v61 = vrot.slane %v8863_v13, %v8009_v60 }
0x129c   :  { %4171 = vmatprep.subr.bf16.mxu1 %v6046_v47  ;;  %4214 = vmatprep.subr.bf16.mxu0 %v6048_v42 }
0x129e   :  { %6053 = vmatmul.mubr.msk.bf16.vlgmr.msra.gmra.mxu1 %vm174_vm1, %v8686_v9  ;;  %6054 = vmatmul.mubr.msk.bf16.vlgmr.msra.gmra.mxu0 %vm174_vm1, %v8686_v9 }
0x129f   :  { %4172 = vmatpush1.bf16.msra.mxu1 %v6045_v45  ;;  %4215 = vmatpush1.bf16.msra.mxu0 %v6047_v53 }
0x12a0   :  { %4173 = vmatprep.subr.bf16.mxu1 %v6030_v43  ;;  %4216 = vmatprep.subr.bf16.mxu0 %v6032_v54 }
0x12a1   :  { %4191 = vmatprep.mubr.bf16.mxu1 %v7417_v20  ;;  %4234 = vmatprep.mubr.bf16.mxu0 %v7417_v20  ;;  %v7198_v20 = vld [vmem:[%s9258_s12 + $0x4f0] sm:$0xff]  }
0x12a3   :  { %4174 = vmatpush1.bf16.msra.mxu1 %v6029_v55  ;;  %4217 = vmatpush1.bf16.msra.mxu0 %v6031_v26 }
0x12a4   :  { %6717 = vmatprep.subr.bf16.mxu1 %v7193_v56  ;;  %6739 = vmatprep.subr.bf16.mxu0 %v7194_v21 }
0x12a6   :  { %6055 = vmatmul.mubr.msk.bf16.vlgmr.msra.gmra.mxu1 %vm174_vm1, %v8686_v9  ;;  %6056 = vmatmul.mubr.msk.bf16.vlgmr.msra.gmra.mxu0 %vm174_vm1, %v8686_v9  ;;  %v7210_v9 = vld [vmem:[%s9258_s12 + $0x4d8] sm:$0xff]  }
0x12a7   :  { %6718 = vmatpush3.bf16.msra.mxu1 %v7195_v12  ;;  %6740 = vmatpush3.bf16.msra.mxu0 %v7196_v11 }
0x12a8   :  { %6719 = vmatprep.subr.bf16.mxu1 %v7197_v62  ;;  %6741 = vmatprep.subr.bf16.mxu0 %v7198_v20  ;;  %v3681_v20 = vrot.slane %v8863_v13, %v8025_v5 }
0x12ab   :  { %6720 = vmatpush3.bf16.msra.mxu1 %v7199_v63  ;;  %6742 = vmatpush3.bf16.msra.mxu0 %v7200_v29  ;;  %v3689_v63 = vrot.slane %v8863_v13, %v8028_v6 }
0x12ac   :  { %6721 = vmatprep.subr.bf16.mxu1 %v7201_v0  ;;  %6743 = vmatprep.subr.bf16.mxu0 %v7202_v1 }
0x12af   :  { %6722 = vmatpush3.bf16.msra.mxu1 %v7203_v2  ;;  %6744 = vmatpush3.bf16.msra.mxu0 %v7204_v17 }
0x12b0   :  { %6723 = vmatprep.subr.bf16.mxu1 %v7205_v36  ;;  %6745 = vmatprep.subr.bf16.mxu0 %v7206_v48 }
0x12b3   :  { %6724 = vmatpush3.bf16.msra.mxu1 %v7207_v7  ;;  %6746 = vmatpush3.bf16.msra.mxu0 %v7208_v4 }
0x12b4   :  { %6725 = vmatprep.subr.bf16.mxu1 %v7209_v49  ;;  %6747 = vmatprep.subr.bf16.mxu0 %v7210_v9  ;;  %v7227_v9 = vld [vmem:[%s9258_s12 + $0x538] sm:$0xff]  }
0x12b7   :  { %6726 = vmatpush3.bf16.msra.mxu1 %v7211_v10  ;;  %6748 = vmatpush3.bf16.msra.mxu0 %v7212_v57  ;;  %v7228_v10 = vld [vmem:[%s9258_s12 + $0x5b8] sm:$0xff]  }
0x12b8   :  { %6727 = vmatprep.subr.bf16.mxu1 %v7213_v34  ;;  %6749 = vmatprep.subr.bf16.mxu0 %v7214_v19 }
0x12bb   :  { %6728 = vmatpush3.bf16.msra.mxu1 %v7215_v8  ;;  %6750 = vmatpush3.bf16.msra.mxu0 %v7216_v22  ;;  %v7229_v22 = vld [vmem:[%s9258_s12 + $0x570] sm:$0xff]  }
0x12bc   :  { %6729 = vmatprep.subr.bf16.mxu1 %v7217_v24  ;;  %6751 = vmatprep.subr.bf16.mxu0 %v7218_v25  ;;  %v7230_v24 = vld [vmem:[%s9258_s12 + $0x5f0] sm:$0xff]  }
0x12bf   :  { %6730 = vmatpush3.bf16.msra.mxu1 %v7219_v27  ;;  %6752 = vmatpush3.bf16.msra.mxu0 %v7220_v31 }
0x12c0   :  { %6731 = vmatprep.subr.bf16.mxu1 %v7221_v3  ;;  %6753 = vmatprep.subr.bf16.mxu0 %v7222_v30 }
0x12c3   :  { %6732 = vmatpush3.bf16.msra.mxu1 %v7223_v32  ;;  %6754 = vmatpush3.bf16.msra.mxu0 %v7224_v33  ;;  %v7231_v33 = vld [vmem:[%s9258_s12 + $0x530] sm:$0xff]  }
0x12c4   :  { %6761 = vmatprep.subr.bf16.mxu1 %v7225_v35  ;;  %6783 = vmatprep.subr.bf16.mxu0 %v7226_v37  ;;  %v7232_v35 = vld [vmem:[%s9258_s12 + $0x5b0] sm:$0xff]   ;;  %v7233_v37 = vld [vmem:[%s9258_s12 + $0x568] sm:$0xff]  }
0x134e   :  { %v3935_v38 = vpop.f32.mrf.mxu1  ;;  %v3978_v40 = vpop.f32.mrf.mxu0 }
0x134f   :  { %v3936_v53 = vadd.f32 %v3935_v38, %v3661_v41  ;;  %v3979_v43 = vadd.f32 %v3978_v40, %v3669_v61 }
0x1350   :  { %v3937_v46 = vpop.f32.mrf.mxu1  ;;  %v3980_v47 = vpop.f32.mrf.mxu0 }
0x1351   :  { %v3938_v51 = vadd.f32 %v3937_v46, %v3665_v14  ;;  %v3981_v44 = vadd.f32 %v3980_v47, %v3673_v39  ;;  %v4245_v17 = vmax.f32 %v3936_v53, 0.0  ;;  %v4247_v36 = vmax.f32 %v3979_v43, 0.0  ;;  %v7235_v47 = vld [vmem:[%s9258_s12 + $0x528] sm:$0xff]   ;;  %v7240_v53 = vld [vmem:[%s9258_s12 + $0x5a0] sm:$0xff]   ;;  %v7241_v43 = vld [vmem:[%s9258_s12 + $0x558] sm:$0xff]  }
0x1352   :  { %v3939_v42 = vpop.f32.mrf.mxu1  ;;  %v3982_v50 = vpop.f32.mrf.mxu0 }
0x1353   :  { %v3940_v52 = vadd.f32 %v3939_v42, %v3661_v41  ;;  %v3983_v45 = vadd.f32 %v3982_v50, %v3669_v61  ;;  %v4246_v29 = vmax.f32 %v3938_v51, 0.0  ;;  %v4248_v0 = vmax.f32 %v3981_v44, 0.0  ;;  %v7234_v41 = vld [vmem:[%s9258_s12 + $0x5e8] sm:$0xff]   ;;  %v7237_v50 = vld [vmem:[%s9258_s12 + $0x560] sm:$0xff]  }
0x1354   :  { %v3941_v54 = vpop.f32.mrf.mxu1  ;;  %v3984_v55 = vpop.f32.mrf.mxu0  ;;  %v7236_v42 = vld [vmem:[%s9258_s12 + $0x5a8] sm:$0xff]   ;;  %v7238_v51 = vld [vmem:[%s9258_s12 + $0x5e0] sm:$0xff]  }
0x1355   :  { %v3942_v26 = vadd.f32 %v3941_v54, %v3665_v14  ;;  %v3985_v56 = vadd.f32 %v3984_v55, %v3673_v39  ;;  %v4261_v21 = vmax.f32 %v3940_v52, 0.0  ;;  %v4263_v12 = vmax.f32 %v3983_v45, 0.0  ;;  %v7239_v52 = vld [vmem:[%s9258_s12 + $0x520] sm:$0xff]   ;;  %v7242_v54 = vld [vmem:[%s9258_s12 + $0x5d8] sm:$0xff]  }
0x1356   :  { %v8873_v11 = vpop.f32.mrf.mxu1  ;;  %v8875_v62 = vpop.f32.mrf.mxu0 }
0x1357   :  { %v4262_v1 = vmax.f32 %v3942_v26, 0.0  ;;  %v4264_v2 = vmax.f32 %v3985_v56, 0.0  ;;  %v4277_v57 = vpack.c.bf16 %v4261_v21, %v4245_v17  ;;  %v4279_v34 = vpack.c.bf16 %v4263_v12, %v4247_v36  ;;  %v7243_v26 = vld [vmem:[%s9258_s12 + $0x518] sm:$0xff]   ;;  %v7245_v12 = vld [vmem:[%s9258_s12 + $0x550] sm:$0xff]   ;;  %v7250_v17 = vld [vmem:[%s9258_s12 + $0x5c8] sm:$0xff]  }
0x1358   :  { %v4023_v48 = vpop.f32.mrf.mxu1  ;;  %v4066_v7 = vpop.f32.mrf.mxu0  ;;  %v7244_v21 = vld [vmem:[%s9258_s12 + $0x598] sm:$0xff]   ;;  %v3677_v36 = vrot.slane %v8863_v13, %v8107_v28 }
0x1359   :  { %v4278_v4 = vpack.c.bf16 %v4262_v1, %v4246_v29  ;;  %v4280_v49 = vpack.c.bf16 %v4264_v2, %v4248_v0  ;;  %v4024_v25 = vadd.f32 %v4023_v48, %v3681_v20  ;;  %v4067_v27 = vadd.f32 %v4066_v7, %v3689_v63  ;;  %v7247_v29 = vld [vmem:[%s9258_s12 + $0x510] sm:$0xff]   ;;  %v7249_v2 = vld [vmem:[%s9258_s12 + $0x548] sm:$0xff]   ;;  %v8972_v7 = vld [vmem:[%s9261_s11 + $0x18] sm:$0xff] }
0x135a   :  { %v8887_v19 = vpop.f32.mrf.mxu1  ;;  %v8889_v8 = vpop.f32.mrf.mxu0  ;;  %v7248_v1 = vld [vmem:[%s9258_s12 + $0x590] sm:$0xff]   ;;  %v3685_v48 = vrot.slane %v8863_v13, %v8110_v23  ;;  %v7252_v13 = vld [vmem:[%s9258_s12 + $0x588] sm:$0xff]  }
0x135b   :  { %5358 = vmatprep.mubr.bf16.mxu1 %v4278_v4  ;;  %5399 = vmatprep.mubr.bf16.mxu0 %v4280_v49  ;;  %v4250_v38 = vmax.f32 %v4024_v25, 0.0  ;;  %v4252_v40 = vmax.f32 %v4067_v27, 0.0  ;;  %v7251_v49 = vld [vmem:[%s9258_s12 + $0x508] sm:$0xff]  }
0x135c   :  { %v4027_v31 = vpop.f32.mrf.mxu1  ;;  %v4070_v3 = vpop.f32.mrf.mxu0  ;;  %5359 = vmatmul.mubr.bf16.vlgmr.msra.gmra.mxu1 %v4277_v57  ;;  %5400 = vmatmul.mubr.bf16.vlgmr.msra.gmra.mxu0 %v4279_v34  ;;  %v7253_v34 = vld [vmem:[%s9258_s12 + $0x540] sm:$0xff]   ;;  %v4065_v27 = vadd.f32 %v8875_v62, %v3685_v48 }
0x135d   :  { %v4028_v30 = vadd.f32 %v4027_v31, %v3681_v20  ;;  %v4071_v32 = vadd.f32 %v4070_v3, %v3689_v63  ;;  %6762 = vmatpush3.bf16.msra.mxu1 %v7227_v9  ;;  %6784 = vmatpush3.bf16.msra.mxu0 %v7228_v10  ;;  %v7246_v20 = vld [vmem:[%s9258_s12 + $0x5d0] sm:$0xff]   ;;  %v4026_v9 = vadd.f32 %v8887_v19, %v3677_v36  ;;  %v7255_v3 = vld [vmem:[%s9258_s12 + $0x500] sm:$0xff]  }
0x135e   :  { %6763 = vmatprep.subr.bf16.mxu1 %v7229_v22  ;;  %6785 = vmatprep.subr.bf16.mxu0 %v7230_v24  ;;  %v8921_v44 = vpop.f32.mrf.mxu1  ;;  %v8926_v45 = vpop.f32.mrf.mxu0  ;;  %v3697_v10 = vrot.slane %v8972_v7, %v8000_v15  ;;  %v4069_v22 = vadd.f32 %v8889_v8, %v3685_v48  ;;  %v3705_v24 = vrot.slane %v8972_v7, %v8003_v58  ;;  %v7254_v15 = vld [vmem:[%s9258_s12 + $0x5c0] sm:$0xff]  }
0x135f   :  { %v4266_v14 = vmax.f32 %v4028_v30, 0.0  ;;  %v4268_v39 = vmax.f32 %v4071_v32, 0.0  ;;  %v4022_v19 = vadd.f32 %v8873_v11, %v3677_v36  ;;  %v4265_v8 = vmax.f32 %v4026_v9, 0.0  ;;  %v7256_v58 = vld [vmem:[%s9258_s12 + $0x580] sm:$0xff]   ;;  %v7257_v11 = vld [vmem:[%s9258_s12 + $0x678] sm:$0xff]  }
0x1360   :  { %v4109_v55 = vpop.f32.mrf.mxu1  ;;  %v4152_v56 = vpop.f32.mrf.mxu0  ;;  %v4267_v32 = vmax.f32 %v4069_v22, 0.0  ;;  %v7274_v36 = vld [vmem:[%s9258_s12 + $0x6d8] sm:$0xff]  }
0x1361   :  { %v4282_v61 = vpack.c.bf16 %v4266_v14, %v4250_v38  ;;  %v4284_v46 = vpack.c.bf16 %v4268_v39, %v4252_v40  ;;  %6764 = vmatpush3.bf16.msra.mxu1 %v7231_v33  ;;  %6786 = vmatpush3.bf16.msra.mxu0 %v7232_v35  ;;  %v4110_v30 = vadd.f32 %v4109_v55, %v3697_v10  ;;  %v7258_v33 = vld [vmem:[%s9258_s12 + $0x6f8] sm:$0xff]   ;;  %v4249_v35 = vmax.f32 %v4022_v19, 0.0  ;;  %v7266_v55 = vld [vmem:[%s9258_s12 + $0x6e8] sm:$0xff]  }
0x1362   :  { %6765 = vmatprep.subr.bf16.mxu1 %v7233_v37  ;;  %6787 = vmatprep.subr.bf16.mxu0 %v7234_v41  ;;  %v8949_v63 = vpop.f32.mrf.mxu1  ;;  %v8954_v0 = vpop.f32.mrf.mxu0  ;;  %v4153_v62 = vadd.f32 %v4152_v56, %v3705_v24  ;;  %v4251_v38 = vmax.f32 %v4065_v27, 0.0  ;;  %v7259_v14 = vld [vmem:[%s9258_s12 + $0x638] sm:$0xff]   ;;  %v7268_v56 = vld [vmem:[%s9258_s12 + $0x6a8] sm:$0xff]   ;;  %v3701_v27 = vrot.slane %v8972_v7, %v8009_v60  ;;  %v7285_v60 = vld [vmem:[%s9258_s12 + $0x640] sm:$0xff]  }
0x1363   :  { %5440 = vmatprep.mubr.bf16.mxu1 %v4282_v61  ;;  %5481 = vmatprep.mubr.bf16.mxu0 %v4284_v46  ;;  %v4281_v39 = vpack.c.bf16 %v4265_v8, %v4249_v35  ;;  %v4254_v41 = vmax.f32 %v4110_v30, 0.0  ;;  %v7260_v61 = vld [vmem:[%s9258_s12 + $0x6b8] sm:$0xff]   ;;  %v7282_v19 = vld [vmem:[%s9258_s12 + $0x6c8] sm:$0xff]   ;;  %v3713_v30 = vrot.slane %v8972_v7, %v8025_v5  ;;  %v7286_v5 = vld [vmem:[%s9258_s12 + $0x6c0] sm:$0xff]  }
0x1364   :  { %v4113_v4 = vpop.f32.mrf.mxu1  ;;  %v4156_v57 = vpop.f32.mrf.mxu0  ;;  %v4283_v46 = vpack.c.bf16 %v4267_v32, %v4251_v38  ;;  %v7276_v9 = vld [vmem:[%s9258_s12 + $0x698] sm:$0xff]   ;;  %v3721_v32 = vrot.slane %v8972_v7, %v8028_v6  ;;  %v7288_v6 = vld [vmem:[%s9258_s12 + $0x680] sm:$0xff]  }
0x1365   :  { %6766 = vmatpush3.bf16.msra.mxu1 %v7235_v47  ;;  %6788 = vmatpush3.bf16.msra.mxu0 %v7236_v42  ;;  %v4114_v25 = vadd.f32 %v4113_v4, %v3697_v10  ;;  %v4157_v31 = vadd.f32 %v4156_v57, %v3705_v24  ;;  %v4256_v47 = vmax.f32 %v4153_v62, 0.0  ;;  %v7261_v42 = vld [vmem:[%s9258_s12 + $0x670] sm:$0xff]   ;;  %v7275_v4 = vld [vmem:[%s9258_s12 + $0x618] sm:$0xff]  }
0x1366   :  { %6767 = vmatprep.subr.bf16.mxu1 %v7237_v50  ;;  %6789 = vmatprep.subr.bf16.mxu0 %v7238_v51  ;;  %v7262_v51 = vld [vmem:[%s9258_s12 + $0x6f0] sm:$0xff]  }
0x1367   :  { %v4270_v37 = vmax.f32 %v4114_v25, 0.0  ;;  %v4272_v40 = vmax.f32 %v4157_v31, 0.0  ;;  %v7277_v10 = vld [vmem:[%s9258_s12 + $0x650] sm:$0xff]   ;;  %v3693_v25 = vrot.slane %v8972_v7, %v8006_v59  ;;  %v7284_v59 = vld [vmem:[%s9258_s12 + $0x688] sm:$0xff]  }
0x1368   :  { %v7278_v57 = vld [vmem:[%s9258_s12 + $0x6d0] sm:$0xff]  }
0x1369   :  { %6768 = vmatpush3.bf16.msra.mxu1 %v7239_v52  ;;  %6790 = vmatpush3.bf16.msra.mxu0 %v7240_v53  ;;  %v4286_v50 = vpack.c.bf16 %v4270_v37, %v4254_v41  ;;  %v4288_v52 = vpack.c.bf16 %v4272_v40, %v4256_v47  ;;  %v7263_v53 = vld [vmem:[%s9258_s12 + $0x630] sm:$0xff]   ;;  %v4112_v8 = vadd.f32 %v8949_v63, %v3693_v25  ;;  %v7287_v37 = vld [vmem:[%s9258_s12 + $0x600] sm:$0xff]   ;;  %v7291_v47 = vld [vmem:[%s9258_s12 + $0x738] sm:$0xff]  }
0x136a   :  { %6769 = vmatprep.subr.bf16.mxu1 %v7241_v43  ;;  %6791 = vmatprep.subr.bf16.mxu0 %v7242_v54  ;;  %v7264_v43 = vld [vmem:[%s9258_s12 + $0x6b0] sm:$0xff]   ;;  %v7265_v54 = vld [vmem:[%s9258_s12 + $0x668] sm:$0xff]   ;;  %v4108_v63 = vadd.f32 %v8921_v44, %v3693_v25  ;;  %v7289_v44 = vld [vmem:[%s9258_s12 + $0x778] sm:$0xff]  }
0x136b   :  { %v7280_v24 = vld [vmem:[%s9258_s12 + $0x690] sm:$0xff]  }
0x136c   :  { %v7312_v25 = vld [vmem:[%s9258_s12 + $0x790] sm:$0xff]  }
0x136d   :  { %6770 = vmatpush3.bf16.msra.mxu1 %v7243_v26  ;;  %6792 = vmatpush3.bf16.msra.mxu0 %v7244_v21  ;;  %v7267_v26 = vld [vmem:[%s9258_s12 + $0x628] sm:$0xff]   ;;  %v7269_v21 = vld [vmem:[%s9258_s12 + $0x660] sm:$0xff]  }
0x136e   :  { %6771 = vmatprep.subr.bf16.mxu1 %v7245_v12  ;;  %6793 = vmatprep.subr.bf16.mxu0 %v7246_v20  ;;  %v7270_v12 = vld [vmem:[%s9258_s12 + $0x6e0] sm:$0xff]   ;;  %v9042_v20 = vpop.f32.mrf.mxu1 }
0x1370   :  { %v4195_v48 = vpop.f32.mrf.mxu1 }
0x1371   :  { %6772 = vmatpush3.bf16.msra.mxu1 %v7247_v29  ;;  %6794 = vmatpush3.bf16.msra.mxu0 %v7248_v1  ;;  %v7271_v29 = vld [vmem:[%s9258_s12 + $0x620] sm:$0xff]   ;;  %v9047_v1 = vpop.f32.mrf.mxu0  ;;  %v4196_v38 = vadd.f32 %v4195_v48, %v3713_v30 }
0x1372   :  { %6773 = vmatprep.subr.bf16.mxu1 %v7249_v2  ;;  %6795 = vmatprep.subr.bf16.mxu0 %v7250_v17  ;;  %v7272_v2 = vld [vmem:[%s9258_s12 + $0x6a0] sm:$0xff]   ;;  %v7273_v17 = vld [vmem:[%s9258_s12 + $0x658] sm:$0xff]  }
0x1373   :  { %v7302_v48 = vld [vmem:[%s9258_s12 + $0x7e0] sm:$0xff]  }
0x1375   :  { %6774 = vmatpush3.bf16.msra.mxu1 %v7251_v49  ;;  %6796 = vmatpush3.bf16.msra.mxu0 %v7252_v13  ;;  %v4238_v49 = vpop.f32.mrf.mxu0  ;;  %v9070_v13 = vpop.f32.mrf.mxu1 }
0x1376   :  { %6775 = vmatprep.subr.bf16.mxu1 %v7253_v34  ;;  %6797 = vmatprep.subr.bf16.mxu0 %v7254_v15  ;;  %v7279_v34 = vld [vmem:[%s9258_s12 + $0x610] sm:$0xff]   ;;  %v7281_v15 = vld [vmem:[%s9258_s12 + $0x648] sm:$0xff]  }
0x1377   :  { %v9075_v22 = vpop.f32.mrf.mxu0  ;;  %v4199_v31 = vpop.f32.mrf.mxu1 }
0x1378   :  { %v4200_v62 = vadd.f32 %v4199_v31, %v3713_v30  ;;  %v7314_v31 = vld [vmem:[%s9258_s12 + $0x7c8] sm:$0xff]  }
0x1379   :  { %6776 = vmatpush3.bf16.msra.mxu1 %v7255_v3  ;;  %6798 = vmatpush3.bf16.msra.mxu0 %v7256_v58  ;;  %v7283_v3 = vld [vmem:[%s9258_s12 + $0x608] sm:$0xff]   ;;  %v4242_v58 = vpop.f32.mrf.mxu0 }
0x137a   :  { %6805 = vmatprep.subr.bf16.mxu1 %v7257_v11  ;;  %6827 = vmatprep.subr.bf16.mxu0 %v7258_v33  ;;  %v4155_v11 = vadd.f32 %v8954_v0, %v3701_v27  ;;  %v4151_v33 = vadd.f32 %v8926_v45, %v3701_v27  ;;  %v4243_v35 = vadd.f32 %v4242_v58, %v3721_v32  ;;  %v4269_v0 = vmax.f32 %v4112_v8, 0.0  ;;  %v7313_v27 = vld [vmem:[%s9258_s12 + $0x748] sm:$0xff]  }
0x137b   :  { %v4239_v45 = vadd.f32 %v4238_v49, %v3721_v32  ;;  %v4274_v41 = vmax.f32 %v4200_v62, 0.0  ;;  %v7304_v49 = vld [vmem:[%s9258_s12 + $0x7a0] sm:$0xff]   ;;  %v3717_v8 = vrot.slane %v8972_v7, %v8110_v23  ;;  %v7315_v30 = vld [vmem:[%s9258_s12 + $0x708] sm:$0xff]  }
0x137c   :  { %5441 = vmatmul.mubr.bf16.vlgmr.msra.gmra.mxu1 %v4281_v39  ;;  %5482 = vmatmul.mubr.bf16.vlgmr.msra.gmra.mxu0 %v4283_v46  ;;  %v4271_v40 = vmax.f32 %v4155_v11, 0.0  ;;  %v4253_v39 = vmax.f32 %v4108_v63, 0.0  ;;  %v4276_v46 = vmax.f32 %v4243_v35, 0.0  ;;  %v7318_v23 = vld [vmem:[%s9258_s12 + $0x7c0] sm:$0xff]  }
0x137d   :  { %6806 = vmatpush3.bf16.msra.mxu1 %v7259_v14  ;;  %5522 = vmatprep.mubr.bf16.mxu1 %v4286_v50  ;;  %v7290_v14 = vld [vmem:[%s9258_s12 + $0x7f8] sm:$0xff]   ;;  %v4258_v50 = vmax.f32 %v4196_v38, 0.0  ;;  %v7319_v11 = vld [vmem:[%s9258_s12 + $0x700] sm:$0xff]  }
0x137e   :  { %6828 = vmatpush3.bf16.msra.mxu0 %v7260_v61  ;;  %5563 = vmatprep.mubr.bf16.mxu0 %v4288_v52  ;;  %v4255_v61 = vmax.f32 %v4151_v33, 0.0 }
0x137f   :  { %6807 = vmatprep.subr.bf16.mxu1 %v7261_v42  ;;  %6829 = vmatprep.subr.bf16.mxu0 %v7262_v51  ;;  %v4285_v42 = vpack.c.bf16 %v4269_v0, %v4253_v39  ;;  %v7292_v51 = vld [vmem:[%s9258_s12 + $0x7b8] sm:$0xff]  }
0x1380   :  { %v4287_v52 = vpack.c.bf16 %v4271_v40, %v4255_v61 }
0x1381   :  { %6808 = vmatpush3.bf16.msra.mxu1 %v7263_v53  ;;  %v4260_v53 = vmax.f32 %v4239_v45, 0.0 }
0x1382   :  { %6830 = vmatpush3.bf16.msra.mxu0 %v7264_v43  ;;  %6809 = vmatprep.subr.bf16.mxu1 %v7265_v54  ;;  %v7293_v43 = vld [vmem:[%s9258_s12 + $0x770] sm:$0xff]   ;;  %v4290_v54 = vpack.c.bf16 %v4274_v41, %v4258_v50  ;;  %v6314_v50 = vld [vmem:[%s9262_s13 + $0x1] ss:$0 sm:$0xff] }
0x1383   :  { %6831 = vmatprep.subr.bf16.mxu0 %v7266_v55  ;;  %v7294_v55 = vld [vmem:[%s9258_s12 + $0x7f0] sm:$0xff]  }
0x1385   :  { %6810 = vmatpush3.bf16.msra.mxu1 %v7267_v26  ;;  %v4292_v26 = vpack.c.bf16 %v4276_v46, %v4260_v53 }
0x1386   :  { %6832 = vmatpush3.bf16.msra.mxu0 %v7268_v56  ;;  %6811 = vmatprep.subr.bf16.mxu1 %v7269_v21  ;;  %v7295_v56 = vld [vmem:[%s9258_s12 + $0x730] sm:$0xff]  }
0x1387   :  { %6833 = vmatprep.subr.bf16.mxu0 %v7270_v12  ;;  %v7296_v21 = vld [vmem:[%s9258_s12 + $0x7b0] sm:$0xff]   ;;  %v7297_v12 = vld [vmem:[%s9258_s12 + $0x768] sm:$0xff]  }
0x1389   :  { %6812 = vmatpush3.bf16.msra.mxu1 %v7271_v29  ;;  %v7298_v29 = vld [vmem:[%s9258_s12 + $0x7e8] sm:$0xff]  }
0x138a   :  { %6834 = vmatpush3.bf16.msra.mxu0 %v7272_v2  ;;  %6813 = vmatprep.subr.bf16.mxu1 %v7273_v17  ;;  %v7299_v2 = vld [vmem:[%s9258_s12 + $0x728] sm:$0xff]  }
0x138b   :  { %6835 = vmatprep.subr.bf16.mxu0 %v7274_v36  ;;  %v7300_v17 = vld [vmem:[%s9258_s12 + $0x7a8] sm:$0xff]   ;;  %v7301_v36 = vld [vmem:[%s9258_s12 + $0x760] sm:$0xff]  }
0x138d   :  { %6814 = vmatpush3.bf16.msra.mxu1 %v7275_v4  ;;  %v7303_v4 = vld [vmem:[%s9258_s12 + $0x720] sm:$0xff]  }
0x138e   :  { %6836 = vmatpush3.bf16.msra.mxu0 %v7276_v9  ;;  %6815 = vmatprep.subr.bf16.mxu1 %v7277_v10  ;;  %v7305_v9 = vld [vmem:[%s9258_s12 + $0x758] sm:$0xff]  }
0x138f   :  { %6837 = vmatprep.subr.bf16.mxu0 %v7278_v57  ;;  %v7306_v10 = vld [vmem:[%s9258_s12 + $0x7d8] sm:$0xff]  }
0x1390   :  { %v7307_v57 = vld [vmem:[%s9258_s12 + $0x718] sm:$0xff]  }
0x1391   :  { %6816 = vmatpush3.bf16.msra.mxu1 %v7279_v34  ;;  %v7308_v34 = vld [vmem:[%s9258_s12 + $0x798] sm:$0xff]  }
0x1392   :  { %6838 = vmatpush3.bf16.msra.mxu0 %v7280_v24  ;;  %6817 = vmatprep.subr.bf16.mxu1 %v7281_v15  ;;  %v7309_v24 = vld [vmem:[%s9258_s12 + $0x750] sm:$0xff]  }
0x1393   :  { %6839 = vmatprep.subr.bf16.mxu0 %v7282_v19  ;;  %v7310_v15 = vld [vmem:[%s9258_s12 + $0x7d0] sm:$0xff]  }
0x1394   :  { %v7311_v19 = vld [vmem:[%s9258_s12 + $0x710] sm:$0xff]  }
0x1395   :  { %6818 = vmatpush3.bf16.msra.mxu1 %v7283_v3  ;;  %v3709_v3 = vrot.slane %v8972_v7, %v8107_v28  ;;  %v7317_v28 = vld [vmem:[%s9258_s12 + $0x740] sm:$0xff]  }
0x1396   :  { %6840 = vmatpush3.bf16.msra.mxu0 %v7284_v59  ;;  %6819 = vmatprep.subr.bf16.mxu1 %v7285_v60  ;;  %v7316_v59 = vld [vmem:[%s9258_s12 + $0x788] sm:$0xff]   ;;  %v4241_v60 = vadd.f32 %v9075_v22, %v3717_v8  ;;  %v7320_v22 = vld [vmem:[%s9258_s12 + $0x780] sm:$0xff]  }
0x1397   :  { %6841 = vmatprep.subr.bf16.mxu0 %v7286_v5  ;;  %v4198_v58 = vadd.f32 %v9070_v13, %v3709_v3  ;;  %v4194_v7 = vadd.f32 %v9042_v20, %v3709_v3  ;;  %v4237_v13 = vadd.f32 %v9047_v1, %v3717_v8 }
0x1398   :  { %v4275_v5 = vmax.f32 %v4241_v60, 0.0 }
0x1399   :  { %6820 = vmatpush3.bf16.msra.mxu1 %v7287_v37  ;;  %v4273_v32 = vmax.f32 %v4198_v58, 0.0  ;;  %v4257_v63 = vmax.f32 %v4194_v7, 0.0  ;;  %v4259_v62 = vmax.f32 %v4237_v13, 0.0 }
0x139a   :  { %6842 = vmatpush3.bf16.msra.mxu0 %v7288_v6  ;;  %6849 = vmatprep.subr.bf16.mxu1 %v7289_v44 }
0x139b   :  { %6871 = vmatprep.subr.bf16.mxu0 %v7290_v14  ;;  %v4289_v20 = vpack.c.bf16 %v4273_v32, %v4257_v63  ;;  %v4291_v1 = vpack.c.bf16 %v4275_v5, %v4259_v62 }
0x139c   :  { %5523 = vmatmul.mubr.bf16.vlgmr.msra.gmra.mxu1 %v4285_v42 }
0x139d   :  { %5564 = vmatmul.mubr.bf16.vlgmr.msra.gmra.mxu0 %v4287_v52  ;;  %6850 = vmatpush3.bf16.msra.mxu1 %v7291_v47 }
0x139e   :  { %5604 = vmatprep.mubr.bf16.mxu1 %v4290_v54  ;;  %6872 = vmatpush3.bf16.msra.mxu0 %v7292_v51 }
0x139f   :  { %5645 = vmatprep.mubr.bf16.mxu0 %v4292_v26  ;;  %6851 = vmatprep.subr.bf16.mxu1 %v7293_v43 }
0x13a0   :  { %6873 = vmatprep.subr.bf16.mxu0 %v7294_v55 }
0x13a1   :  { %6852 = vmatpush3.bf16.msra.mxu1 %v7295_v56 }
0x13a2   :  { %6874 = vmatpush3.bf16.msra.mxu0 %v7296_v21  ;;  %6853 = vmatprep.subr.bf16.mxu1 %v7297_v12 }
0x13a3   :  { %6875 = vmatprep.subr.bf16.mxu0 %v7298_v29 }
0x13a5   :  { %6854 = vmatpush3.bf16.msra.mxu1 %v7299_v2 }
0x13a6   :  { %6876 = vmatpush3.bf16.msra.mxu0 %v7300_v17  ;;  %6855 = vmatprep.subr.bf16.mxu1 %v7301_v36 }
0x13a7   :  { %6877 = vmatprep.subr.bf16.mxu0 %v7302_v48 }
0x13a9   :  { %6856 = vmatpush3.bf16.msra.mxu1 %v7303_v4 }
0x13aa   :  { %6878 = vmatpush3.bf16.msra.mxu0 %v7304_v49  ;;  %6857 = vmatprep.subr.bf16.mxu1 %v7305_v9 }
0x13ab   :  { %6879 = vmatprep.subr.bf16.mxu0 %v7306_v10 }
0x13ad   :  { %6858 = vmatpush3.bf16.msra.mxu1 %v7307_v57 }
0x13ae   :  { %6880 = vmatpush3.bf16.msra.mxu0 %v7308_v34  ;;  %6859 = vmatprep.subr.bf16.mxu1 %v7309_v24 }
0x13af   :  { %6881 = vmatprep.subr.bf16.mxu0 %v7310_v15 }
0x13b1   :  { %6860 = vmatpush3.bf16.msra.mxu1 %v7311_v19 }
0x13b2   :  { %6882 = vmatpush3.bf16.msra.mxu0 %v7312_v25  ;;  %6861 = vmatprep.subr.bf16.mxu1 %v7313_v27 }
0x13b3   :  { %6883 = vmatprep.subr.bf16.mxu0 %v7314_v31 }
0x13b5   :  { %6862 = vmatpush3.bf16.msra.mxu1 %v7315_v30 }
0x13b6   :  { %6884 = vmatpush3.bf16.msra.mxu0 %v7316_v59  ;;  %6863 = vmatprep.subr.bf16.mxu1 %v7317_v28 }
0x13b7   :  { %6885 = vmatprep.subr.bf16.mxu0 %v7318_v23 }
0x13b9   :  { %6864 = vmatpush3.bf16.msra.mxu1 %v7319_v11 }
0x13ba   :  { %6886 = vmatpush3.bf16.msra.mxu0 %v7320_v22 }
0x13bc   :  { %5605 = vmatmul.mubr.bf16.vlgmr.msra.gmra.mxu1 %v4289_v20 }
0x13bd   :  { %5646 = vmatmul.mubr.bf16.vlgmr.msra.gmra.mxu0 %v4291_v1 }
0x141c   :  { %v6733_v33 = vpop.f32.mrf.mxu1  ;;  %v6755_v35 = vpop.f32.mrf.mxu0 }
0x141e   :  { %v6734_v37 = vpop.f32.mrf.mxu1  ;;  %v6756_v0 = vpop.f32.mrf.mxu0 }
0x141f   :  { %v6735_v42 = vadd.f32 %v6734_v37, %v6733_v33  ;;  %v6757_v26 = vadd.f32 %v6756_v0, %v6755_v35 }
0x1420   :  { %v6736_v38 = vpop.f32.mrf.mxu1  ;;  %v6758_v6 = vpop.f32.mrf.mxu0 }
0x1421   :  { %v5361_v53 = vadd.f32 %v6735_v42, %v6314_v50 }
0x1422   :  { %v6737_v44 = vpop.f32.mrf.mxu1  ;;  %v6759_v45 = vpop.f32.mrf.mxu0 }
0x1423   :  { %v6738_v43 = vadd.f32 %v6737_v44, %v6736_v38  ;;  %v5402_v21 = vadd.f32 %v6757_v26, %v5361_v53  ;;  %v6760_v17 = vadd.f32 %v6759_v45, %v6758_v6  ;;  %v6445_v26 = vld [vmem:[%s9263_s14 + $0x1] ss:$0 sm:$0xff] }
0x1425   :  { %v5364_v12 = vadd.f32 %v6738_v43, %v6314_v50 }
0x1427   :  { %v5405_v4 = vadd.f32 %v6760_v17, %v5364_v12 }
0x143c   :  { %v6777_v40 = vpop.f32.mrf.mxu1  ;;  %v6799_v14 = vpop.f32.mrf.mxu0 }
0x143e   :  { %v6778_v39 = vpop.f32.mrf.mxu1  ;;  %v6800_v41 = vpop.f32.mrf.mxu0 }
0x143f   :  { %v6779_v56 = vadd.f32 %v6778_v39, %v6777_v40  ;;  %v6801_v49 = vadd.f32 %v6800_v41, %v6799_v14 }
0x1440   :  { %v6780_v61 = vpop.f32.mrf.mxu1  ;;  %v6802_v46 = vpop.f32.mrf.mxu0 }
0x1441   :  { %v5443_v36 = vadd.f32 %v6779_v56, %v5402_v21  ;;  %v6446_v21 = vld [vmem:[%s9264_s15 + $0x1] ss:$0 sm:$0xff] }
0x1442   :  { %v6781_v47 = vpop.f32.mrf.mxu1  ;;  %v6803_v52 = vpop.f32.mrf.mxu0 }
0x1443   :  { %v6782_v48 = vadd.f32 %v6781_v47, %v6780_v61  ;;  %v5484_v34 = vadd.f32 %v6801_v49, %v5443_v36  ;;  %v6804_v15 = vadd.f32 %v6803_v52, %v6802_v46 }
0x1445   :  { %v5446_v24 = vadd.f32 %v6782_v48, %v5405_v4 }
0x1447   :  { %v5487_v3 = vadd.f32 %v6804_v15, %v5446_v24 }
0x145c   :  { %v6821_v51 = vpop.f32.mrf.mxu1 }
0x145d   :  { %v6843_v54 = vpop.f32.mrf.mxu0 }
0x145e   :  { %v6822_v55 = vpop.f32.mrf.mxu1 }
0x145f   :  { %v6844_v29 = vpop.f32.mrf.mxu0  ;;  %v6823_v9 = vadd.f32 %v6822_v55, %v6821_v51 }
0x1460   :  { %v6824_v2 = vpop.f32.mrf.mxu1  ;;  %v6845_v8 = vadd.f32 %v6844_v29, %v6843_v54 }
0x1461   :  { %v6846_v10 = vpop.f32.mrf.mxu0  ;;  %v5525_v19 = vadd.f32 %v6823_v9, %v5484_v34 }
0x1462   :  { %v6825_v57 = vpop.f32.mrf.mxu1 }
0x1463   :  { %v6826_v25 = vadd.f32 %v6825_v57, %v6824_v2  ;;  %v6847_v27 = vpop.f32.mrf.mxu0  ;;  %v5566_v59 = vadd.f32 %v6845_v8, %v5525_v19  ;;  %v6447_v2 = vld [vmem:[%s9266_s16] ss:$0 sm:$0xff] }
0x1464   :  { %v6848_v13 = vadd.f32 %v6847_v27, %v6846_v10 }
0x1465   :  { %v5528_v28 = vadd.f32 %v6826_v25, %v5487_v3 }
0x1467   :  { %v5569_v63 = vadd.f32 %v6848_v13, %v5528_v28 }
0x147c   :  { %v6865_v31 = vpop.f32.mrf.mxu1 }
0x147d   :  { %v6887_v30 = vpop.f32.mrf.mxu0 }
0x147e   :  { %v6866_v58 = vpop.f32.mrf.mxu1 }
0x147f   :  { %v6867_v60 = vadd.f32 %v6866_v58, %v6865_v31  ;;  %v6888_v23 = vpop.f32.mrf.mxu0 }
0x1480   :  { %v6868_v7 = vpop.f32.mrf.mxu1  ;;  %v6889_v32 = vadd.f32 %v6888_v23, %v6887_v30 }
0x1481   :  { %v5607_v11 = vadd.f32 %v6867_v60, %v5566_v59  ;;  %v6890_v22 = vpop.f32.mrf.mxu0 }
0x1482   :  { %v6869_v5 = vpop.f32.mrf.mxu1 }
0x1483   :  { %v5648_v62 = vadd.f32 %v6889_v32, %v5607_v11  ;;  %v6870_v20 = vadd.f32 %v6869_v5, %v6868_v7  ;;  %v6891_v1 = vpop.f32.mrf.mxu0 }
0x1484   :  { %v6892_v35 = vadd.f32 %v6891_v1, %v6890_v22 }
0x1485   :  { %v5610_v33 = vadd.f32 %v6870_v20, %v5569_v63  ;;  %v5654_v37 = vadd.f32 %v5648_v62, %v8680_v16 }
0x1487   :  { %v5651_v0 = vadd.f32 %v6892_v35, %v5610_v33  ;;  %v5660_v38 = vsel %vm174_vm1, %v5654_v37, 0.0 }
0x1488   :  { %5661 = vadd.xlane.f32.xlu1 %v5660_v38 }
0x1489   :  { %v5655_v6 = vadd.f32 %v5651_v0, %v8682_v18  ;;  %v23_v18 = vstv %s9265_s17 }
0x148a   :  { %24 = vst [vmem:[#allocation2] sm:$0x1] %v23_v18 }
0x148b   :  { %v5663_v44 = vsel %vm174_vm1, %v5655_v6, 0.0 }
0x148c   :  { %5664 = vadd.xlane.f32.xlu0 %v5663_v44 }
0x1491   :  { %v6448_v34 = vld [vmem:[#allocation2] ss:$0 sm:$0xff] }
0x1511   :  { %v5662_v40 = vpop.xlane.xlu1 %5661 }
0x1512   :  { %v5666_v45 = vmul.f32 0.03125, %v5662_v40 }
0x1514   :  { %v5668_v14 = vsub.f32 %v5654_v37, %v5666_v45 }
0x1515   :  { %v5665_v39 = vpop.xlane.xlu0 %5664 }
0x1516   :  { %v5667_v41 = vmul.f32 0.03125, %v5665_v39  ;;  %v5670_v61 = vmul.f32 %v5668_v14, %v5668_v14 }
0x1518   :  { %v5669_v46 = vsub.f32 %v5655_v6, %v5667_v41  ;;  %v5672_v47 = vsel %vm174_vm1, %v5670_v61, 0.0 }
0x1519   :  { %5673 = vadd.xlane.f32.xlu1 %v5672_v47 }
0x151a   :  { %v5671_v16 = vmul.f32 %v5669_v46, %v5669_v46 }
0x151c   :  { %v5675_v42 = vsel %vm174_vm1, %v5671_v16, 0.0 }
0x151d   :  { %5676 = vadd.xlane.f32.xlu0 %v5675_v42 }
0x15a2   :  { %v5674_v50 = vpop.xlane.xlu1 %5673 }
0x15a3   :  { %v5678_v51 = vmul.f32 0.03125, %v5674_v50 }
0x15a5   :  { %v5680_v52 = vadd.f32 1e-05, %v5678_v51 }
0x15a6   :  { %v5677_v53 = vpop.xlane.xlu0 %5676 }
0x15a7   :  { %7397 = vrsqrt.f32 %v5680_v52  ;;  %v5679_v43 = vmul.f32 0.03125, %v5677_v53 }
0x15a9   :  { %v5681_v54 = vadd.f32 1e-05, %v5679_v43 }
0x15ab   :  { %7399 = vrsqrt.f32 %v5681_v54 }
0x15b4   :  { %v7398_v55 = vpop.eup %7397 }
0x15b5   :  { %v5684_v56 = vmul.f32 %v7398_v55, %v5668_v14 }
0x15b7   :  { %v5692_v12 = vmul.f32 %v6445_v26, %v5684_v56 }
0x15b8   :  { %v7400_v29 = vpop.eup %7399 }
0x15b9   :  { %v5700_v17 = vadd.f32 %v6446_v21, %v5692_v12  ;;  %v5685_v36 = vmul.f32 %v7400_v29, %v5669_v46 }
0x15bb   :  { %v5709_v48 = vmul.f32 %v6447_v2, %v5700_v17  ;;  %v5693_v4 = vmul.f32 %v6445_v26, %v5685_v36 }
0x15bd   :  { %v5711_v49 = vsel %vm174_vm1, %v5709_v48, 0.0  ;;  %v5701_v9 = vadd.f32 %v6446_v21, %v5693_v4 }
0x15be   :  { %5712 = vadd.xlane.f32.xlu1 %v5711_v49 }
0x15bf   :  { %v5710_v10 = vmul.f32 %v6447_v2, %v5701_v9 }
0x15c1   :  { %v5714_v57 = vsel %vm174_vm1, %v5710_v10, 0.0 }
0x15c2   :  { %5715 = vadd.xlane.f32.xlu0 %v5714_v57 }
0x1647   :  { %v5713_v24 = vpop.xlane.xlu1 %5712 }
0x1648   :  { %v5724_v15 = vadd.f32 %v6448_v34, %v5713_v24 }
0x164a   :  { %5727 = vst.msk [vmem:[%s9267_s18] sm:$0xff] %vm5726_vm5, %v5724_v15 }
0x164b   :  { %v5716_v19 = vpop.xlane.xlu0 %5715 }
0x164c   :  { %v5725_v25 = vadd.f32 %v6448_v34, %v5716_v19 }
0x164e   :  { %5728 = vst.msk [vmem:[%s9267_s18 + $0x8] sm:$0xff] %vm5726_vm5, %v5725_v25 }

</bundles_post_ra>
